<compile_context>
chip_gen: v7x
topology: tpu7x:2x2x1
jax: 0.10.0
libtpu: 0.0.40
codegen_flags: <defaults>
</compile_context>

<pallas_src>
import jax
import jax.numpy as jnp
from jax.experimental import pallas as pl
from jax.experimental.pallas import tpu as pltpu

HIDDEN = 1024
TILE_CAP = 512  # multiple of 128 (v5e MXU tile) and 256 (v6e/v7x MXU tile)


def _round_up(x, m):
    return ((x + m - 1) // m) * m


def mlp_kernel(x_ref, w1_ref, b1_ref, w2_ref, b2_ref, w3_ref, b3_ref, o_ref):
    # fc1 + bias + relu   (dropout1 is identity in eval mode); carry bf16.
    h = jnp.dot(x_ref[...], w1_ref[...], preferred_element_type=jnp.float32)
    h = jnp.maximum(h + b1_ref[...], 0.0).astype(jnp.bfloat16)
    # fc2 + bias + relu   (dropout2 is identity in eval mode); carry bf16.
    h = jnp.dot(h, w2_ref[...], preferred_element_type=jnp.float32)
    h = jnp.maximum(h + b2_ref[...], 0.0).astype(jnp.bfloat16)
    # fc3 + bias, then numerically stable softmax over dim=1 (class axis), f32.
    logits = jnp.dot(h, w3_ref[...], preferred_element_type=jnp.float32)
    logits = logits + b3_ref[...]
    m = jnp.max(logits, axis=1, keepdims=True)
    e = jnp.exp(logits - m)
    denom = jnp.sum(e, axis=1, keepdims=True)
    o_ref[...] = (e * pl.reciprocal(denom, approx=False)).astype(o_ref.dtype)


def _choose_batch_tile(B):
    Bp8 = _round_up(max(B, 8), 8)
    tb = min(TILE_CAP, Bp8)
    # v7x has 2 TensorCores per chip: whenever the batch is larger than one
    # 8-row tile, make the "parallel" grid axis span >= 2 steps.
    if Bp8 > 8 and Bp8 // tb < 2:
        tb = _round_up((Bp8 + 1) // 2, 8)
    return tb


def prepare_params(params):
    """One-time cast of weights to bf16 (native MXU input dtype); biases stay f32."""
    w1, b1, w2, b2, w3, b3 = params
    return (w1.astype(jnp.bfloat16), b1,
            w2.astype(jnp.bfloat16), b2,
            w3.astype(jnp.bfloat16), b3)


def neural_net_forward(x, params_bf16, *, tb=None):
    """x: [B, input_size] float32; params_bf16 from prepare_params().
    Returns softmax probabilities [B, output_size] float32."""
    w1, b1, w2, b2, w3, b3 = params_bf16
    B, input_size = x.shape
    output_size = w3.shape[1]

    if tb is None:
        tb = _choose_batch_tile(B)
    Bp = _round_up(B, tb)
    if Bp != B:
        x = jnp.pad(x, ((0, Bp - B), (0, 0)))
    x_bf = x.astype(jnp.bfloat16)

    # Weights/biases: constant block index -> DMA'd once and VMEM-resident
    # across all batch tiles; single-buffered (no second redundant buffer).
    resident = lambda shape: pl.BlockSpec(shape, lambda i: (0, 0),
                                          pipeline_mode=pl.Buffered(1))

    out = pl.pallas_call(
        mlp_kernel,
        out_shape=jax.ShapeDtypeStruct((Bp, output_size), jnp.float32),
        grid_spec=pltpu.PrefetchScalarGridSpec(
            num_scalar_prefetch=0,
            grid=(Bp // tb,),
            in_specs=[
                pl.BlockSpec((tb, input_size), lambda i: (i, 0)),  # x (batch-tiled)
                resident((input_size, HIDDEN)),                    # w1
                resident((1, HIDDEN)),                             # b1
                resident((HIDDEN, HIDDEN)),                        # w2
                resident((1, HIDDEN)),                             # b2
                resident((HIDDEN, output_size)),                   # w3
                resident((1, output_size)),                        # b3
            ],
            out_specs=pl.BlockSpec((tb, output_size), lambda i: (i, 0)),
        ),
        compiler_params=pltpu.CompilerParams(
            dimension_semantics=("parallel",),
            vmem_limit_bytes=32 << 20,
        ),
    )(x_bf, w1, b1, w2, b2, w3, b3)

    return out[:B]


def init_params(key, input_size, output_size):
    """Deterministic synthetic init (shapes match nn.Linear layers, transposed)."""
    k1, k2, k3, k4, k5, k6 = jax.random.split(key, 6)
    scale1 = 1.0 / jnp.sqrt(input_size)
    scale2 = 1.0 / jnp.sqrt(HIDDEN)
    w1 = jax.random.uniform(k1, (input_size, HIDDEN), jnp.float32, -scale1, scale1)
    b1 = jax.random.uniform(k2, (1, HIDDEN), jnp.float32, -scale1, scale1)
    w2 = jax.random.uniform(k3, (HIDDEN, HIDDEN), jnp.float32, -scale2, scale2)
    b2 = jax.random.uniform(k4, (1, HIDDEN), jnp.float32, -scale2, scale2)
    w3 = jax.random.uniform(k5, (HIDDEN, output_size), jnp.float32, -scale2, scale2)
    b3 = jax.random.uniform(k6, (1, output_size), jnp.float32, -scale2, scale2)
    return (w1, b1, w2, b2, w3, b3)


def reference_forward_f32(x, params):
    w1, b1, w2, b2, w3, b3 = params
    h = jnp.maximum(x @ w1 + b1, 0.0)
    h = jnp.maximum(h @ w2 + b2, 0.0)
    logits = h @ w3 + b3
    return jax.nn.softmax(logits, axis=1)


def reference_forward_bf16(x, params):
    """Emulates the kernel's bf16 matmul inputs / bf16 activation carry, f32 accumulate."""
    w1, b1, w2, b2, w3, b3 = params
    bf = lambda a: a.astype(jnp.bfloat16).astype(jnp.float32)
    h = jnp.maximum(
        jnp.dot(bf(x), bf(w1), precision=jax.lax.Precision.HIGHEST) + b1, 0.0)
    h = jnp.maximum(
        jnp.dot(bf(h), bf(w2), precision=jax.lax.Precision.HIGHEST) + b2, 0.0)
    logits = jnp.dot(bf(h), bf(w3), precision=jax.lax.Precision.HIGHEST) + b3
    return jax.nn.softmax(logits, axis=1)


if __name__ == "__main__":
    key = jax.random.PRNGKey(0)
    kx, kp = jax.random.split(key)

    batch = 2
    input_size = 32     # e.g. EMG feature vector length
    output_size = 8     # number of gesture classes

    x = jax.random.normal(kx, (batch, input_size), dtype=jnp.float32)
    params = init_params(kp, input_size, output_size)
    params_dev = prepare_params(params)   # one-time bf16 cast, outside forward

    out = neural_net_forward(x, params_dev)
    out = jax.block_until_ready(out)

    ref_bf16 = reference_forward_bf16(x, params)
    ref_f32 = reference_forward_f32(x, params)

    assert out.shape == (batch, output_size)
    # Tight check against a reference using the same bf16 inputs/activations.
    assert jnp.allclose(out, ref_bf16, atol=5e-3, rtol=5e-2)
    # Loose check against the full-f32 reference (bf16 rounding tolerance).
    assert jnp.allclose(out, ref_f32, atol=3e-2, rtol=3e-2)
    assert jnp.allclose(jnp.sum(out, axis=1), 1.0, atol=1e-5)

    print("KERNEL_OK")
</pallas_src>

<mosaic_0001>
module attributes {stable_mosaic.version = 11 : i64} {
  func.func @mlp_kernel(%arg0: i32, %arg1: memref<8x32xbf16, #tpu.memory_space<vmem>>, %arg2: memref<32x1024xbf16, #tpu.memory_space<vmem>>, %arg3: memref<1x1024xf32, #tpu.memory_space<vmem>>, %arg4: memref<1024x1024xbf16, #tpu.memory_space<vmem>>, %arg5: memref<1x1024xf32, #tpu.memory_space<vmem>>, %arg6: memref<1024x8xbf16, #tpu.memory_space<vmem>>, %arg7: memref<1x8xf32, #tpu.memory_space<vmem>>, %arg8: memref<8x8xf32, #tpu.memory_space<vmem>>) attributes {dimension_semantics = [#tpu.dimension_semantics<parallel>], iteration_bounds = array<i64: 1>, scalar_prefetch = 0 : i64, scratch_operands = 0 : i64, tpu.core_type = #tpu.core_type<tc>, window_params = [{transform_indices = @transform_0, window_bounds = array<i64: 8, 32>}, {pipeline_mode = #tpu.pipeline_mode<synchronous>, transform_indices = @transform_1, window_bounds = array<i64: 32, 1024>}, {pipeline_mode = #tpu.pipeline_mode<synchronous>, transform_indices = @transform_2, window_bounds = array<i64: 1, 1024>}, {pipeline_mode = #tpu.pipeline_mode<synchronous>, transform_indices = @transform_3, window_bounds = array<i64: 1024, 1024>}, {pipeline_mode = #tpu.pipeline_mode<synchronous>, transform_indices = @transform_4, window_bounds = array<i64: 1, 1024>}, {pipeline_mode = #tpu.pipeline_mode<synchronous>, transform_indices = @transform_5, window_bounds = array<i64: 1024, 8>}, {pipeline_mode = #tpu.pipeline_mode<synchronous>, transform_indices = @transform_6, window_bounds = array<i64: 1, 8>}, {transform_indices = @transform_7, window_bounds = array<i64: 8, 8>}]} {
    %c0 = arith.constant 0 : index
    %c0_0 = arith.constant 0 : index
    %0 = vector.load %arg1[%c0, %c0_0] : memref<8x32xbf16, #tpu.memory_space<vmem>>, vector<8x32xbf16>
    %c0_1 = arith.constant 0 : index
    %c0_2 = arith.constant 0 : index
    %1 = vector.load %arg2[%c0_1, %c0_2] : memref<32x1024xbf16, #tpu.memory_space<vmem>>, vector<32x1024xbf16>
    %cst = arith.constant dense<0.000000e+00> : vector<8x1024xf32>
    %2 = tpu.matmul %0, %1, %cst {dimension_numbers = #tpu.dot_dimension_numbers<[1], [0], [0], [1], [0, 0, 1, 1], [], []>} : vector<8x32xbf16>, vector<32x1024xbf16>, vector<8x1024xf32> -> vector<8x1024xf32>
    %c0_3 = arith.constant 0 : index
    %c0_4 = arith.constant 0 : index
    %3 = vector.load %arg3[%c0_3, %c0_4] : memref<1x1024xf32, #tpu.memory_space<vmem>>, vector<1x1024xf32>
    %4 = vector.broadcast %3 : vector<1x1024xf32> to vector<8x1024xf32>
    %5 = arith.addf %2, %4 : vector<8x1024xf32>
    %cst_5 = arith.constant 0.000000e+00 : f32
    %6 = vector.broadcast %cst_5 : f32 to vector<8x1024xf32>
    %7 = arith.maximumf %5, %6 : vector<8x1024xf32>
    %8 = arith.truncf %7 : vector<8x1024xf32> to vector<8x1024xbf16>
    %c0_6 = arith.constant 0 : index
    %c0_7 = arith.constant 0 : index
    %9 = vector.load %arg4[%c0_6, %c0_7] : memref<1024x1024xbf16, #tpu.memory_space<vmem>>, vector<1024x1024xbf16>
    %cst_8 = arith.constant dense<0.000000e+00> : vector<8x1024xf32>
    %10 = tpu.matmul %8, %9, %cst_8 {dimension_numbers = #tpu.dot_dimension_numbers<[1], [0], [0], [1], [0, 0, 1, 1], [], []>} : vector<8x1024xbf16>, vector<1024x1024xbf16>, vector<8x1024xf32> -> vector<8x1024xf32>
    %c0_9 = arith.constant 0 : index
    %c0_10 = arith.constant 0 : index
    %11 = vector.load %arg5[%c0_9, %c0_10] : memref<1x1024xf32, #tpu.memory_space<vmem>>, vector<1x1024xf32>
    %12 = vector.broadcast %11 : vector<1x1024xf32> to vector<8x1024xf32>
    %13 = arith.addf %10, %12 : vector<8x1024xf32>
    %cst_11 = arith.constant 0.000000e+00 : f32
    %14 = vector.broadcast %cst_11 : f32 to vector<8x1024xf32>
    %15 = arith.maximumf %13, %14 : vector<8x1024xf32>
    %16 = arith.truncf %15 : vector<8x1024xf32> to vector<8x1024xbf16>
    %c0_12 = arith.constant 0 : index
    %c0_13 = arith.constant 0 : index
    %17 = vector.load %arg6[%c0_12, %c0_13] : memref<1024x8xbf16, #tpu.memory_space<vmem>>, vector<1024x8xbf16>
    %cst_14 = arith.constant dense<0.000000e+00> : vector<8x8xf32>
    %18 = tpu.matmul %16, %17, %cst_14 {dimension_numbers = #tpu.dot_dimension_numbers<[1], [0], [0], [1], [0, 0, 1, 1], [], []>} : vector<8x1024xbf16>, vector<1024x8xbf16>, vector<8x8xf32> -> vector<8x8xf32>
    %c0_15 = arith.constant 0 : index
    %c0_16 = arith.constant 0 : index
    %19 = vector.load %arg7[%c0_15, %c0_16] : memref<1x8xf32, #tpu.memory_space<vmem>>, vector<1x8xf32>
    %20 = vector.broadcast %19 : vector<1x8xf32> to vector<8x8xf32>
    %21 = arith.addf %18, %20 : vector<8x8xf32>
    %cst_17 = arith.constant dense<0xFF800000> : vector<8xf32>
    %22 = vector.multi_reduction <maximumf>, %21, %cst_17 [1] : vector<8x8xf32> to vector<8xf32>
    %23 = vector.shape_cast %22 : vector<8xf32> to vector<8x1xf32>
    %24 = vector.broadcast %23 : vector<8x1xf32> to vector<8x8xf32>
    %25 = arith.subf %21, %24 : vector<8x8xf32>
    %26 = math.exp %25 : vector<8x8xf32>
    %cst_18 = arith.constant dense<0.000000e+00> : vector<8xf32>
    %27 = vector.multi_reduction <add>, %26, %cst_18 [1] : vector<8x8xf32> to vector<8xf32>
    %28 = vector.shape_cast %27 : vector<8xf32> to vector<8x1xf32>
    %29 = tpu.reciprocal %28 : vector<8x1xf32> -> vector<8x1xf32>
    %30 = vector.broadcast %29 : vector<8x1xf32> to vector<8x8xf32>
    %31 = arith.mulf %26, %30 : vector<8x8xf32>
    %c0_19 = arith.constant 0 : index
    %c0_20 = arith.constant 0 : index
    %32 = vector.load %arg8[%c0_19, %c0_20] : memref<8x8xf32, #tpu.memory_space<vmem>>, vector<8x8xf32>
    tpu.vector_store %arg8[%c0_19, %c0_20], %31 {strides = array<i32>} : memref<8x8xf32, #tpu.memory_space<vmem>>, vector<8x8xf32>,
    return
  }
  func.func @transform_0(%arg0: i32) -> (i32, i32) {
    %c0_i32 = arith.constant 0 : i32
    %c0_i32_0 = arith.constant 0 : i32
    return %arg0, %c0_i32 : i32, i32
  }
  func.func @transform_1(%arg0: i32) -> (i32, i32) {
    %c0_i32 = arith.constant 0 : i32
    %c0_i32_0 = arith.constant 0 : i32
    %c0_i32_1 = arith.constant 0 : i32
    return %c0_i32, %c0_i32_0 : i32, i32
  }
  func.func @transform_2(%arg0: i32) -> (i32, i32) {
    %c0_i32 = arith.constant 0 : i32
    %c0_i32_0 = arith.constant 0 : i32
    %c0_i32_1 = arith.constant 0 : i32
    return %c0_i32, %c0_i32_0 : i32, i32
  }
  func.func @transform_3(%arg0: i32) -> (i32, i32) {
    %c0_i32 = arith.constant 0 : i32
    %c0_i32_0 = arith.constant 0 : i32
    %c0_i32_1 = arith.constant 0 : i32
    return %c0_i32, %c0_i32_0 : i32, i32
  }
  func.func @transform_4(%arg0: i32) -> (i32, i32) {
    %c0_i32 = arith.constant 0 : i32
    %c0_i32_0 = arith.constant 0 : i32
    %c0_i32_1 = arith.constant 0 : i32
    return %c0_i32, %c0_i32_0 : i32, i32
  }
  func.func @transform_5(%arg0: i32) -> (i32, i32) {
    %c0_i32 = arith.constant 0 : i32
    %c0_i32_0 = arith.constant 0 : i32
    %c0_i32_1 = arith.constant 0 : i32
    return %c0_i32, %c0_i32_0 : i32, i32
  }
  func.func @transform_6(%arg0: i32) -> (i32, i32) {
    %c0_i32 = arith.constant 0 : i32
    %c0_i32_0 = arith.constant 0 : i32
    %c0_i32_1 = arith.constant 0 : i32
    return %c0_i32, %c0_i32_0 : i32, i32
  }
  func.func @transform_7(%arg0: i32) -> (i32, i32) {
    %c0_i32 = arith.constant 0 : i32
    %c0_i32_0 = arith.constant 0 : i32
    return %arg0, %c0_i32 : i32, i32
  }
}

</mosaic_0001>

<bundles_post_ra>
// kernel: tpu_custom_call.1
= control target key start
LH: loop header
LB: loop body
LE: loop exit
PB: predicated region body
PF: predicated region fallthrough
CT: control target
= control target key end

     0   :  { %12 = vsyncpa [#allocation3], 0  ;;  %s6374_s0 = inlined_call_operand.hbm [shape: bf16[8,32], index: 0, kind: input, shape index: {}]   ;;  %s6375_s1 = inlined_call_operand.hbm [shape: bf16[32,1024], index: 1, kind: input, shape index: {}]   ;;  %s6376_s2 = inlined_call_operand.hbm [shape: f32[1,1024], index: 2, kind: input, shape index: {}]   ;;  %s6377_s3 = inlined_call_operand.hbm [shape: bf16[1024,1024], index: 3, kind: input, shape index: {}]   ;;  %s6378_s4 = inlined_call_operand.hbm [shape: f32[1,1024], index: 4, kind: input, shape index: {}]   ;;  %s6379_s5 = inlined_call_operand.vmem [shape: bf16[1024,8], index: 5, kind: input, shape index: {}]   ;;  %s6380_s6 = inlined_call_operand.hbm [shape: f32[1,8], index: 6, kind: input, shape index: {}]   ;;  %s6381_s7 = inlined_call_operand.hbm [shape: f32[8,8], index: 7, kind: output, shape index: {}]  }
   0x1   :  { %13 = vsyncpa [#allocation6], 0 }
   0x2   :  { %14 = vsyncpa [#allocation9], 0 }
   0x3   :  { %15 = vsyncpa [#allocation12], 0 }
   0x4   :  { %16 = vsyncpa [#allocation4], 0  ;;  %s5905_s24 = smov [#allocation5]   ;;  %s5741_s28 = scalar_lea.hbm %s6375_s1, 2048 }
   0x5   :  { %s32_s25 = sshll.u32 %s5905_s24, 4  ;;  %p5742_p0 = scmp.ne.s32.totalorder %s6375_s1, %s5741_s28  ;;  %s33_s25 = int_to_ptr.vmem [resolvable:$true] %s32_s25 }
   0x6   :  { %p5745_p1 = scmp.lt.u32.totalorder %s5741_s28, %s6375_s1 }
   0x8   :  { %p5747_p2 = pnand %p5745_p1, %p5742_p0 }
   0xa   :  { %5750 = shalt.err (!%p5747_p2)
}
   0xb   :  { %s5751_s10 = scalar_lea.vmem %s33_s25, 2048  ;;  %p5756_p4 = scmp.lt.s32.totalorder %s33_s25, %s33_s25 }
   0xc   :  { %p5752_p3 = scmp.ne.s32.totalorder %s33_s25, %s5751_s10  ;;  %p5757_p5 = scmp.lt.s32.totalorder %s5751_s10, %s5751_s10 }
   0xe   :  { %p5758_p6 = por %p5757_p5, %p5756_p4 }
  0x10   :  { %p5759_p7 = pnand %p5758_p6, %p5752_p3 }
  0x12   :  { %5762 = shalt.err (!%p5759_p7)
}
  0x13   :  { %s5906_s11 = smov 512   ;;  %s5907_s12 = smov 32  }
  0x14   :  { %38 = dma.hbm_to_vmem [thread:$0]  %s6375_s1, 2048, %s33_s25, [#allocation6], %s5906_s11, %s5906_s11, %s5907_s12  }
  0x15   :  { %s5908_s15 = smov [#allocation8]   ;;  %s5909_s17 = smov [#allocation2]  }
  0x16   :  { %s54_s16 = sshll.u32 %s5908_s15, 4  ;;  %s23_s18 = sshll.u32 %s5909_s17, 4  ;;  %s55_s16 = int_to_ptr.vmem [resolvable:$true] %s54_s16  ;;  %s24_s18 = int_to_ptr.vmem [resolvable:$true] %s23_s18 }
  0x17   :  { %s5763_s21 = scalar_lea.hbm %s6377_s3, 65536 }
  0x18   :  { %p5764_p8 = scmp.ne.s32.totalorder %s6377_s3, %s5763_s21  ;;  %p5767_p9 = scmp.lt.u32.totalorder %s5763_s21, %s6377_s3 }
  0x1a   :  { %p5769_p10 = pnand %p5767_p9, %p5764_p8 }
  0x1c   :  { %5772 = shalt.err (!%p5769_p10)
}
  0x1d   :  { %s5773_s1 = scalar_lea.vmem %s55_s16, 65536  ;;  %p5778_p12 = scmp.lt.s32.totalorder %s55_s16, %s55_s16 }
  0x1e   :  { %p5774_p11 = scmp.ne.s32.totalorder %s55_s16, %s5773_s1  ;;  %p5779_p13 = scmp.lt.s32.totalorder %s5773_s1, %s5773_s1 }
  0x20   :  { %p5780_p0 = por %p5779_p13, %p5778_p12 }
  0x22   :  { %p5781_p1 = pnand %p5780_p0, %p5774_p11 }
  0x24   :  { %5784 = shalt.err (!%p5781_p1)
}
  0x25   :  { %60 = dma.hbm_to_vmem [thread:$0]  %s6377_s3, 65536, %s55_s16, [#allocation9], %s5906_s11, %s5906_s11, %s5907_s12  }
  0x26   :  { %s5785_s30 = scalar_lea.hbm %s6374_s0, 64 }
  0x27   :  { %p5786_p2 = scmp.ne.s32.totalorder %s6374_s0, %s5785_s30  ;;  %p5789_p3 = scmp.lt.u32.totalorder %s5785_s30, %s6374_s0 }
  0x29   :  { %p5791_p4 = pnand %p5789_p3, %p5786_p2 }
  0x2b   :  { %5794 = shalt.err (!%p5791_p4)
}
  0x2c   :  { %s5795_s14 = scalar_lea.vmem %s24_s18, 64  ;;  %p5800_p6 = scmp.lt.s32.totalorder %s24_s18, %s24_s18 }
  0x2d   :  { %p5796_p5 = scmp.ne.s32.totalorder %s24_s18, %s5795_s14  ;;  %p5801_p7 = scmp.lt.s32.totalorder %s5795_s14, %s5795_s14 }
  0x2f   :  { %p5802_p8 = por %p5801_p7, %p5800_p6 }
  0x31   :  { %p5803_p9 = pnand %p5802_p8, %p5796_p5 }
  0x33   :  { %5806 = shalt.err (!%p5803_p9)
}
  0x34   :  { %26 = dma.hbm_to_vmem [thread:$0]  %s6374_s0, 64, %s24_s18, [#allocation3]  }
  0x35   :  { %s5910_s12 = smov [#allocation7]   ;;  %s5911_s16 = smov [#allocation10]  }
  0x36   :  { %s45_s15 = sshll.u32 %s5910_s12, 4  ;;  %s67_s17 = sshll.u32 %s5911_s16, 4  ;;  %s46_s15 = int_to_ptr.vmem [resolvable:$true] %s45_s15  ;;  %s68_s17 = int_to_ptr.vmem [resolvable:$true] %s67_s17 }
  0x37   :  { %s5807_s21 = scalar_lea.hbm %s6376_s2, 128 }
  0x38   :  { %p5808_p10 = scmp.ne.s32.totalorder %s6376_s2, %s5807_s21  ;;  %p5811_p11 = scmp.lt.u32.totalorder %s5807_s21, %s6376_s2 }
  0x3a   :  { %p5813_p12 = pnand %p5811_p11, %p5808_p10 }
  0x3c   :  { %5816 = shalt.err (!%p5813_p12)
}
  0x3d   :  { %s5817_s0 = scalar_lea.vmem %s46_s15, 128  ;;  %p5822_p0 = scmp.lt.s32.totalorder %s46_s15, %s46_s15 }
  0x3e   :  { %p5818_p13 = scmp.ne.s32.totalorder %s46_s15, %s5817_s0  ;;  %p5823_p1 = scmp.lt.s32.totalorder %s5817_s0, %s5817_s0 }
  0x40   :  { %p5824_p2 = por %p5823_p1, %p5822_p0 }
  0x42   :  { %p5825_p3 = pnand %p5824_p2, %p5818_p13 }
  0x44   :  { %5828 = shalt.err (!%p5825_p3)
}
  0x45   :  { %48 = dma.hbm_to_vmem [thread:$0]  %s6376_s2, 128, %s46_s15, [#allocation6]  }
  0x46   :  { %s5829_s28 = scalar_lea.hbm %s6378_s4, 128 }
  0x47   :  { %p5830_p4 = scmp.ne.s32.totalorder %s6378_s4, %s5829_s28  ;;  %p5833_p5 = scmp.lt.u32.totalorder %s5829_s28, %s6378_s4 }
  0x49   :  { %p5835_p6 = pnand %p5833_p5, %p5830_p4 }
  0x4b   :  { %5838 = shalt.err (!%p5835_p6)
}
  0x4c   :  { %s5839_s10 = scalar_lea.vmem %s68_s17, 128  ;;  %p5844_p8 = scmp.lt.s32.totalorder %s68_s17, %s68_s17 }
  0x4d   :  { %p5840_p7 = scmp.ne.s32.totalorder %s68_s17, %s5839_s10  ;;  %p5845_p9 = scmp.lt.s32.totalorder %s5839_s10, %s5839_s10 }
  0x4f   :  { %p5846_p10 = por %p5845_p9, %p5844_p8 }
  0x51   :  { %p5847_p11 = pnand %p5846_p10, %p5840_p7 }
  0x53   :  { %5850 = shalt.err (!%p5847_p11)
}
  0x54   :  { %70 = dma.hbm_to_vmem [thread:$0]  %s6378_s4, 128, %s68_s17, [#allocation9]  }
  0x55   :  { %s5912_s14 = smov [#allocation11]   ;;  %s5851_s15 = scalar_lea.hbm %s6380_s6, 16 }
  0x56   :  { %s79_s3 = sshll.u32 %s5912_s14, 4  ;;  %p5852_p12 = scmp.ne.s32.totalorder %s6380_s6, %s5851_s15  ;;  %s80_s3 = int_to_ptr.vmem [resolvable:$true] %s79_s3 }
  0x57   :  { %p5855_p13 = scmp.lt.u32.totalorder %s5851_s15, %s6380_s6 }
  0x59   :  { %p5857_p0 = pnand %p5855_p13, %p5852_p12 }
  0x5b   :  { %5860 = shalt.err (!%p5857_p0)
}
  0x5c   :  { %s5861_s22 = scalar_lea.vmem %s80_s3, 16  ;;  %s5865_s4 = scalar_lea.vmem %s80_s3, 32 }
  0x5d   :  { %p5862_p1 = scmp.ne.s32.totalorder %s80_s3, %s5861_s22  ;;  %p5866_p2 = scmp.lt.s32.totalorder %s80_s3, %s80_s3 }
  0x5e   :  { %p5867_p3 = scmp.lt.s32.totalorder %s5865_s4, %s5861_s22 }
  0x60   :  { %p5868_p4 = por %p5867_p3, %p5866_p2 }
  0x62   :  { %p5869_p5 = pnand %p5868_p4, %p5862_p1 }
  0x64   :  { %5872 = shalt.err (!%p5869_p5)
}
  0x65   :  { %82 = dma.hbm_to_vmem [thread:$0]  %s6380_s6, 16, %s80_s3, [#allocation12]  }
  0x66   :  { %5895 = dma.done.wait [#allocation3], 64  }
  0x67   :  { %5896 = vsyncadd [#allocation3], 4294967232 }
  0x68   :  { %5897 = dma.done.wait [#allocation6], 2176  }
  0x69   :  { %5898 = vsyncadd [#allocation6], 4294965120 }
  0x6a   :  { %5899 = dma.done.wait [#allocation9], 65664  }
  0x6b   :  { %5900 = vsyncadd [#allocation9], 4294901632 }
  0x6c   :  { %5901 = dma.done.wait [#allocation12], 16  }
  0x6d   :  { %5902 = vsyncadd [#allocation12], 4294967280  ;;  %v5913_v0 = vmov 0   ;;  %v103_v1 = vld [vmem:[#allocation5] sm:$0xff]  ;;  %v104_v7 = vld [vmem:[#allocation5 + $0x8] sm:$0xff]  ;;  %vm241_vm0 = vcmask 261120  }
  0x6e   :  { %277 = vmatprep.mubr.bf16.mxu0 %v5913_v0  ;;  %318 = vmatprep.mubr.bf16.mxu1 %v5913_v0  ;;  %v107_v2 = vld [vmem:[#allocation5 + $0x20] sm:$0xff]  ;;  %v108_v9 = vld [vmem:[#allocation5 + $0x28] sm:$0xff]  ;;  %v105_v15 = vld [vmem:[#allocation5 + $0x10] sm:$0xff]  ;;  %vm4890_vm1 = vcmask 64512  }
  0x6f   :  { %v111_v3 = vld [vmem:[#allocation5 + $0x40] sm:$0xff]  ;;  %v4922_v4 = vcombine.high %v103_v1, %v107_v2  ;;  %v4921_v5 = vcombine.low %v103_v1, %v107_v2  ;;  %v112_v10 = vld [vmem:[#allocation5 + $0x48] sm:$0xff]  ;;  %v4924_v12 = vcombine.high %v104_v7, %v108_v9  ;;  %v4923_v13 = vcombine.low %v104_v7, %v108_v9  ;;  %v109_v16 = vld [vmem:[#allocation5 + $0x30] sm:$0xff] }
  0x70   :  { %v115_v6 = vld [vmem:[#allocation5 + $0x60] sm:$0xff]  ;;  %v116_v11 = vld [vmem:[#allocation5 + $0x68] sm:$0xff]  ;;  %v106_v18 = vld [vmem:[#allocation5 + $0x18] sm:$0xff]  ;;  %v4926_v20 = vcombine.high %v105_v15, %v109_v16  ;;  %v4925_v26 = vcombine.low %v105_v15, %v109_v16 }
  0x71   :  { %v4930_v8 = vcombine.high %v111_v3, %v115_v6  ;;  %245 = vmatprep.subr.bf16.mxu0 %v4922_v4  ;;  %v4932_v14 = vcombine.high %v112_v10, %v116_v11  ;;  %v4929_v17 = vcombine.low %v111_v3, %v115_v6  ;;  %v110_v19 = vld [vmem:[#allocation5 + $0x38] sm:$0xff]  ;;  %286 = vmatprep.subr.bf16.mxu1 %v4924_v12  ;;  %v113_v22 = vld [vmem:[#allocation5 + $0x50] sm:$0xff]  ;;  %v425_v31 = vld [vmem:[#allocation8] sm:$0xff] }
  0x72   :  { %246 = vmatpush1.bf16.msra.mxu0 %v4921_v5  ;;  %287 = vmatpush1.bf16.msra.mxu1 %v4923_v13  ;;  %v4931_v21 = vcombine.low %v112_v10, %v116_v11  ;;  %v117_v23 = vld [vmem:[#allocation5 + $0x70] sm:$0xff]  ;;  %v4928_v24 = vcombine.high %v106_v18, %v110_v19  ;;  %v102_v25 = vld [vmem:[#allocation2] sm:$0xf]  ;;  %v4927_v30 = vcombine.low %v106_v18, %v110_v19  ;;  %v429_v32 = vld [vmem:[#allocation8 + $0x20] sm:$0xff] }
  0x73   :  { %247 = vmatprep.subr.bf16.mxu0 %v4930_v8  ;;  %288 = vmatprep.subr.bf16.mxu1 %v4932_v14  ;;  %v114_v27 = vld [vmem:[#allocation5 + $0x58] sm:$0xff]  ;;  %v4934_v29 = vcombine.high %v113_v22, %v117_v23  ;;  %v4933_v34 = vcombine.low %v113_v22, %v117_v23  ;;  %v426_v35 = vld [vmem:[#allocation8 + $0x8] sm:$0xff]  ;;  %v4942_v37 = vcombine.high %v425_v31, %v429_v32  ;;  %v433_v39 = vld [vmem:[#allocation8 + $0x40] sm:$0xff] }
  0x74   :  { %v118_v28 = vld [vmem:[#allocation5 + $0x78] sm:$0xff]  ;;  %v430_v36 = vld [vmem:[#allocation8 + $0x28] sm:$0xff]  ;;  %v437_v40 = vld [vmem:[#allocation8 + $0x60] sm:$0xff]  ;;  %v4941_v42 = vcombine.low %v425_v31, %v429_v32 }
  0x75   :  { %v4936_v33 = vcombine.high %v114_v27, %v118_v28  ;;  %v4935_v38 = vcombine.low %v114_v27, %v118_v28  ;;  %v4944_v41 = vcombine.high %v426_v35, %v430_v36  ;;  %v434_v43 = vld [vmem:[#allocation8 + $0x48] sm:$0xff]  ;;  %v4950_v45 = vcombine.high %v433_v39, %v437_v40  ;;  %v441_v47 = vld [vmem:[#allocation8 + $0x80] sm:$0xff] }
  0x76   :  { %248 = vmatpush1.bf16.msra.mxu0 %v4929_v17  ;;  %289 = vmatpush1.bf16.msra.mxu1 %v4931_v21  ;;  %v438_v44 = vld [vmem:[#allocation8 + $0x68] sm:$0xff]  ;;  %v4943_v46 = vcombine.low %v426_v35, %v430_v36  ;;  %v445_v48 = vld [vmem:[#allocation8 + $0xa0] sm:$0xff]  ;;  %v4949_v50 = vcombine.low %v433_v39, %v437_v40 }
  0x77   :  { %327 = vmatprep.subr.bf16.mxu0 %v4926_v20  ;;  %368 = vmatprep.subr.bf16.mxu1 %v4928_v24  ;;  %v4952_v49 = vcombine.high %v434_v43, %v438_v44  ;;  %v442_v51 = vld [vmem:[#allocation8 + $0x88] sm:$0xff]  ;;  %v4958_v53 = vcombine.high %v441_v47, %v445_v48  ;;  %v4951_v54 = vcombine.low %v434_v43, %v438_v44  ;;  %v449_v55 = vld [vmem:[#allocation8 + $0xc0] sm:$0xff] }
  0x78   :  { %v446_v52 = vld [vmem:[#allocation8 + $0xa8] sm:$0xff]  ;;  %v453_v56 = vld [vmem:[#allocation8 + $0xe0] sm:$0xff]  ;;  %v4957_v60 = vcombine.low %v441_v47, %v445_v48 }
  0x79   :  { %4937 = vmatmul.mubr.msk.bf16.vlgmr.msra.gmra.mrb[0].mxu0 %vm241_vm0, %v102_v25  ;;  %4938 = vmatmul.mubr.msk.bf16.vlgmr.msra.gmra.mrb[0].mxu1 %vm241_vm0, %v102_v25  ;;  %v4960_v57 = vcombine.high %v442_v51, %v446_v52  ;;  %v450_v58 = vld [vmem:[#allocation8 + $0xc8] sm:$0xff]  ;;  %v457_v61 = vld [vmem:[#allocation8 + $0x100] sm:$0xff]  ;;  %v4966_v63 = vcombine.high %v449_v55, %v453_v56  ;;  %v4965_v4 = vcombine.low %v449_v55, %v453_v56 }
  0x7a   :  { %328 = vmatpush1.bf16.msra.mxu0 %v4925_v26  ;;  %359 = vmatprep.mubr.bf16.mxu0 %v5913_v0  ;;  %v454_v59 = vld [vmem:[#allocation8 + $0xe8] sm:$0xff]  ;;  %v461_v62 = vld [vmem:[#allocation8 + $0x120] sm:$0xff] }
  0x7b   :  { %329 = vmatprep.subr.bf16.mxu0 %v4934_v29  ;;  %369 = vmatpush1.bf16.msra.mxu1 %v4927_v30  ;;  %v458_v1 = vld [vmem:[#allocation8 + $0x108] sm:$0xff]  ;;  %v4968_v3 = vcombine.high %v450_v58, %v454_v59  ;;  %v465_v5 = vld [vmem:[#allocation8 + $0x140] sm:$0xff]  ;;  %v4974_v7 = vcombine.high %v457_v61, %v461_v62  ;;  %v4967_v8 = vcombine.low %v450_v58, %v454_v59 }
  0x7c   :  { %400 = vmatprep.mubr.bf16.mxu1 %v5913_v0  ;;  %370 = vmatprep.subr.bf16.mxu1 %v4936_v33  ;;  %v4959_v0 = vcombine.low %v442_v51, %v446_v52  ;;  %v462_v2 = vld [vmem:[#allocation8 + $0x128] sm:$0xff]  ;;  %v469_v6 = vld [vmem:[#allocation8 + $0x160] sm:$0xff]  ;;  %v4973_v12 = vcombine.low %v457_v61, %v461_v62 }
  0x7d   :  { %v466_v9 = vld [vmem:[#allocation8 + $0x148] sm:$0xff]  ;;  %v4976_v11 = vcombine.high %v458_v1, %v462_v2  ;;  %v473_v13 = vld [vmem:[#allocation8 + $0x180] sm:$0xff]  ;;  %v4982_v15 = vcombine.high %v465_v5, %v469_v6  ;;  %v4975_v16 = vcombine.low %v458_v1, %v462_v2  ;;  %v4981_v20 = vcombine.low %v465_v5, %v469_v6 }
  0x7e   :  { %330 = vmatpush1.bf16.msra.mxu0 %v4933_v34  ;;  %v470_v10 = vld [vmem:[#allocation8 + $0x168] sm:$0xff]  ;;  %v477_v14 = vld [vmem:[#allocation8 + $0x1a0] sm:$0xff] }
  0x7f   :  { %3539 = vmatprep.subr.bf16.mxu0 %v4942_v37  ;;  %371 = vmatpush1.bf16.msra.mxu1 %v4935_v38  ;;  %v474_v17 = vld [vmem:[#allocation8 + $0x188] sm:$0xff]  ;;  %v4984_v19 = vcombine.high %v466_v9, %v470_v10  ;;  %v481_v21 = vld [vmem:[#allocation8 + $0x1c0] sm:$0xff]  ;;  %v4990_v23 = vcombine.high %v473_v13, %v477_v14  ;;  %v4983_v24 = vcombine.low %v466_v9, %v470_v10 }
  0x80   :  { %3703 = vmatprep.subr.bf16.mxu1 %v4944_v41  ;;  %v478_v18 = vld [vmem:[#allocation8 + $0x1a8] sm:$0xff]  ;;  %v485_v22 = vld [vmem:[#allocation8 + $0x1e0] sm:$0xff]  ;;  %v4989_v28 = vcombine.low %v473_v13, %v477_v14 }
  0x81   :  { %4939 = vmatmul.mubr.msk.bf16.vlgmr.msra.gmra.mrb[4].mxu0 %vm241_vm0, %v102_v25  ;;  %v486_v26 = vld [vmem:[#allocation8 + $0x1e8] sm:$0xff]  ;;  %v4992_v27 = vcombine.high %v474_v17, %v478_v18  ;;  %v489_v29 = vld [vmem:[#allocation8 + $0x200] sm:$0xff]  ;;  %v4998_v31 = vcombine.high %v481_v21, %v485_v22  ;;  %v4991_v32 = vcombine.low %v474_v17, %v478_v18  ;;  %v4997_v36 = vcombine.low %v481_v21, %v485_v22 }
  0x82   :  { %3540 = vmatpush1.bf16.msra.mxu0 %v4941_v42  ;;  %4940 = vmatmul.mubr.msk.bf16.vlgmr.msra.gmra.mrb[4].mxu1 %vm241_vm0, %v102_v25  ;;  %v482_v25 = vld [vmem:[#allocation8 + $0x1c8] sm:$0xff]  ;;  %v493_v30 = vld [vmem:[#allocation8 + $0x220] sm:$0xff] }
  0x83   :  { %3541 = vmatprep.subr.bf16.mxu0 %v4950_v45  ;;  %3704 = vmatpush1.bf16.msra.mxu1 %v4943_v46  ;;  %v490_v33 = vld [vmem:[#allocation8 + $0x208] sm:$0xff]  ;;  %v5000_v35 = vcombine.high %v482_v25, %v486_v26  ;;  %v497_v37 = vld [vmem:[#allocation8 + $0x240] sm:$0xff]  ;;  %v5006_v39 = vcombine.high %v489_v29, %v493_v30  ;;  %v4999_v40 = vcombine.low %v482_v25, %v486_v26 }
  0x84   :  { %3705 = vmatprep.subr.bf16.mxu1 %v4952_v49  ;;  %v494_v34 = vld [vmem:[#allocation8 + $0x228] sm:$0xff]  ;;  %v501_v38 = vld [vmem:[#allocation8 + $0x260] sm:$0xff]  ;;  %v5005_v44 = vcombine.low %v489_v29, %v493_v30 }
  0x85   :  { %v498_v41 = vld [vmem:[#allocation8 + $0x248] sm:$0xff]  ;;  %v5008_v43 = vcombine.high %v490_v33, %v494_v34  ;;  %v505_v45 = vld [vmem:[#allocation8 + $0x280] sm:$0xff]  ;;  %v5014_v47 = vcombine.high %v497_v37, %v501_v38  ;;  %v5007_v48 = vcombine.low %v490_v33, %v494_v34  ;;  %v5013_v52 = vcombine.low %v497_v37, %v501_v38 }
  0x86   :  { %3542 = vmatpush1.bf16.msra.mxu0 %v4949_v50  ;;  %v502_v42 = vld [vmem:[#allocation8 + $0x268] sm:$0xff]  ;;  %v509_v46 = vld [vmem:[#allocation8 + $0x2a0] sm:$0xff] }
  0x87   :  { %3543 = vmatprep.subr.bf16.mxu0 %v4958_v53  ;;  %3706 = vmatpush1.bf16.msra.mxu1 %v4951_v54  ;;  %v506_v49 = vld [vmem:[#allocation8 + $0x288] sm:$0xff]  ;;  %v5016_v51 = vcombine.high %v498_v41, %v502_v42  ;;  %v513_v53 = vld [vmem:[#allocation8 + $0x2c0] sm:$0xff]  ;;  %v5022_v55 = vcombine.high %v505_v45, %v509_v46  ;;  %v5015_v56 = vcombine.low %v498_v41, %v502_v42  ;;  %v121_v42 = vlaneseq }
  0x88   :  { %3707 = vmatprep.subr.bf16.mxu1 %v4960_v57  ;;  %v510_v50 = vld [vmem:[#allocation8 + $0x2a8] sm:$0xff]  ;;  %v517_v54 = vld [vmem:[#allocation8 + $0x2e0] sm:$0xff] }
  0x89   :  { %v514_v57 = vld [vmem:[#allocation8 + $0x2c8] sm:$0xff]  ;;  %v5024_v59 = vcombine.high %v506_v49, %v510_v50  ;;  %v521_v61 = vld [vmem:[#allocation8 + $0x300] sm:$0xff] }
  0x8a   :  { %3544 = vmatpush1.bf16.msra.mxu0 %v4957_v60  ;;  %v518_v58 = vld [vmem:[#allocation8 + $0x2e8] sm:$0xff]  ;;  %v5021_v60 = vcombine.low %v505_v45, %v509_v46  ;;  %v525_v62 = vld [vmem:[#allocation8 + $0x320] sm:$0xff]  ;;  %v6034_v45 = vld [vmem:[#allocation7] sm:$0xff] }
  0x8b   :  { %3545 = vmatprep.subr.bf16.mxu0 %v4966_v63  ;;  %3708 = vmatpush1.bf16.msra.mxu1 %v4959_v0  ;;  %v5030_v63 = vcombine.high %v513_v53, %v517_v54  ;;  %v5023_v0 = vcombine.low %v506_v49, %v510_v50  ;;  %v522_v1 = vld [vmem:[#allocation8 + $0x308] sm:$0xff]  ;;  %v529_v5 = vld [vmem:[#allocation8 + $0x340] sm:$0xff] }
  0x8c   :  { %3709 = vmatprep.subr.bf16.mxu1 %v4968_v3  ;;  %v526_v2 = vld [vmem:[#allocation8 + $0x328] sm:$0xff]  ;;  %v5032_v3 = vcombine.high %v514_v57, %v518_v58  ;;  %v533_v6 = vld [vmem:[#allocation8 + $0x360] sm:$0xff] }
  0x8d   :  { %v530_v9 = vld [vmem:[#allocation8 + $0x348] sm:$0xff]  ;;  %v5046_v13 = vcombine.high %v529_v5, %v533_v6  ;;  %v5039_v14 = vcombine.low %v522_v1, %v526_v2  ;;  %v537_v18 = vld [vmem:[#allocation8 + $0x380] sm:$0xff] }
  0x8e   :  { %3546 = vmatpush1.bf16.msra.mxu0 %v4965_v4  ;;  %v5029_v4 = vcombine.low %v513_v53, %v517_v54  ;;  %v534_v10 = vld [vmem:[#allocation8 + $0x368] sm:$0xff]  ;;  %v545_v26 = vld [vmem:[#allocation8 + $0x3c0] sm:$0xff] }
  0x8f   :  { %3547 = vmatprep.subr.bf16.mxu0 %v4974_v7  ;;  %3710 = vmatpush1.bf16.msra.mxu1 %v4967_v8  ;;  %v5038_v7 = vcombine.high %v521_v61, %v525_v62  ;;  %v5031_v8 = vcombine.low %v514_v57, %v518_v58  ;;  %v5047_v17 = vcombine.low %v530_v9, %v534_v10  ;;  %v542_v22 = vld [vmem:[#allocation8 + $0x3a8] sm:$0xff]  ;;  %v553_v34 = vld [vmem:[#allocation8 + $0x400] sm:$0xff] }
  0x90   :  { %3711 = vmatprep.subr.bf16.mxu1 %v4976_v11  ;;  %v5040_v11 = vcombine.high %v522_v1, %v526_v2  ;;  %v550_v30 = vld [vmem:[#allocation8 + $0x3e8] sm:$0xff] }
  0x91   :  { %v558_v38 = vld [vmem:[#allocation8 + $0x428] sm:$0xff] }
  0x92   :  { %3548 = vmatpush1.bf16.msra.mxu0 %v4973_v12  ;;  %v5037_v12 = vcombine.low %v521_v61, %v525_v62  ;;  %v565_v62 = vld [vmem:[#allocation8 + $0x460] sm:$0xff] }
  0x93   :  { %3549 = vmatprep.subr.bf16.mxu0 %v4982_v15  ;;  %3712 = vmatpush1.bf16.msra.mxu1 %v4975_v16  ;;  %v5048_v15 = vcombine.high %v530_v9, %v534_v10  ;;  %v5045_v16 = vcombine.low %v529_v5, %v533_v6  ;;  %v569_v9 = vld [vmem:[#allocation8 + $0x480] sm:$0xff] }
  0x94   :  { %3713 = vmatprep.subr.bf16.mxu1 %v4984_v19  ;;  %v541_v19 = vld [vmem:[#allocation8 + $0x3a0] sm:$0xff] }
  0x95   :  { %v5054_v21 = vcombine.high %v537_v18, %v541_v19  ;;  %v573_v10 = vld [vmem:[#allocation8 + $0x4a0] sm:$0xff] }
  0x96   :  { %3550 = vmatpush1.bf16.msra.mxu0 %v4981_v20  ;;  %v538_v20 = vld [vmem:[#allocation8 + $0x388] sm:$0xff] }
  0x97   :  { %3551 = vmatprep.subr.bf16.mxu0 %v4990_v23  ;;  %3714 = vmatpush1.bf16.msra.mxu1 %v4983_v24  ;;  %v5053_v23 = vcombine.low %v537_v18, %v541_v19  ;;  %v5055_v24 = vcombine.low %v538_v20, %v542_v22  ;;  %v5056_v25 = vcombine.high %v538_v20, %v542_v22 }
  0x98   :  { %3715 = vmatprep.subr.bf16.mxu1 %v4992_v27  ;;  %v549_v27 = vld [vmem:[#allocation8 + $0x3e0] sm:$0xff]  ;;  %v5086_v19 = vcombine.high %v569_v9, %v573_v10 }
  0x99   :  { %v5062_v29 = vcombine.high %v545_v26, %v549_v27 }
  0x9a   :  { %3552 = vmatpush1.bf16.msra.mxu0 %v4989_v28  ;;  %v546_v28 = vld [vmem:[#allocation8 + $0x3c8] sm:$0xff] }
  0x9b   :  { %3553 = vmatprep.subr.bf16.mxu0 %v4998_v31  ;;  %3716 = vmatpush1.bf16.msra.mxu1 %v4991_v32  ;;  %v5061_v31 = vcombine.low %v545_v26, %v549_v27  ;;  %v5063_v32 = vcombine.low %v546_v28, %v550_v30  ;;  %v5064_v33 = vcombine.high %v546_v28, %v550_v30  ;;  %v585_v30 = vld [vmem:[#allocation8 + $0x500] sm:$0xff] }
  0x9c   :  { %3717 = vmatprep.subr.bf16.mxu1 %v5000_v35  ;;  %v557_v35 = vld [vmem:[#allocation8 + $0x420] sm:$0xff]  ;;  %v5085_v26 = vcombine.low %v569_v9, %v573_v10 }
  0x9d   :  { %v5070_v37 = vcombine.high %v553_v34, %v557_v35  ;;  %v617_v10 = vld [vmem:[#allocation8 + $0x600] sm:$0xff] }
  0x9e   :  { %3554 = vmatpush1.bf16.msra.mxu0 %v4997_v36  ;;  %v554_v36 = vld [vmem:[#allocation8 + $0x408] sm:$0xff] }
  0x9f   :  { %3555 = vmatprep.subr.bf16.mxu0 %v5006_v39  ;;  %3718 = vmatpush1.bf16.msra.mxu1 %v4999_v40  ;;  %v5069_v39 = vcombine.low %v553_v34, %v557_v35  ;;  %v5071_v40 = vcombine.low %v554_v36, %v558_v38  ;;  %v5072_v41 = vcombine.high %v554_v36, %v558_v38  ;;  %v593_v38 = vld [vmem:[#allocation8 + $0x540] sm:$0xff] }
  0xa0   :  { %3719 = vmatprep.subr.bf16.mxu1 %v5008_v43  ;;  %v6031_v43 = vshrl.u32 %v121_v42, 7 }
  0xa2   :  { %3556 = vmatpush1.bf16.msra.mxu0 %v5005_v44  ;;  %v123_v44 = vsub.s32 0, %v6031_v43  ;;  %v127_v46 = vsub.s32 1, %v6031_v43 }
  0xa3   :  { %3557 = vmatprep.subr.bf16.mxu0 %v5014_v47  ;;  %3720 = vmatpush1.bf16.msra.mxu1 %v5007_v48  ;;  %v135_v47 = vsub.s32 3, %v6031_v43 }
  0xa4   :  { %3721 = vmatprep.subr.bf16.mxu1 %v5016_v51  ;;  %v124_v48 = vrot.slane %v6034_v45, %v123_v44  ;;  %v128_v49 = vrot.slane %v6034_v45, %v127_v46 }
  0xa5   :  { %v136_v51 = vrot.slane %v6034_v45, %v135_v47 }
  0xa6   :  { %3558 = vmatpush1.bf16.msra.mxu0 %v5013_v52 }
  0xa7   :  { %3559 = vmatprep.subr.bf16.mxu0 %v5022_v55  ;;  %3722 = vmatpush1.bf16.msra.mxu1 %v5015_v56 }
  0xa8   :  { %3723 = vmatprep.subr.bf16.mxu1 %v5024_v59  ;;  %v561_v59 = vld [vmem:[#allocation8 + $0x440] sm:$0xff] }
  0xaa   :  { %3560 = vmatpush1.bf16.msra.mxu0 %v5021_v60 }
  0xab   :  { %3561 = vmatprep.subr.bf16.mxu0 %v5030_v63  ;;  %3724 = vmatpush1.bf16.msra.mxu1 %v5023_v0  ;;  %v562_v63 = vld [vmem:[#allocation8 + $0x448] sm:$0xff] }
  0xac   :  { %3725 = vmatprep.subr.bf16.mxu1 %v5032_v3  ;;  %v566_v0 = vld [vmem:[#allocation8 + $0x468] sm:$0xff] }
  0xae   :  { %3562 = vmatpush1.bf16.msra.mxu0 %v5029_v4 }
  0xaf   :  { %3563 = vmatprep.subr.bf16.mxu0 %v5038_v7  ;;  %3726 = vmatpush1.bf16.msra.mxu1 %v5031_v8  ;;  %v5078_v7 = vcombine.high %v561_v59, %v565_v62  ;;  %v5080_v8 = vcombine.high %v562_v63, %v566_v0 }
  0xb0   :  { %3727 = vmatprep.subr.bf16.mxu1 %v5040_v11  ;;  %v570_v11 = vld [vmem:[#allocation8 + $0x488] sm:$0xff] }
  0xb2   :  { %3564 = vmatpush1.bf16.msra.mxu0 %v5037_v12  ;;  %v574_v12 = vld [vmem:[#allocation8 + $0x4a8] sm:$0xff] }
  0xb3   :  { %3565 = vmatprep.subr.bf16.mxu0 %v5046_v13  ;;  %3728 = vmatpush1.bf16.msra.mxu1 %v5039_v14  ;;  %v5088_v20 = vcombine.high %v570_v11, %v574_v12  ;;  %v5087_v27 = vcombine.low %v570_v11, %v574_v12  ;;  %v621_v11 = vld [vmem:[#allocation8 + $0x620] sm:$0xff]  ;;  %v618_v12 = vld [vmem:[#allocation8 + $0x608] sm:$0xff] }
  0xb4   :  { %3729 = vmatprep.subr.bf16.mxu1 %v5048_v15 }
  0xb6   :  { %3566 = vmatpush1.bf16.msra.mxu0 %v5045_v16  ;;  %v5077_v16 = vcombine.low %v561_v59, %v565_v62 }
  0xb7   :  { %3730 = vmatpush1.bf16.msra.mxu1 %v5047_v17  ;;  %3567 = vmatprep.subr.bf16.mxu0 %v5054_v21  ;;  %v5079_v17 = vcombine.low %v562_v63, %v566_v0  ;;  %v577_v21 = vld [vmem:[#allocation8 + $0x4c0] sm:$0xff]  ;;  %v610_v0 = vld [vmem:[#allocation8 + $0x5c8] sm:$0xff] }
  0xb8   :  { %3731 = vmatprep.subr.bf16.mxu1 %v5056_v25  ;;  %v582_v25 = vld [vmem:[#allocation8 + $0x4e8] sm:$0xff]  ;;  %v613_v63 = vld [vmem:[#allocation8 + $0x5e0] sm:$0xff] }
  0xba   :  { %3568 = vmatpush1.bf16.msra.mxu0 %v5053_v23  ;;  %v581_v23 = vld [vmem:[#allocation8 + $0x4e0] sm:$0xff] }
  0xbb   :  { %3732 = vmatpush1.bf16.msra.mxu1 %v5055_v24  ;;  %3569 = vmatprep.subr.bf16.mxu0 %v5062_v29  ;;  %v578_v24 = vld [vmem:[#allocation8 + $0x4c8] sm:$0xff]  ;;  %v5094_v28 = vcombine.high %v577_v21, %v581_v23  ;;  %v5093_v34 = vcombine.low %v577_v21, %v581_v23  ;;  %v625_v21 = vld [vmem:[#allocation8 + $0x640] sm:$0xff] }
  0xbc   :  { %3733 = vmatprep.subr.bf16.mxu1 %v5064_v33  ;;  %v5096_v29 = vcombine.high %v578_v24, %v582_v25  ;;  %v590_v33 = vld [vmem:[#allocation8 + $0x528] sm:$0xff]  ;;  %v5095_v35 = vcombine.low %v578_v24, %v582_v25  ;;  %v5133_v25 = vcombine.low %v617_v10, %v621_v11 }
  0xbd   :  { %v626_v23 = vld [vmem:[#allocation8 + $0x648] sm:$0xff] }
  0xbe   :  { %3570 = vmatpush1.bf16.msra.mxu0 %v5061_v31  ;;  %v589_v31 = vld [vmem:[#allocation8 + $0x520] sm:$0xff]  ;;  %v630_v24 = vld [vmem:[#allocation8 + $0x668] sm:$0xff] }
  0xbf   :  { %3734 = vmatpush1.bf16.msra.mxu1 %v5063_v32  ;;  %3580 = vmatprep.subr.bf16.mxu0 %v5070_v37  ;;  %v586_v32 = vld [vmem:[#allocation8 + $0x508] sm:$0xff]  ;;  %v5102_v36 = vcombine.high %v585_v30, %v589_v31  ;;  %v5101_v42 = vcombine.low %v585_v30, %v589_v31  ;;  %v637_v30 = vld [vmem:[#allocation8 + $0x6a0] sm:$0xff] }
  0xc0   :  { %3744 = vmatprep.subr.bf16.mxu1 %v5072_v41  ;;  %v5104_v37 = vcombine.high %v586_v32, %v590_v33  ;;  %v598_v41 = vld [vmem:[#allocation8 + $0x568] sm:$0xff] }
  0xc1   :  { %v634_v31 = vld [vmem:[#allocation8 + $0x688] sm:$0xff] }
 0x14c   :  { %v279_v50 = vpop.f32.mrb[0].mxu0  ;;  %v6047_v56 = vpop.f32.mrb[0].mxu1 }
 0x14d   :  { %v280_v52 = vadd.f32 %v279_v50, %v124_v48  ;;  %v281_v53 = vpop.f32.mrb[1].mxu0  ;;  %v322_v60 = vpop.f32.mrb[1].mxu1  ;;  %v5103_v48 = vcombine.low %v586_v32, %v590_v33  ;;  %v638_v32 = vld [vmem:[#allocation8 + $0x6a8] sm:$0xff] }
 0x14e   :  { %v282_v54 = vadd.f32 %v281_v53, %v128_v49  ;;  %v283_v55 = vpop.f32.mrb[2].mxu0  ;;  %v323_v1 = vadd.f32 %v322_v60, %v136_v51  ;;  %v324_v2 = vpop.f32.mrb[2].mxu1  ;;  %v601_v51 = vld [vmem:[#allocation8 + $0x580] sm:$0xff]  ;;  %v602_v53 = vld [vmem:[#allocation8 + $0x588] sm:$0xff] }
 0x14f   :  { %v409_v57 = vmax.f32 %v280_v52, 0.0  ;;  %v284_v58 = vpop.f32.mrb[3].mxu0  ;;  %v325_v3 = vpop.f32.mrb[3].mxu1  ;;  %v605_v52 = vld [vmem:[#allocation8 + $0x5a0] sm:$0xff] }
 0x150   :  { %v410_v61 = vmax.f32 %v282_v54, 0.0  ;;  %v412_v5 = vmax.f32 %v323_v1, 0.0  ;;  %v606_v54 = vld [vmem:[#allocation8 + $0x5a8] sm:$0xff]  ;;  %v5118_v59 = vcombine.high %v601_v51, %v605_v52 }
 0x151   :  { %v6051_v6 = vpack.c.bf16 %v409_v57, %v409_v57  ;;  %v5120_v60 = vcombine.high %v602_v53, %v606_v54  ;;  %v614_v1 = vld [vmem:[#allocation8 + $0x5e8] sm:$0xff] }
 0x152   :  { %v6049_v4 = vpack.c.bf16 %v410_v61, %v410_v61  ;;  %v6055_v13 = vpack.c.bf16 %v412_v5, %v412_v5  ;;  %v609_v61 = vld [vmem:[#allocation8 + $0x5c0] sm:$0xff]  ;;  %v5117_v5 = vcombine.low %v601_v51, %v605_v52  ;;  %v5128_v9 = vcombine.high %v610_v0, %v614_v1  ;;  %v650_v52 = vld [vmem:[#allocation8 + $0x708] sm:$0xff] }
 0x153   :  { %v653_v51 = vld [vmem:[#allocation8 + $0x720] sm:$0xff] }
 0x154   :  { %3571 = vmatprep.mubr.bf16.mxu0 %v6049_v4  ;;  %3735 = vmatprep.mubr.bf16.mxu1 %v6049_v4  ;;  %v6057_v14 = vpop.f32.mrb[4].mxu0 }
 0x155   :  { %3572 = vmatmul.mubr.bf16.vlgmr.msra.gmra.mrb[8].mxu0 %v6051_v6  ;;  %3736 = vmatmul.mubr.bf16.vlgmr.msra.gmra.mrb[8].mxu1 %v6051_v6  ;;  %v6061_v15 = vpop.f32.mrb[5].mxu0  ;;  %v6065_v58 = vpop.f32.mrb[4].mxu1 }
 0x156   :  { %3581 = vmatpush1.bf16.msra.mxu0 %v5069_v39  ;;  %3745 = vmatpush1.bf16.msra.mxu1 %v5071_v40  ;;  %v365_v18 = vpop.f32.mrb[6].mxu0  ;;  %v597_v39 = vld [vmem:[#allocation8 + $0x560] sm:$0xff]  ;;  %v594_v40 = vld [vmem:[#allocation8 + $0x548] sm:$0xff]  ;;  %v6067_v62 = vpop.f32.mrb[5].mxu1 }
 0x157   :  { %3582 = vmatprep.subr.bf16.mxu0 %v5078_v7  ;;  %3746 = vmatprep.subr.bf16.mxu1 %v5080_v8  ;;  %v366_v22 = vpop.f32.mrb[7].mxu0  ;;  %v5110_v49 = vcombine.high %v593_v38, %v597_v39  ;;  %v5112_v50 = vcombine.high %v594_v40, %v598_v41  ;;  %v5109_v55 = vcombine.low %v593_v38, %v597_v39  ;;  %v406_v2 = vpop.f32.mrb[6].mxu1  ;;  %v645_v38 = vld [vmem:[#allocation8 + $0x6e0] sm:$0xff]  ;;  %v642_v39 = vld [vmem:[#allocation8 + $0x6c8] sm:$0xff] }
 0x158   :  { %3612 = vmatprep.mubr.bf16.mxu0 %v6055_v13  ;;  %3776 = vmatprep.mubr.bf16.mxu1 %v6055_v13  ;;  %v5111_v57 = vcombine.low %v594_v40, %v598_v41  ;;  %v407_v3 = vpop.f32.mrb[7].mxu1  ;;  %v5119_v7 = vcombine.low %v602_v53, %v606_v54  ;;  %v5126_v8 = vcombine.high %v609_v61, %v613_v63  ;;  %v629_v22 = vld [vmem:[#allocation8 + $0x660] sm:$0xff]  ;;  %v646_v40 = vld [vmem:[#allocation8 + $0x6e8] sm:$0xff] }
 0x159   :  { %v5127_v18 = vcombine.low %v610_v0, %v614_v1  ;;  %v5141_v33 = vcombine.low %v625_v21, %v629_v22  ;;  %v654_v53 = vld [vmem:[#allocation8 + $0x728] sm:$0xff]  ;;  %v131_v1 = vsub.s32 2, %v6031_v43 }
 0x15a   :  { %3583 = vmatpush1.bf16.msra.mxu0 %v5077_v16  ;;  %3747 = vmatpush1.bf16.msra.mxu1 %v5079_v17  ;;  %v622_v16 = vld [vmem:[#allocation8 + $0x628] sm:$0xff]  ;;  %v5125_v17 = vcombine.low %v609_v61, %v613_v63  ;;  %v661_v61 = vld [vmem:[#allocation8 + $0x760] sm:$0xff]  ;;  %v5167_v3 = vcombine.low %v650_v52, %v654_v53 }
 0x15b   :  { %3584 = vmatprep.subr.bf16.mxu0 %v5086_v19  ;;  %3748 = vmatprep.subr.bf16.mxu1 %v5088_v20  ;;  %v5134_v19 = vcombine.high %v617_v10, %v621_v11  ;;  %v5136_v20 = vcombine.high %v618_v12, %v622_v16  ;;  %v658_v63 = vld [vmem:[#allocation8 + $0x748] sm:$0xff] }
 0x15c   :  { %v662_v0 = vld [vmem:[#allocation8 + $0x768] sm:$0xff] }
 0x15d   :  { %v666_v10 = vld [vmem:[#allocation8 + $0x788] sm:$0xff] }
 0x15e   :  { %3585 = vmatpush1.bf16.msra.mxu0 %v5085_v26  ;;  %3749 = vmatpush1.bf16.msra.mxu1 %v5087_v27  ;;  %v5135_v26 = vcombine.low %v618_v12, %v622_v16  ;;  %v5142_v27 = vcombine.high %v625_v21, %v629_v22  ;;  %v670_v11 = vld [vmem:[#allocation8 + $0x7a8] sm:$0xff]  ;;  %v143_v12 = vsub.s32 5, %v6031_v43  ;;  %v132_v16 = vrot.slane %v6034_v45, %v131_v1  ;;  %v673_v21 = vld [vmem:[#allocation8 + $0x7c0] sm:$0xff] }
 0x15f   :  { %3586 = vmatprep.subr.bf16.mxu0 %v5094_v28  ;;  %3750 = vmatprep.subr.bf16.mxu1 %v5096_v29  ;;  %v5144_v28 = vcombine.high %v626_v23, %v630_v24  ;;  %v633_v29 = vld [vmem:[#allocation8 + $0x680] sm:$0xff] }
 0x160   :  { %v5149_v41 = vcombine.low %v633_v29, %v637_v30  ;;  %v677_v22 = vld [vmem:[#allocation8 + $0x7e0] sm:$0xff] }
 0x162   :  { %3587 = vmatpush1.bf16.msra.mxu0 %v5093_v34  ;;  %3751 = vmatpush1.bf16.msra.mxu1 %v5095_v35  ;;  %v5143_v34 = vcombine.low %v626_v23, %v630_v24  ;;  %v5150_v35 = vcombine.high %v633_v29, %v637_v30  ;;  %v674_v23 = vld [vmem:[#allocation8 + $0x7c8] sm:$0xff]  ;;  %v5190_v29 = vcombine.high %v673_v21, %v677_v22 }
 0x163   :  { %3588 = vmatprep.subr.bf16.mxu0 %v5102_v36  ;;  %3752 = vmatprep.subr.bf16.mxu1 %v5104_v37  ;;  %v5152_v36 = vcombine.high %v634_v31, %v638_v32  ;;  %v641_v37 = vld [vmem:[#allocation8 + $0x6c0] sm:$0xff]  ;;  %v678_v24 = vld [vmem:[#allocation8 + $0x7e8] sm:$0xff] }
 0x164   :  { %v5157_v54 = vcombine.low %v641_v37, %v645_v38  ;;  %v5192_v30 = vcombine.high %v674_v23, %v678_v24 }
 0x166   :  { %3589 = vmatpush1.bf16.msra.mxu0 %v5101_v42  ;;  %3753 = vmatpush1.bf16.msra.mxu1 %v5103_v48  ;;  %v5151_v42 = vcombine.low %v634_v31, %v638_v32  ;;  %v5158_v48 = vcombine.high %v641_v37, %v645_v38  ;;  %v681_v31 = vld [vmem:[#allocation8 + $0x800] sm:$0xff]  ;;  %v5189_v37 = vcombine.low %v673_v21, %v677_v22 }
 0x167   :  { %3590 = vmatprep.subr.bf16.mxu0 %v5110_v49  ;;  %3754 = vmatprep.subr.bf16.mxu1 %v5112_v50  ;;  %v5160_v49 = vcombine.high %v642_v39, %v646_v40  ;;  %v649_v50 = vld [vmem:[#allocation8 + $0x700] sm:$0xff]  ;;  %v5191_v38 = vcombine.low %v674_v23, %v678_v24 }
 0x168   :  { %v5165_v2 = vcombine.low %v649_v50, %v653_v51  ;;  %v685_v32 = vld [vmem:[#allocation8 + $0x820] sm:$0xff] }
 0x16a   :  { %3591 = vmatpush1.bf16.msra.mxu0 %v5109_v55  ;;  %3755 = vmatpush1.bf16.msra.mxu1 %v5111_v57  ;;  %v5159_v55 = vcombine.low %v642_v39, %v646_v40  ;;  %v5166_v57 = vcombine.high %v649_v50, %v653_v51  ;;  %v689_v40 = vld [vmem:[#allocation8 + $0x840] sm:$0xff]  ;;  %v5197_v51 = vcombine.low %v681_v31, %v685_v32 }
 0x16b   :  { %3592 = vmatprep.subr.bf16.mxu0 %v5118_v59  ;;  %3756 = vmatprep.subr.bf16.mxu1 %v5120_v60  ;;  %v5168_v59 = vcombine.high %v650_v52, %v654_v53  ;;  %v657_v60 = vld [vmem:[#allocation8 + $0x740] sm:$0xff] }
 0x16e   :  { %3593 = vmatpush1.bf16.msra.mxu0 %v5117_v5  ;;  %3757 = vmatpush1.bf16.msra.mxu1 %v5119_v7  ;;  %v5174_v5 = vcombine.high %v657_v60, %v661_v61  ;;  %v5176_v7 = vcombine.high %v658_v63, %v662_v0 }
 0x16f   :  { %3594 = vmatprep.subr.bf16.mxu0 %v5126_v8  ;;  %3758 = vmatprep.subr.bf16.mxu1 %v5128_v9  ;;  %v665_v8 = vld [vmem:[#allocation8 + $0x780] sm:$0xff] }
 0x170   :  { %v669_v9 = vld [vmem:[#allocation8 + $0x7a0] sm:$0xff] }
 0x172   :  { %3595 = vmatpush1.bf16.msra.mxu0 %v5125_v17  ;;  %3759 = vmatpush1.bf16.msra.mxu1 %v5127_v18  ;;  %v5173_v17 = vcombine.low %v657_v60, %v661_v61  ;;  %v5175_v18 = vcombine.low %v658_v63, %v662_v0 }
 0x173   :  { %3596 = vmatprep.subr.bf16.mxu0 %v5134_v19  ;;  %3760 = vmatprep.subr.bf16.mxu1 %v5136_v20  ;;  %v5182_v19 = vcombine.high %v665_v8, %v669_v9  ;;  %v5184_v20 = vcombine.high %v666_v10, %v670_v11 }
 0x176   :  { %3597 = vmatpush1.bf16.msra.mxu0 %v5133_v25  ;;  %3761 = vmatpush1.bf16.msra.mxu1 %v5135_v26  ;;  %v144_v25 = vrot.slane %v6034_v45, %v143_v12  ;;  %v321_v26 = vadd.f32 %v6047_v56, %v132_v16  ;;  %v5198_v56 = vcombine.high %v681_v31, %v685_v32 }
 0x177   :  { %3598 = vmatprep.subr.bf16.mxu0 %v5142_v27  ;;  %3762 = vmatprep.subr.bf16.mxu1 %v5144_v28  ;;  %v5181_v27 = vcombine.low %v665_v8, %v669_v9  ;;  %v5183_v28 = vcombine.low %v666_v10, %v670_v11  ;;  %v710_v8 = vld [vmem:[#allocation8 + $0x8e8] sm:$0xff] }
 0x17a   :  { %3599 = vmatpush1.bf16.msra.mxu0 %v5141_v33  ;;  %3763 = vmatpush1.bf16.msra.mxu1 %v5143_v34  ;;  %v682_v33 = vld [vmem:[#allocation8 + $0x808] sm:$0xff] }
 0x17b   :  { %3600 = vmatprep.subr.bf16.mxu0 %v5150_v35  ;;  %3764 = vmatprep.subr.bf16.mxu1 %v5152_v36  ;;  %v686_v34 = vld [vmem:[#allocation8 + $0x828] sm:$0xff]  ;;  %v364_v35 = vadd.f32 %v6061_v15, %v144_v25  ;;  %v411_v36 = vmax.f32 %v321_v26, 0.0  ;;  %v721_v25 = vld [vmem:[#allocation8 + $0x940] sm:$0xff] }
 0x17c   :  { %v5200_v39 = vcombine.high %v682_v33, %v686_v34  ;;  %v5199_v15 = vcombine.low %v682_v33, %v686_v34  ;;  %v725_v26 = vld [vmem:[#allocation8 + $0x960] sm:$0xff] }
 0x17d   :  { %v6079_v50 = vpack.c.bf16 %v411_v36, %v411_v36  ;;  %v5238_v31 = vcombine.high %v721_v25, %v725_v26  ;;  %v729_v33 = vld [vmem:[#allocation8 + $0x980] sm:$0xff]  ;;  %v734_v36 = vld [vmem:[#allocation8 + $0x9a8] sm:$0xff] }
 0x17e   :  { %3601 = vmatpush1.bf16.msra.mxu0 %v5149_v41  ;;  %3765 = vmatpush1.bf16.msra.mxu1 %v5151_v42  ;;  %v693_v41 = vld [vmem:[#allocation8 + $0x860] sm:$0xff]  ;;  %v690_v42 = vld [vmem:[#allocation8 + $0x848] sm:$0xff] }
 0x17f   :  { %3602 = vmatprep.subr.bf16.mxu0 %v5158_v48  ;;  %3766 = vmatprep.subr.bf16.mxu1 %v5160_v49  ;;  %v694_v48 = vld [vmem:[#allocation8 + $0x868] sm:$0xff]  ;;  %v414_v49 = vmax.f32 %v364_v35, 0.0  ;;  %v5206_v52 = vcombine.high %v689_v40, %v693_v41  ;;  %v5205_v61 = vcombine.low %v689_v40, %v693_v41  ;;  %v733_v34 = vld [vmem:[#allocation8 + $0x9a0] sm:$0xff] }
 0x180   :  { %v5208_v53 = vcombine.high %v690_v42, %v694_v48  ;;  %v5207_v63 = vcombine.low %v690_v42, %v694_v48  ;;  %v730_v35 = vld [vmem:[#allocation8 + $0x988] sm:$0xff]  ;;  %v737_v40 = vld [vmem:[#allocation8 + $0x9c0] sm:$0xff] }
 0x181   :  { %v6081_v60 = vpack.c.bf16 %v414_v49, %v414_v49  ;;  %v741_v41 = vld [vmem:[#allocation8 + $0x9e0] sm:$0xff]  ;;  %v738_v42 = vld [vmem:[#allocation8 + $0x9c8] sm:$0xff]  ;;  %v5245_v49 = vcombine.low %v729_v33, %v733_v34 }
 0x182   :  { %3603 = vmatpush1.bf16.msra.mxu0 %v5157_v54  ;;  %3767 = vmatpush1.bf16.msra.mxu1 %v5159_v55  ;;  %v697_v54 = vld [vmem:[#allocation8 + $0x880] sm:$0xff]  ;;  %v742_v48 = vld [vmem:[#allocation8 + $0x9e8] sm:$0xff] }
 0x183   :  { %3604 = vmatprep.subr.bf16.mxu0 %v5166_v57  ;;  %3768 = vmatprep.subr.bf16.mxu1 %v5168_v59  ;;  %v701_v55 = vld [vmem:[#allocation8 + $0x8a0] sm:$0xff]  ;;  %v698_v57 = vld [vmem:[#allocation8 + $0x888] sm:$0xff] }
 0x184   :  { %v702_v59 = vld [vmem:[#allocation8 + $0x8a8] sm:$0xff]  ;;  %v5214_v0 = vcombine.high %v697_v54, %v701_v55  ;;  %v5213_v9 = vcombine.low %v697_v54, %v701_v55  ;;  %v749_v54 = vld [vmem:[#allocation8 + $0xa20] sm:$0xff] }
 0x185   :  { %v5215_v10 = vcombine.low %v698_v57, %v702_v59  ;;  %v746_v55 = vld [vmem:[#allocation8 + $0xa08] sm:$0xff] }
 0x186   :  { %3605 = vmatpush1.bf16.msra.mxu0 %v5165_v2  ;;  %3769 = vmatpush1.bf16.msra.mxu1 %v5167_v3  ;;  %v5216_v2 = vcombine.high %v698_v57, %v702_v59  ;;  %v705_v3 = vld [vmem:[#allocation8 + $0x8c0] sm:$0xff]  ;;  %v750_v57 = vld [vmem:[#allocation8 + $0xa28] sm:$0xff]  ;;  %v5253_v59 = vcombine.low %v737_v40, %v741_v41 }
 0x187   :  { %3606 = vmatprep.subr.bf16.mxu0 %v5174_v5  ;;  %3770 = vmatprep.subr.bf16.mxu1 %v5176_v7  ;;  %v709_v5 = vld [vmem:[#allocation8 + $0x8e0] sm:$0xff]  ;;  %v706_v7 = vld [vmem:[#allocation8 + $0x8c8] sm:$0xff] }
 0x188   :  { %v5222_v11 = vcombine.high %v705_v3, %v709_v5  ;;  %v5224_v16 = vcombine.high %v706_v7, %v710_v8  ;;  %v5221_v21 = vcombine.low %v705_v3, %v709_v5  ;;  %v5223_v22 = vcombine.low %v706_v7, %v710_v8  ;;  %v757_v3 = vld [vmem:[#allocation8 + $0xa60] sm:$0xff]  ;;  %v754_v5 = vld [vmem:[#allocation8 + $0xa48] sm:$0xff] }
 0x189   :  { %v758_v7 = vld [vmem:[#allocation8 + $0xa68] sm:$0xff] }
 0x18a   :  { %3607 = vmatpush1.bf16.msra.mxu0 %v5173_v17  ;;  %3771 = vmatpush1.bf16.msra.mxu1 %v5175_v18  ;;  %v713_v17 = vld [vmem:[#allocation8 + $0x900] sm:$0xff] }
 0x18b   :  { %3608 = vmatprep.subr.bf16.mxu0 %v5182_v19  ;;  %3772 = vmatprep.subr.bf16.mxu1 %v5184_v20  ;;  %v717_v18 = vld [vmem:[#allocation8 + $0x920] sm:$0xff]  ;;  %v714_v19 = vld [vmem:[#allocation8 + $0x908] sm:$0xff] }
 0x18c   :  { %v718_v20 = vld [vmem:[#allocation8 + $0x928] sm:$0xff]  ;;  %v5230_v23 = vcombine.high %v713_v17, %v717_v18 }
 0x18d   :  { %v5232_v24 = vcombine.high %v714_v19, %v718_v20 }
 0x18e   :  { %3609 = vmatpush1.bf16.msra.mxu0 %v5181_v27  ;;  %3773 = vmatpush1.bf16.msra.mxu1 %v5183_v28  ;;  %v722_v27 = vld [vmem:[#allocation8 + $0x948] sm:$0xff] }
 0x18f   :  { %3610 = vmatprep.subr.bf16.mxu0 %v5190_v29  ;;  %3774 = vmatprep.subr.bf16.mxu1 %v5192_v30  ;;  %v726_v28 = vld [vmem:[#allocation8 + $0x968] sm:$0xff]  ;;  %v5229_v29 = vcombine.low %v713_v17, %v717_v18  ;;  %v5231_v30 = vcombine.low %v714_v19, %v718_v20  ;;  %v765_v17 = vld [vmem:[#allocation8 + $0xaa0] sm:$0xff] }
 0x190   :  { %v5240_v32 = vcombine.high %v722_v27, %v726_v28  ;;  %v762_v18 = vld [vmem:[#allocation8 + $0xa88] sm:$0xff] }
 0x191   :  { %v766_v19 = vld [vmem:[#allocation8 + $0xaa8] sm:$0xff] }
 0x192   :  { %3611 = vmatpush1.bf16.msra.mxu0 %v5189_v37  ;;  %3775 = vmatpush1.bf16.msra.mxu1 %v5191_v38  ;;  %v5237_v37 = vcombine.low %v721_v25, %v725_v26  ;;  %v5239_v38 = vcombine.low %v722_v27, %v726_v28  ;;  %v773_v25 = vld [vmem:[#allocation8 + $0xae0] sm:$0xff]  ;;  %v770_v26 = vld [vmem:[#allocation8 + $0xac8] sm:$0xff] }
 0x193   :  { %3621 = vmatprep.subr.bf16.mxu0 %v5198_v56  ;;  %3785 = vmatprep.subr.bf16.mxu1 %v5200_v39  ;;  %v5246_v56 = vcombine.high %v729_v33, %v733_v34  ;;  %v5248_v39 = vcombine.high %v730_v35, %v734_v36  ;;  %v774_v27 = vld [vmem:[#allocation8 + $0xae8] sm:$0xff]  ;;  %v781_v33 = vld [vmem:[#allocation8 + $0xb20] sm:$0xff] }
 0x194   :  { %v778_v34 = vld [vmem:[#allocation8 + $0xb08] sm:$0xff] }
 0x195   :  { %3613 = vmatmul.mubr.bf16.vlgmr.msra.gmra.mrb[8].mxu0 %v6079_v50  ;;  %3777 = vmatmul.mubr.bf16.vlgmr.msra.gmra.mrb[8].mxu1 %v6079_v50 }
 0x196   :  { %3622 = vmatpush1.bf16.msra.mxu0 %v5197_v51  ;;  %3786 = vmatpush1.bf16.msra.mxu1 %v5199_v15  ;;  %v5247_v51 = vcombine.low %v730_v35, %v734_v36  ;;  %v5254_v15 = vcombine.high %v737_v40, %v741_v41  ;;  %v782_v35 = vld [vmem:[#allocation8 + $0xb28] sm:$0xff]  ;;  %v789_v40 = vld [vmem:[#allocation8 + $0xb60] sm:$0xff] }
 0x197   :  { %3623 = vmatprep.subr.bf16.mxu0 %v5206_v52  ;;  %3787 = vmatprep.subr.bf16.mxu1 %v5208_v53  ;;  %v5256_v52 = vcombine.high %v738_v42, %v742_v48  ;;  %v745_v53 = vld [vmem:[#allocation8 + $0xa00] sm:$0xff]  ;;  %v786_v41 = vld [vmem:[#allocation8 + $0xb48] sm:$0xff] }
 0x198   :  { %3653 = vmatprep.mubr.bf16.mxu0 %v6081_v60  ;;  %3817 = vmatprep.mubr.bf16.mxu1 %v6081_v60  ;;  %v5261_v8 = vcombine.low %v745_v53, %v749_v54 }
 0x19a   :  { %3624 = vmatpush1.bf16.msra.mxu0 %v5205_v61  ;;  %3788 = vmatpush1.bf16.msra.mxu1 %v5207_v63  ;;  %v5255_v61 = vcombine.low %v738_v42, %v742_v48  ;;  %v5262_v63 = vcombine.high %v745_v53, %v749_v54  ;;  %v790_v42 = vld [vmem:[#allocation8 + $0xb68] sm:$0xff]  ;;  %v139_v48 = vsub.s32 4, %v6031_v43  ;;  %v793_v53 = vld [vmem:[#allocation8 + $0xb80] sm:$0xff] }
 0x19b   :  { %3625 = vmatprep.subr.bf16.mxu0 %v5214_v0  ;;  %3789 = vmatprep.subr.bf16.mxu1 %v5216_v2  ;;  %v5264_v0 = vcombine.high %v746_v55, %v750_v57  ;;  %v753_v2 = vld [vmem:[#allocation8 + $0xa40] sm:$0xff] }
 0x19c   :  { %v5269_v20 = vcombine.low %v753_v2, %v757_v3  ;;  %v797_v54 = vld [vmem:[#allocation8 + $0xba0] sm:$0xff] }
 0x19e   :  { %3626 = vmatpush1.bf16.msra.mxu0 %v5213_v9  ;;  %3790 = vmatpush1.bf16.msra.mxu1 %v5215_v10  ;;  %v5263_v9 = vcombine.low %v746_v55, %v750_v57  ;;  %v5270_v10 = vcombine.high %v753_v2, %v757_v3  ;;  %v794_v55 = vld [vmem:[#allocation8 + $0xb88] sm:$0xff]  ;;  %v5310_v2 = vcombine.high %v793_v53, %v797_v54 }
 0x19f   :  { %3627 = vmatprep.subr.bf16.mxu0 %v5222_v11  ;;  %3791 = vmatprep.subr.bf16.mxu1 %v5224_v16  ;;  %v5272_v11 = vcombine.high %v754_v5, %v758_v7  ;;  %v761_v16 = vld [vmem:[#allocation8 + $0xa80] sm:$0xff]  ;;  %v798_v57 = vld [vmem:[#allocation8 + $0xba8] sm:$0xff] }
 0x1a0   :  { %v5277_v28 = vcombine.low %v761_v16, %v765_v17  ;;  %v5312_v3 = vcombine.high %v794_v55, %v798_v57 }
 0x1a2   :  { %3628 = vmatpush1.bf16.msra.mxu0 %v5221_v21  ;;  %3792 = vmatpush1.bf16.msra.mxu1 %v5223_v22  ;;  %v5271_v21 = vcombine.low %v754_v5, %v758_v7  ;;  %v5278_v22 = vcombine.high %v761_v16, %v765_v17  ;;  %v801_v5 = vld [vmem:[#allocation8 + $0xbc0] sm:$0xff]  ;;  %v5309_v16 = vcombine.low %v793_v53, %v797_v54  ;;  %v834_v53 = vld [vmem:[#allocation8 + $0xcc8] sm:$0xff] }
 0x1a3   :  { %3629 = vmatprep.subr.bf16.mxu0 %v5230_v23  ;;  %3793 = vmatprep.subr.bf16.mxu1 %v5232_v24  ;;  %v5280_v23 = vcombine.high %v762_v18, %v766_v19  ;;  %v769_v24 = vld [vmem:[#allocation8 + $0xac0] sm:$0xff]  ;;  %v5311_v17 = vcombine.low %v794_v55, %v798_v57  ;;  %v838_v54 = vld [vmem:[#allocation8 + $0xce8] sm:$0xff] }
 0x1a4   :  { %v5285_v36 = vcombine.low %v769_v24, %v773_v25  ;;  %v805_v7 = vld [vmem:[#allocation8 + $0xbe0] sm:$0xff] }
 0x1a6   :  { %3630 = vmatpush1.bf16.msra.mxu0 %v5229_v29  ;;  %3794 = vmatpush1.bf16.msra.mxu1 %v5231_v30  ;;  %v5279_v29 = vcombine.low %v762_v18, %v766_v19  ;;  %v5286_v30 = vcombine.high %v769_v24, %v773_v25  ;;  %v5318_v18 = vcombine.high %v801_v5, %v805_v7 }
 0x1a7   :  { %3631 = vmatprep.subr.bf16.mxu0 %v5238_v31  ;;  %3795 = vmatprep.subr.bf16.mxu1 %v5240_v32  ;;  %v5288_v31 = vcombine.high %v770_v26, %v774_v27  ;;  %v777_v32 = vld [vmem:[#allocation8 + $0xb00] sm:$0xff] }
 0x1aa   :  { %3632 = vmatpush1.bf16.msra.mxu0 %v5237_v37  ;;  %3796 = vmatpush1.bf16.msra.mxu1 %v5239_v38  ;;  %v5287_v37 = vcombine.low %v770_v26, %v774_v27  ;;  %v5294_v38 = vcombine.high %v777_v32, %v781_v33 }
 0x1ab   :  { %3633 = vmatprep.subr.bf16.mxu0 %v5246_v56  ;;  %3797 = vmatprep.subr.bf16.mxu1 %v5248_v39  ;;  %v5296_v56 = vcombine.high %v778_v34, %v782_v35  ;;  %v785_v39 = vld [vmem:[#allocation8 + $0xb40] sm:$0xff] }
 0x1ae   :  { %3634 = vmatpush1.bf16.msra.mxu0 %v5245_v49  ;;  %3798 = vmatpush1.bf16.msra.mxu1 %v5247_v51  ;;  %v5293_v49 = vcombine.low %v777_v32, %v781_v33  ;;  %v5295_v51 = vcombine.low %v778_v34, %v782_v35 }
 0x1af   :  { %3635 = vmatprep.subr.bf16.mxu0 %v5254_v15  ;;  %3799 = vmatprep.subr.bf16.mxu1 %v5256_v52  ;;  %v5302_v15 = vcombine.high %v785_v39, %v789_v40  ;;  %v5304_v52 = vcombine.high %v786_v41, %v790_v42 }
 0x1b2   :  { %3636 = vmatpush1.bf16.msra.mxu0 %v5253_v59  ;;  %3800 = vmatpush1.bf16.msra.mxu1 %v5255_v61  ;;  %v151_v59 = vsub.s32 7, %v6031_v43  ;;  %v140_v61 = vrot.slane %v6034_v45, %v139_v48 }
 0x1b3   :  { %3637 = vmatprep.subr.bf16.mxu0 %v5262_v63  ;;  %3801 = vmatprep.subr.bf16.mxu1 %v5264_v0  ;;  %v5301_v63 = vcombine.low %v785_v39, %v789_v40  ;;  %v5303_v0 = vcombine.low %v786_v41, %v790_v42  ;;  %v830_v39 = vld [vmem:[#allocation8 + $0xca8] sm:$0xff] }
 0x1b6   :  { %3638 = vmatpush1.bf16.msra.mxu0 %v5261_v8  ;;  %3802 = vmatpush1.bf16.msra.mxu1 %v5263_v9  ;;  %v802_v8 = vld [vmem:[#allocation8 + $0xbc8] sm:$0xff] }
 0x1b7   :  { %3639 = vmatprep.subr.bf16.mxu0 %v5270_v10  ;;  %3803 = vmatprep.subr.bf16.mxu1 %v5272_v11  ;;  %v806_v9 = vld [vmem:[#allocation8 + $0xbe8] sm:$0xff]  ;;  %v152_v10 = vrot.slane %v6034_v45, %v151_v59  ;;  %v362_v11 = vadd.f32 %v6057_v14, %v140_v61  ;;  %v5317_v45 = vcombine.low %v801_v5, %v805_v7 }
 0x1b8   :  { %v5320_v19 = vcombine.high %v802_v8, %v806_v9  ;;  %v5319_v26 = vcombine.low %v802_v8, %v806_v9  ;;  %v846_v5 = vld [vmem:[#allocation8 + $0xd28] sm:$0xff]  ;;  %v5351_v8 = vcombine.low %v834_v53, %v838_v54 }
 0x1b9   :  { %v405_v24 = vadd.f32 %v6067_v62, %v152_v10  ;;  %v413_v25 = vmax.f32 %v362_v11, 0.0  ;;  %v849_v11 = vld [vmem:[#allocation8 + $0xd40] sm:$0xff] }
 0x1ba   :  { %3640 = vmatpush1.bf16.msra.mxu0 %v5269_v20  ;;  %3804 = vmatpush1.bf16.msra.mxu1 %v5271_v21  ;;  %v809_v20 = vld [vmem:[#allocation8 + $0xc00] sm:$0xff] }
 0x1bb   :  { %3641 = vmatprep.subr.bf16.mxu0 %v5278_v22  ;;  %3805 = vmatprep.subr.bf16.mxu1 %v5280_v23  ;;  %v813_v21 = vld [vmem:[#allocation8 + $0xc20] sm:$0xff]  ;;  %v810_v22 = vld [vmem:[#allocation8 + $0xc08] sm:$0xff]  ;;  %v416_v32 = vmax.f32 %v405_v24, 0.0  ;;  %v6097_v33 = vpack.c.bf16 %v413_v25, %v413_v25 }
 0x1bc   :  { %v814_v23 = vld [vmem:[#allocation8 + $0xc28] sm:$0xff]  ;;  %v5326_v14 = vcombine.high %v809_v20, %v813_v21  ;;  %v5325_v34 = vcombine.low %v809_v20, %v813_v21  ;;  %v861_v24 = vld [vmem:[#allocation8 + $0xda0] sm:$0xff] }
 0x1bd   :  { %v5328_v27 = vcombine.high %v810_v22, %v814_v23  ;;  %v5327_v62 = vcombine.low %v810_v22, %v814_v23  ;;  %v6099_v40 = vpack.c.bf16 %v416_v32, %v416_v32  ;;  %v857_v23 = vld [vmem:[#allocation8 + $0xd80] sm:$0xff]  ;;  %v858_v25 = vld [vmem:[#allocation8 + $0xd88] sm:$0xff] }
 0x1be   :  { %3642 = vmatpush1.bf16.msra.mxu0 %v5277_v28  ;;  %3806 = vmatpush1.bf16.msra.mxu1 %v5279_v29  ;;  %v817_v28 = vld [vmem:[#allocation8 + $0xc40] sm:$0xff]  ;;  %v870_v32 = vld [vmem:[#allocation8 + $0xde8] sm:$0xff] }
 0x1bf   :  { %3643 = vmatprep.subr.bf16.mxu0 %v5286_v30  ;;  %3807 = vmatprep.subr.bf16.mxu1 %v5288_v31  ;;  %v821_v29 = vld [vmem:[#allocation8 + $0xc60] sm:$0xff]  ;;  %v818_v30 = vld [vmem:[#allocation8 + $0xc48] sm:$0xff] }
 0x1c0   :  { %v822_v31 = vld [vmem:[#allocation8 + $0xc68] sm:$0xff]  ;;  %v5334_v35 = vcombine.high %v817_v28, %v821_v29  ;;  %v5333_v41 = vcombine.low %v817_v28, %v821_v29  ;;  %v865_v29 = vld [vmem:[#allocation8 + $0xdc0] sm:$0xff] }
 0x1c1   :  { %v5335_v42 = vcombine.low %v818_v30, %v822_v31 }
 0x1c2   :  { %3644 = vmatpush1.bf16.msra.mxu0 %v5285_v36  ;;  %3808 = vmatpush1.bf16.msra.mxu1 %v5287_v37  ;;  %v5336_v36 = vcombine.high %v818_v30, %v822_v31  ;;  %v825_v37 = vld [vmem:[#allocation8 + $0xc80] sm:$0xff]  ;;  %v866_v31 = vld [vmem:[#allocation8 + $0xdc8] sm:$0xff] }
 0x1c3   :  { %3645 = vmatprep.subr.bf16.mxu0 %v5294_v38  ;;  %3809 = vmatprep.subr.bf16.mxu1 %v5296_v56  ;;  %v829_v38 = vld [vmem:[#allocation8 + $0xca0] sm:$0xff]  ;;  %v826_v56 = vld [vmem:[#allocation8 + $0xc88] sm:$0xff] }
 0x1c4   :  { %v5341_v55 = vcombine.low %v825_v37, %v829_v38  ;;  %v5343_v57 = vcombine.low %v826_v56, %v830_v39  ;;  %v869_v30 = vld [vmem:[#allocation8 + $0xde0] sm:$0xff] }
 0x1c6   :  { %3646 = vmatpush1.bf16.msra.mxu0 %v5293_v49  ;;  %3810 = vmatpush1.bf16.msra.mxu1 %v5295_v51  ;;  %v5342_v49 = vcombine.high %v825_v37, %v829_v38  ;;  %v5344_v51 = vcombine.high %v826_v56, %v830_v39  ;;  %v873_v37 = vld [vmem:[#allocation8 + $0xe00] sm:$0xff]  ;;  %v874_v56 = vld [vmem:[#allocation8 + $0xe08] sm:$0xff] }
 0x1c7   :  { %3647 = vmatprep.subr.bf16.mxu0 %v5302_v15  ;;  %3811 = vmatprep.subr.bf16.mxu1 %v5304_v52  ;;  %v833_v15 = vld [vmem:[#allocation8 + $0xcc0] sm:$0xff]  ;;  %v878_v39 = vld [vmem:[#allocation8 + $0xe28] sm:$0xff] }
 0x1c8   :  { %v837_v52 = vld [vmem:[#allocation8 + $0xce0] sm:$0xff] }
 0x1c9   :  { %v5350_v61 = vcombine.high %v833_v15, %v837_v52  ;;  %v5349_v7 = vcombine.low %v833_v15, %v837_v52  ;;  %v877_v38 = vld [vmem:[#allocation8 + $0xe20] sm:$0xff] }
 0x1ca   :  { %3648 = vmatpush1.bf16.msra.mxu0 %v5301_v63  ;;  %3812 = vmatpush1.bf16.msra.mxu1 %v5303_v0  ;;  %v5352_v63 = vcombine.high %v834_v53, %v838_v54  ;;  %v841_v0 = vld [vmem:[#allocation8 + $0xd00] sm:$0xff]  ;;  %v882_v53 = vld [vmem:[#allocation8 + $0xe48] sm:$0xff] }
 0x1cb   :  { %3649 = vmatprep.subr.bf16.mxu0 %v5310_v2  ;;  %3813 = vmatprep.subr.bf16.mxu1 %v5312_v3  ;;  %v845_v2 = vld [vmem:[#allocation8 + $0xd20] sm:$0xff]  ;;  %v842_v3 = vld [vmem:[#allocation8 + $0xd08] sm:$0xff] }
 0x1cc   :  { %v5358_v9 = vcombine.high %v841_v0, %v845_v2  ;;  %v5360_v10 = vcombine.high %v842_v3, %v846_v5  ;;  %v5359_v20 = vcombine.low %v842_v3, %v846_v5  ;;  %v881_v15 = vld [vmem:[#allocation8 + $0xe40] sm:$0xff]  ;;  %v886_v54 = vld [vmem:[#allocation8 + $0xe68] sm:$0xff] }
 0x1cd   :  { %v885_v52 = vld [vmem:[#allocation8 + $0xe60] sm:$0xff]  ;;  %v890_v3 = vld [vmem:[#allocation8 + $0xe88] sm:$0xff] }
 0x1ce   :  { %3650 = vmatpush1.bf16.msra.mxu0 %v5309_v16  ;;  %3814 = vmatpush1.bf16.msra.mxu1 %v5311_v17  ;;  %v853_v16 = vld [vmem:[#allocation8 + $0xd60] sm:$0xff]  ;;  %v850_v17 = vld [vmem:[#allocation8 + $0xd48] sm:$0xff] }
 0x1cf   :  { %3651 = vmatprep.subr.bf16.mxu0 %v5318_v18  ;;  %3815 = vmatprep.subr.bf16.mxu1 %v5320_v19  ;;  %v854_v18 = vld [vmem:[#allocation8 + $0xd68] sm:$0xff]  ;;  %v5357_v19 = vcombine.low %v841_v0, %v845_v2  ;;  %v5366_v21 = vcombine.high %v849_v11, %v853_v16  ;;  %v889_v0 = vld [vmem:[#allocation8 + $0xe80] sm:$0xff] }
 0x1d0   :  { %v5368_v22 = vcombine.high %v850_v17, %v854_v18  ;;  %v893_v2 = vld [vmem:[#allocation8 + $0xea0] sm:$0xff]  ;;  %v894_v5 = vld [vmem:[#allocation8 + $0xea8] sm:$0xff] }
 0x1d2   :  { %3652 = vmatpush1.bf16.msra.mxu0 %v5317_v45  ;;  %3816 = vmatpush1.bf16.msra.mxu1 %v5319_v26  ;;  %v862_v45 = vld [vmem:[#allocation8 + $0xda8] sm:$0xff]  ;;  %v5365_v26 = vcombine.low %v849_v11, %v853_v16  ;;  %v897_v11 = vld [vmem:[#allocation8 + $0xec0] sm:$0xff] }
 0x1d3   :  { %3662 = vmatprep.subr.bf16.mxu0 %v5326_v14  ;;  %3826 = vmatprep.subr.bf16.mxu1 %v5328_v27  ;;  %v5367_v14 = vcombine.low %v850_v17, %v854_v18  ;;  %v5374_v27 = vcombine.high %v857_v23, %v861_v24  ;;  %v5376_v28 = vcombine.high %v858_v25, %v862_v45  ;;  %v901_v16 = vld [vmem:[#allocation8 + $0xee0] sm:$0xff]  ;;  %v898_v17 = vld [vmem:[#allocation8 + $0xec8] sm:$0xff] }
 0x1d4   :  { %v902_v18 = vld [vmem:[#allocation8 + $0xee8] sm:$0xff] }
 0x1d5   :  { %3654 = vmatmul.mubr.bf16.vlgmr.msra.gmra.mrb[8].mxu0 %v6097_v33  ;;  %3818 = vmatmul.mubr.bf16.vlgmr.msra.gmra.mrb[8].mxu1 %v6097_v33 }
 0x1d6   :  { %3663 = vmatpush1.bf16.msra.mxu0 %v5325_v34  ;;  %3827 = vmatpush1.bf16.msra.mxu1 %v5327_v62  ;;  %v5373_v34 = vcombine.low %v857_v23, %v861_v24  ;;  %v5375_v62 = vcombine.low %v858_v25, %v862_v45  ;;  %v905_v23 = vld [vmem:[#allocation8 + $0xf00] sm:$0xff]  ;;  %v906_v25 = vld [vmem:[#allocation8 + $0xf08] sm:$0xff] }
 0x1d7   :  { %3664 = vmatprep.subr.bf16.mxu0 %v5334_v35  ;;  %3828 = vmatprep.subr.bf16.mxu1 %v5336_v36  ;;  %v5382_v35 = vcombine.high %v865_v29, %v869_v30  ;;  %v5384_v36 = vcombine.high %v866_v31, %v870_v32  ;;  %v909_v24 = vld [vmem:[#allocation8 + $0xf20] sm:$0xff]  ;;  %v910_v45 = vld [vmem:[#allocation8 + $0xf28] sm:$0xff] }
 0x1d8   :  { %3694 = vmatprep.mubr.bf16.mxu0 %v6099_v40  ;;  %3858 = vmatprep.mubr.bf16.mxu1 %v6099_v40 }
 0x1da   :  { %3665 = vmatpush1.bf16.msra.mxu0 %v5333_v41  ;;  %3829 = vmatpush1.bf16.msra.mxu1 %v5335_v42  ;;  %v5381_v41 = vcombine.low %v865_v29, %v869_v30  ;;  %v5383_v42 = vcombine.low %v866_v31, %v870_v32  ;;  %v913_v29 = vld [vmem:[#allocation8 + $0xf40] sm:$0xff]  ;;  %v914_v31 = vld [vmem:[#allocation8 + $0xf48] sm:$0xff] }
 0x1db   :  { %3666 = vmatprep.subr.bf16.mxu0 %v5342_v49  ;;  %3830 = vmatprep.subr.bf16.mxu1 %v5344_v51  ;;  %v5390_v49 = vcombine.high %v873_v37, %v877_v38  ;;  %v5392_v51 = vcombine.high %v874_v56, %v878_v39  ;;  %v917_v30 = vld [vmem:[#allocation8 + $0xf60] sm:$0xff]  ;;  %v918_v32 = vld [vmem:[#allocation8 + $0xf68] sm:$0xff] }
 0x1de   :  { %3667 = vmatpush1.bf16.msra.mxu0 %v5341_v55  ;;  %3831 = vmatpush1.bf16.msra.mxu1 %v5343_v57  ;;  %v5389_v55 = vcombine.low %v873_v37, %v877_v38  ;;  %v5391_v57 = vcombine.low %v874_v56, %v878_v39  ;;  %v5432_v37 = vcombine.high %v914_v31, %v918_v32  ;;  %v921_v38 = vld [vmem:[#allocation8 + $0xf80] sm:$0xff]  ;;  %v922_v39 = vld [vmem:[#allocation8 + $0xf88] sm:$0xff] }
 0x1df   :  { %3668 = vmatprep.subr.bf16.mxu0 %v5350_v61  ;;  %3832 = vmatprep.subr.bf16.mxu1 %v5352_v63  ;;  %v5398_v61 = vcombine.high %v881_v15, %v885_v52  ;;  %v5400_v63 = vcombine.high %v882_v53, %v886_v54  ;;  %v925_v56 = vld [vmem:[#allocation8 + $0xfa0] sm:$0xff] }
 0x1e2   :  { %3669 = vmatpush1.bf16.msra.mxu0 %v5349_v7  ;;  %3833 = vmatpush1.bf16.msra.mxu1 %v5351_v8  ;;  %v5397_v7 = vcombine.low %v881_v15, %v885_v52  ;;  %v5399_v8 = vcombine.low %v882_v53, %v886_v54  ;;  %v5438_v52 = vcombine.high %v921_v38, %v925_v56  ;;  %v929_v54 = vld [vmem:[#allocation8 + $0xfc0] sm:$0xff] }
 0x1e3   :  { %3670 = vmatprep.subr.bf16.mxu0 %v5358_v9  ;;  %3834 = vmatprep.subr.bf16.mxu1 %v5360_v10  ;;  %v5406_v9 = vcombine.high %v889_v0, %v893_v2  ;;  %v5408_v10 = vcombine.high %v890_v3, %v894_v5 }
 0x1e6   :  { %3671 = vmatpush1.bf16.msra.mxu0 %v5357_v19  ;;  %3835 = vmatpush1.bf16.msra.mxu1 %v5359_v20  ;;  %v5405_v19 = vcombine.low %v889_v0, %v893_v2  ;;  %v5407_v20 = vcombine.low %v890_v3, %v894_v5 }
 0x1e7   :  { %3672 = vmatprep.subr.bf16.mxu0 %v5366_v21  ;;  %3836 = vmatprep.subr.bf16.mxu1 %v5368_v22  ;;  %v5414_v21 = vcombine.high %v897_v11, %v901_v16  ;;  %v5416_v22 = vcombine.high %v898_v17, %v902_v18 }
 0x1ea   :  { %3673 = vmatpush1.bf16.msra.mxu0 %v5365_v26  ;;  %3837 = vmatpush1.bf16.msra.mxu1 %v5367_v14  ;;  %v5413_v26 = vcombine.low %v897_v11, %v901_v16  ;;  %v5415_v14 = vcombine.low %v898_v17, %v902_v18 }
 0x1eb   :  { %3674 = vmatprep.subr.bf16.mxu0 %v5374_v27  ;;  %3838 = vmatprep.subr.bf16.mxu1 %v5376_v28  ;;  %v5422_v27 = vcombine.high %v905_v23, %v909_v24  ;;  %v5424_v28 = vcombine.high %v906_v25, %v910_v45 }
 0x1ee   :  { %3675 = vmatpush1.bf16.msra.mxu0 %v5373_v34  ;;  %3839 = vmatpush1.bf16.msra.mxu1 %v5375_v62  ;;  %v5421_v34 = vcombine.low %v905_v23, %v909_v24  ;;  %v5423_v62 = vcombine.low %v906_v25, %v910_v45 }
 0x1ef   :  { %3676 = vmatprep.subr.bf16.mxu0 %v5382_v35  ;;  %3840 = vmatprep.subr.bf16.mxu1 %v5384_v36  ;;  %v147_v35 = vsub.s32 6, %v6031_v43  ;;  %v5430_v36 = vcombine.high %v913_v29, %v917_v30 }
 0x1f2   :  { %3677 = vmatpush1.bf16.msra.mxu0 %v5381_v41  ;;  %3841 = vmatpush1.bf16.msra.mxu1 %v5383_v42  ;;  %v926_v41 = vld [vmem:[#allocation8 + $0xfa8] sm:$0xff]  ;;  %v5429_v42 = vcombine.low %v913_v29, %v917_v30  ;;  %v448_v29 = vld [vmem:[#allocation8 + $0xb8] sm:$0xff] }
 0x1f3   :  { %3678 = vmatprep.subr.bf16.mxu0 %v5390_v49  ;;  %3842 = vmatprep.subr.bf16.mxu1 %v5392_v51  ;;  %v5431_v49 = vcombine.low %v914_v31, %v918_v32  ;;  %v5740_v51 = vld [vmem:[#allocation7] sm:$0xff]  ;;  %v5440_v53 = vcombine.high %v922_v39, %v926_v41  ;;  %v5439_v0 = vcombine.low %v922_v39, %v926_v41 }
 0x1f4   :  { %v148_v15 = vrot.slane %v5740_v51, %v147_v35  ;;  %v463_v51 = vld [vmem:[#allocation8 + $0x130] sm:$0xff] }
 0x1f6   :  { %3679 = vmatpush1.bf16.msra.mxu0 %v5389_v55  ;;  %3843 = vmatpush1.bf16.msra.mxu1 %v5391_v57  ;;  %v933_v55 = vld [vmem:[#allocation8 + $0xfe0] sm:$0xff]  ;;  %v930_v57 = vld [vmem:[#allocation8 + $0xfc8] sm:$0xff]  ;;  %v403_v2 = vadd.f32 %v6065_v58, %v148_v15  ;;  %v436_v58 = vld [vmem:[#allocation8 + $0x58] sm:$0xff] }
 0x1f7   :  { %3680 = vmatprep.subr.bf16.mxu0 %v5398_v61  ;;  %3844 = vmatprep.subr.bf16.mxu1 %v5400_v63  ;;  %v934_v61 = vld [vmem:[#allocation8 + $0xfe8] sm:$0xff]  ;;  %v5437_v63 = vcombine.low %v921_v38, %v925_v56  ;;  %v5446_v3 = vcombine.high %v929_v54, %v933_v55  ;;  %v5445_v11 = vcombine.low %v929_v54, %v933_v55  ;;  %v456_v38 = vld [vmem:[#allocation8 + $0xf8] sm:$0xff] }
 0x1f8   :  { %v5448_v5 = vcombine.high %v930_v57, %v934_v61  ;;  %v5447_v16 = vcombine.low %v930_v57, %v934_v61  ;;  %v415_v17 = vmax.f32 %v403_v2, 0.0  ;;  %v464_v15 = vld [vmem:[#allocation8 + $0x138] sm:$0xff]  ;;  %v467_v57 = vld [vmem:[#allocation8 + $0x150] sm:$0xff] }
 0x1f9   :  { %v471_v61 = vld [vmem:[#allocation8 + $0x170] sm:$0xff] }
 0x1fa   :  { %3681 = vmatpush1.bf16.msra.mxu0 %v5397_v7  ;;  %3845 = vmatpush1.bf16.msra.mxu1 %v5399_v8  ;;  %v427_v7 = vld [vmem:[#allocation8 + $0x10] sm:$0xff]  ;;  %v6109_v24 = vpack.c.bf16 %v415_v17, %v415_v17 }
 0x1fb   :  { %3682 = vmatprep.subr.bf16.mxu0 %v5406_v9  ;;  %3846 = vmatprep.subr.bf16.mxu1 %v5408_v10  ;;  %v431_v8 = vld [vmem:[#allocation8 + $0x30] sm:$0xff]  ;;  %v428_v9 = vld [vmem:[#allocation8 + $0x18] sm:$0xff] }
 0x1fc   :  { %v432_v10 = vld [vmem:[#allocation8 + $0x38] sm:$0xff]  ;;  %v4946_v18 = vcombine.high %v427_v7, %v431_v8  ;;  %v4945_v23 = vcombine.low %v427_v7, %v431_v8  ;;  %v475_v8 = vld [vmem:[#allocation8 + $0x190] sm:$0xff] }
 0x1fd   :  { %v4947_v25 = vcombine.low %v428_v9, %v432_v10 }
 0x1fe   :  { %3683 = vmatpush1.bf16.msra.mxu0 %v5405_v19  ;;  %3847 = vmatpush1.bf16.msra.mxu1 %v5407_v20  ;;  %v4948_v19 = vcombine.high %v428_v9, %v432_v10  ;;  %v435_v20 = vld [vmem:[#allocation8 + $0x50] sm:$0xff]  ;;  %v476_v10 = vld [vmem:[#allocation8 + $0x198] sm:$0xff] }
 0x1ff   :  { %3684 = vmatprep.subr.bf16.mxu0 %v5414_v21  ;;  %3848 = vmatprep.subr.bf16.mxu1 %v5416_v22  ;;  %v439_v21 = vld [vmem:[#allocation8 + $0x70] sm:$0xff]  ;;  %v440_v22 = vld [vmem:[#allocation8 + $0x78] sm:$0xff] }
 0x200   :  { %v4954_v45 = vcombine.high %v435_v20, %v439_v21  ;;  %v4953_v30 = vcombine.low %v435_v20, %v439_v21  ;;  %v4955_v31 = vcombine.low %v436_v58, %v440_v22  ;;  %v479_v9 = vld [vmem:[#allocation8 + $0x1b0] sm:$0xff] }
 0x201   :  { %v483_v20 = vld [vmem:[#allocation8 + $0x1d0] sm:$0xff] }
 0x202   :  { %3685 = vmatpush1.bf16.msra.mxu0 %v5413_v26  ;;  %3849 = vmatpush1.bf16.msra.mxu1 %v5415_v14  ;;  %v4956_v26 = vcombine.high %v436_v58, %v440_v22  ;;  %v443_v14 = vld [vmem:[#allocation8 + $0x90] sm:$0xff]  ;;  %v484_v58 = vld [vmem:[#allocation8 + $0x1d8] sm:$0xff] }
 0x203   :  { %3686 = vmatprep.subr.bf16.mxu0 %v5422_v27  ;;  %3850 = vmatprep.subr.bf16.mxu1 %v5424_v28  ;;  %v447_v27 = vld [vmem:[#allocation8 + $0xb0] sm:$0xff]  ;;  %v444_v28 = vld [vmem:[#allocation8 + $0x98] sm:$0xff] }
 0x204   :  { %v4962_v32 = vcombine.high %v443_v14, %v447_v27  ;;  %v4961_v56 = vcombine.low %v443_v14, %v447_v27  ;;  %v4963_v39 = vcombine.low %v444_v28, %v448_v29  ;;  %v487_v21 = vld [vmem:[#allocation8 + $0x1f0] sm:$0xff]  ;;  %v488_v22 = vld [vmem:[#allocation8 + $0x1f8] sm:$0xff] }
 0x205   :  { %v491_v14 = vld [vmem:[#allocation8 + $0x210] sm:$0xff] }
 0x206   :  { %3687 = vmatpush1.bf16.msra.mxu0 %v5421_v34  ;;  %3851 = vmatpush1.bf16.msra.mxu1 %v5423_v62  ;;  %v4964_v34 = vcombine.high %v444_v28, %v448_v29  ;;  %v451_v62 = vld [vmem:[#allocation8 + $0xd0] sm:$0xff]  ;;  %v492_v28 = vld [vmem:[#allocation8 + $0x218] sm:$0xff] }
 0x207   :  { %3688 = vmatprep.subr.bf16.mxu0 %v5430_v36  ;;  %3852 = vmatprep.subr.bf16.mxu1 %v5432_v37  ;;  %v455_v36 = vld [vmem:[#allocation8 + $0xf0] sm:$0xff]  ;;  %v452_v37 = vld [vmem:[#allocation8 + $0xd8] sm:$0xff] }
 0x208   :  { %v4970_v41 = vcombine.high %v451_v62, %v455_v36  ;;  %v495_v27 = vld [vmem:[#allocation8 + $0x230] sm:$0xff]  ;;  %v496_v29 = vld [vmem:[#allocation8 + $0x238] sm:$0xff] }
 0x20a   :  { %3689 = vmatpush1.bf16.msra.mxu0 %v5429_v42  ;;  %3853 = vmatpush1.bf16.msra.mxu1 %v5431_v49  ;;  %v4972_v42 = vcombine.high %v452_v37, %v456_v38  ;;  %v459_v49 = vld [vmem:[#allocation8 + $0x110] sm:$0xff] }
 0x20b   :  { %3690 = vmatprep.subr.bf16.mxu0 %v5438_v52  ;;  %3854 = vmatprep.subr.bf16.mxu1 %v5440_v53  ;;  %v4969_v52 = vcombine.low %v451_v62, %v455_v36  ;;  %v4971_v53 = vcombine.low %v452_v37, %v456_v38  ;;  %v4978_v54 = vcombine.high %v459_v49, %v463_v51  ;;  %v499_v62 = vld [vmem:[#allocation8 + $0x250] sm:$0xff]  ;;  %v500_v37 = vld [vmem:[#allocation8 + $0x258] sm:$0xff] }
 0x20c   :  { %v4977_v2 = vcombine.low %v459_v49, %v463_v51  ;;  %v503_v36 = vld [vmem:[#allocation8 + $0x270] sm:$0xff]  ;;  %v504_v38 = vld [vmem:[#allocation8 + $0x278] sm:$0xff] }
 0x20d   :  { %v507_v49 = vld [vmem:[#allocation8 + $0x290] sm:$0xff] }
 0x20e   :  { %3691 = vmatpush1.bf16.msra.mxu0 %v5437_v63  ;;  %3855 = vmatpush1.bf16.msra.mxu1 %v5439_v0  ;;  %v468_v63 = vld [vmem:[#allocation8 + $0x158] sm:$0xff]  ;;  %v511_v51 = vld [vmem:[#allocation8 + $0x2b0] sm:$0xff] }
 0x20f   :  { %3692 = vmatprep.subr.bf16.mxu0 %v5446_v3  ;;  %3856 = vmatprep.subr.bf16.mxu1 %v5448_v5  ;;  %v472_v0 = vld [vmem:[#allocation8 + $0x178] sm:$0xff]  ;;  %v4986_v5 = vcombine.high %v467_v57, %v471_v61 }
 0x210   :  { %v4988_v7 = vcombine.high %v468_v63, %v472_v0  ;;  %v4987_v17 = vcombine.low %v468_v63, %v472_v0  ;;  %v516_v63 = vld [vmem:[#allocation8 + $0x2d8] sm:$0xff] }
 0x211   :  { %v520_v0 = vld [vmem:[#allocation8 + $0x2f8] sm:$0xff] }
 0x212   :  { %3693 = vmatpush1.bf16.msra.mxu0 %v5445_v11  ;;  %3857 = vmatpush1.bf16.msra.mxu1 %v5447_v16  ;;  %v480_v11 = vld [vmem:[#allocation8 + $0x1b8] sm:$0xff]  ;;  %v4985_v16 = vcombine.low %v467_v57, %v471_v61  ;;  %v515_v57 = vld [vmem:[#allocation8 + $0x2d0] sm:$0xff] }
 0x213   :  { %3867 = vmatprep.subr.bf16.mxu0 %v4946_v18  ;;  %4031 = vmatprep.subr.bf16.mxu1 %v4948_v19  ;;  %v4994_v18 = vcombine.high %v475_v8, %v479_v9  ;;  %v4996_v19 = vcombine.high %v476_v10, %v480_v11  ;;  %v519_v61 = vld [vmem:[#allocation8 + $0x2f0] sm:$0xff] }
 0x215   :  { %3695 = vmatmul.mubr.bf16.vlgmr.msra.gmra.mrb[8].mxu0 %v6109_v24  ;;  %3859 = vmatmul.mubr.bf16.vlgmr.msra.gmra.mrb[8].mxu1 %v6109_v24 }
 0x216   :  { %3868 = vmatpush1.bf16.msra.mxu0 %v4945_v23  ;;  %3899 = vmatprep.mubr.bf16.mxu0 %v6049_v4  ;;  %v4993_v23 = vcombine.low %v475_v8, %v479_v9  ;;  %v523_v8 = vld [vmem:[#allocation8 + $0x310] sm:$0xff] }
 0x217   :  { %4032 = vmatpush1.bf16.msra.mxu1 %v4947_v25  ;;  %4063 = vmatprep.mubr.bf16.mxu1 %v6049_v4  ;;  %v460_v4 = vld [vmem:[#allocation8 + $0x118] sm:$0xff]  ;;  %v4995_v25 = vcombine.low %v476_v10, %v480_v11  ;;  %v527_v9 = vld [vmem:[#allocation8 + $0x330] sm:$0xff] }
 0x218   :  { %3869 = vmatprep.subr.bf16.mxu0 %v4954_v45  ;;  %4033 = vmatprep.subr.bf16.mxu1 %v4956_v26  ;;  %v4980_v55 = vcombine.high %v460_v4, %v464_v15  ;;  %v4979_v3 = vcombine.low %v460_v4, %v464_v15  ;;  %v5002_v45 = vcombine.high %v483_v20, %v487_v21  ;;  %v508_v4 = vld [vmem:[#allocation8 + $0x298] sm:$0xff] }
 0x219   :  { %v5004_v26 = vcombine.high %v484_v58, %v488_v22  ;;  %v512_v15 = vld [vmem:[#allocation8 + $0x2b8] sm:$0xff] }
 0x21a   :  { %3870 = vmatpush1.bf16.msra.mxu0 %v4953_v30  ;;  %v5001_v30 = vcombine.low %v483_v20, %v487_v21  ;;  %v524_v10 = vld [vmem:[#allocation8 + $0x318] sm:$0xff]  ;;  %v531_v20 = vld [vmem:[#allocation8 + $0x350] sm:$0xff] }
 0x21b   :  { %4034 = vmatpush1.bf16.msra.mxu1 %v4955_v31  ;;  %3871 = vmatprep.subr.bf16.mxu0 %v4962_v32  ;;  %v5003_v31 = vcombine.low %v484_v58, %v488_v22  ;;  %v5010_v32 = vcombine.high %v491_v14, %v495_v27  ;;  %v528_v11 = vld [vmem:[#allocation8 + $0x338] sm:$0xff]  ;;  %v535_v21 = vld [vmem:[#allocation8 + $0x370] sm:$0xff] }
 0x21c   :  { %4035 = vmatprep.subr.bf16.mxu1 %v4964_v34  ;;  %v5012_v34 = vcombine.high %v492_v28, %v496_v29  ;;  %v532_v58 = vld [vmem:[#allocation8 + $0x358] sm:$0xff] }
 0x21d   :  { %v536_v22 = vld [vmem:[#allocation8 + $0x378] sm:$0xff] }
 0x21e   :  { %3872 = vmatpush1.bf16.msra.mxu0 %v4961_v56  ;;  %v5009_v56 = vcombine.low %v491_v14, %v495_v27  ;;  %v539_v14 = vld [vmem:[#allocation8 + $0x390] sm:$0xff] }
 0x21f   :  { %4036 = vmatpush1.bf16.msra.mxu1 %v4963_v39  ;;  %3873 = vmatprep.subr.bf16.mxu0 %v4970_v41  ;;  %v5011_v39 = vcombine.low %v492_v28, %v496_v29  ;;  %v5018_v41 = vcombine.high %v499_v62, %v503_v36  ;;  %v543_v27 = vld [vmem:[#allocation8 + $0x3b0] sm:$0xff]  ;;  %v540_v28 = vld [vmem:[#allocation8 + $0x398] sm:$0xff] }
 0x220   :  { %4037 = vmatprep.subr.bf16.mxu1 %v4972_v42  ;;  %v5020_v42 = vcombine.high %v500_v37, %v504_v38  ;;  %v544_v29 = vld [vmem:[#allocation8 + $0x3b8] sm:$0xff] }
 0x222   :  { %3874 = vmatpush1.bf16.msra.mxu0 %v4969_v52  ;;  %v5017_v52 = vcombine.low %v499_v62, %v503_v36  ;;  %v547_v62 = vld [vmem:[#allocation8 + $0x3d0] sm:$0xff] }
 0x223   :  { %4038 = vmatpush1.bf16.msra.mxu1 %v4971_v53  ;;  %3875 = vmatprep.subr.bf16.mxu0 %v4978_v54  ;;  %v5019_v53 = vcombine.low %v500_v37, %v504_v38  ;;  %v5026_v54 = vcombine.high %v507_v49, %v511_v51  ;;  %v551_v36 = vld [vmem:[#allocation8 + $0x3f0] sm:$0xff]  ;;  %v548_v37 = vld [vmem:[#allocation8 + $0x3d8] sm:$0xff] }
 0x224   :  { %4039 = vmatprep.subr.bf16.mxu1 %v4980_v55  ;;  %v5028_v55 = vcombine.high %v508_v4, %v512_v15  ;;  %v552_v38 = vld [vmem:[#allocation8 + $0x3f8] sm:$0xff] }
 0x226   :  { %3876 = vmatpush1.bf16.msra.mxu0 %v4977_v2  ;;  %v5025_v2 = vcombine.low %v507_v49, %v511_v51  ;;  %v555_v49 = vld [vmem:[#allocation8 + $0x410] sm:$0xff] }
 0x227   :  { %4040 = vmatpush1.bf16.msra.mxu1 %v4979_v3  ;;  %3877 = vmatprep.subr.bf16.mxu0 %v4986_v5  ;;  %v5027_v3 = vcombine.low %v508_v4, %v512_v15  ;;  %v5034_v5 = vcombine.high %v515_v57, %v519_v61  ;;  %v559_v51 = vld [vmem:[#allocation8 + $0x430] sm:$0xff]  ;;  %v556_v4 = vld [vmem:[#allocation8 + $0x418] sm:$0xff] }
 0x228   :  { %4041 = vmatprep.subr.bf16.mxu1 %v4988_v7  ;;  %v5036_v7 = vcombine.high %v516_v63, %v520_v0  ;;  %v560_v15 = vld [vmem:[#allocation8 + $0x438] sm:$0xff] }
 0x22a   :  { %3878 = vmatpush1.bf16.msra.mxu0 %v4985_v16  ;;  %v5033_v16 = vcombine.low %v515_v57, %v519_v61  ;;  %v563_v57 = vld [vmem:[#allocation8 + $0x450] sm:$0xff] }
 0x22b   :  { %4042 = vmatpush1.bf16.msra.mxu1 %v4987_v17  ;;  %3879 = vmatprep.subr.bf16.mxu0 %v4994_v18  ;;  %v5035_v17 = vcombine.low %v516_v63, %v520_v0  ;;  %v5042_v18 = vcombine.high %v523_v8, %v527_v9  ;;  %v567_v61 = vld [vmem:[#allocation8 + $0x470] sm:$0xff]  ;;  %v5073_v63 = vcombine.low %v555_v49, %v559_v51  ;;  %v564_v0 = vld [vmem:[#allocation8 + $0x458] sm:$0xff] }
 0x22c   :  { %4043 = vmatprep.subr.bf16.mxu1 %v4996_v19  ;;  %v5044_v19 = vcombine.high %v524_v10, %v528_v11 }
 0x22e   :  { %3880 = vmatpush1.bf16.msra.mxu0 %v4993_v23  ;;  %v5041_v23 = vcombine.low %v523_v8, %v527_v9  ;;  %v575_v8 = vld [vmem:[#allocation8 + $0x4b0] sm:$0xff] }
 0x22f   :  { %4044 = vmatpush1.bf16.msra.mxu1 %v4995_v25  ;;  %3881 = vmatprep.subr.bf16.mxu0 %v5002_v45  ;;  %v5043_v25 = vcombine.low %v524_v10, %v528_v11  ;;  %v5050_v45 = vcombine.high %v531_v20, %v535_v21  ;;  %v572_v10 = vld [vmem:[#allocation8 + $0x498] sm:$0xff] }
 0x230   :  { %4045 = vmatprep.subr.bf16.mxu1 %v5004_v26  ;;  %v5052_v26 = vcombine.high %v532_v58, %v536_v22  ;;  %v576_v11 = vld [vmem:[#allocation8 + $0x4b8] sm:$0xff] }
 0x232   :  { %3882 = vmatpush1.bf16.msra.mxu0 %v5001_v30  ;;  %v5049_v30 = vcombine.low %v531_v20, %v535_v21  ;;  %v579_v20 = vld [vmem:[#allocation8 + $0x4d0] sm:$0xff] }
 0x233   :  { %4046 = vmatpush1.bf16.msra.mxu1 %v5003_v31  ;;  %3883 = vmatprep.subr.bf16.mxu0 %v5010_v32  ;;  %v5051_v31 = vcombine.low %v532_v58, %v536_v22  ;;  %v5058_v32 = vcombine.high %v539_v14, %v543_v27  ;;  %v583_v21 = vld [vmem:[#allocation8 + $0x4f0] sm:$0xff]  ;;  %v580_v58 = vld [vmem:[#allocation8 + $0x4d8] sm:$0xff] }
 0x234   :  { %4047 = vmatprep.subr.bf16.mxu1 %v5012_v34  ;;  %v5060_v34 = vcombine.high %v540_v28, %v544_v29  ;;  %v584_v22 = vld [vmem:[#allocation8 + $0x4f8] sm:$0xff] }
 0x236   :  { %3884 = vmatpush1.bf16.msra.mxu0 %v5009_v56  ;;  %v5057_v56 = vcombine.low %v539_v14, %v543_v27  ;;  %v591_v14 = vld [vmem:[#allocation8 + $0x530] sm:$0xff]  ;;  %v588_v27 = vld [vmem:[#allocation8 + $0x518] sm:$0xff] }
 0x237   :  { %4048 = vmatpush1.bf16.msra.mxu1 %v5011_v39  ;;  %3885 = vmatprep.subr.bf16.mxu0 %v5018_v41  ;;  %v5059_v39 = vcombine.low %v540_v28, %v544_v29  ;;  %v5066_v41 = vcombine.high %v547_v62, %v551_v36  ;;  %v592_v28 = vld [vmem:[#allocation8 + $0x538] sm:$0xff]  ;;  %v5099_v29 = vcombine.low %v580_v58, %v584_v22 }
 0x238   :  { %4049 = vmatprep.subr.bf16.mxu1 %v5020_v42  ;;  %v5068_v42 = vcombine.high %v548_v37, %v552_v38 }
 0x23a   :  { %3886 = vmatpush1.bf16.msra.mxu0 %v5017_v52  ;;  %v5065_v52 = vcombine.low %v547_v62, %v551_v36  ;;  %v596_v62 = vld [vmem:[#allocation8 + $0x558] sm:$0xff] }
 0x23b   :  { %4050 = vmatpush1.bf16.msra.mxu1 %v5019_v53  ;;  %3887 = vmatprep.subr.bf16.mxu0 %v5026_v54  ;;  %v5067_v53 = vcombine.low %v548_v37, %v552_v38  ;;  %v5074_v54 = vcombine.high %v555_v49, %v559_v51  ;;  %v600_v36 = vld [vmem:[#allocation8 + $0x578] sm:$0xff]  ;;  %v5107_v38 = vcombine.low %v588_v27, %v592_v28 }
 0x23c   :  { %4051 = vmatprep.subr.bf16.mxu1 %v5028_v55  ;;  %v5076_v55 = vcombine.high %v556_v4, %v560_v15  ;;  %v604_v49 = vld [vmem:[#allocation8 + $0x598] sm:$0xff] }
 0x23d   :  { %v608_v51 = vld [vmem:[#allocation8 + $0x5b8] sm:$0xff] }
 0x23e   :  { %3888 = vmatpush1.bf16.msra.mxu0 %v5025_v2  ;;  %v568_v2 = vld [vmem:[#allocation8 + $0x478] sm:$0xff] }
 0x23f   :  { %4052 = vmatpush1.bf16.msra.mxu1 %v5027_v3  ;;  %3889 = vmatprep.subr.bf16.mxu0 %v5034_v5  ;;  %v5075_v3 = vcombine.low %v556_v4, %v560_v15  ;;  %v5082_v5 = vcombine.high %v563_v57, %v567_v61  ;;  %v5084_v9 = vcombine.high %v564_v0, %v568_v2 }
 0x240   :  { %4053 = vmatprep.subr.bf16.mxu1 %v5036_v7  ;;  %v571_v7 = vld [vmem:[#allocation8 + $0x490] sm:$0xff]  ;;  %v5115_v15 = vcombine.low %v596_v62, %v600_v36 }
 0x242   :  { %3890 = vmatpush1.bf16.msra.mxu0 %v5033_v16  ;;  %v5081_v16 = vcombine.low %v563_v57, %v567_v61  ;;  %v612_v57 = vld [vmem:[#allocation8 + $0x5d8] sm:$0xff] }
 0x243   :  { %4054 = vmatpush1.bf16.msra.mxu1 %v5035_v17  ;;  %3891 = vmatprep.subr.bf16.mxu0 %v5042_v18  ;;  %v5083_v17 = vcombine.low %v564_v0, %v568_v2  ;;  %v5090_v18 = vcombine.high %v571_v7, %v575_v8  ;;  %v616_v61 = vld [vmem:[#allocation8 + $0x5f8] sm:$0xff]  ;;  %v5123_v0 = vcombine.low %v604_v49, %v608_v51 }
 0x244   :  { %4055 = vmatprep.subr.bf16.mxu1 %v5044_v19  ;;  %v5092_v19 = vcombine.high %v572_v10, %v576_v11 }
 0x246   :  { %3892 = vmatpush1.bf16.msra.mxu0 %v5041_v23  ;;  %v5089_v23 = vcombine.low %v571_v7, %v575_v8  ;;  %v623_v7 = vld [vmem:[#allocation8 + $0x630] sm:$0xff]  ;;  %v620_v8 = vld [vmem:[#allocation8 + $0x618] sm:$0xff] }
 0x247   :  { %4056 = vmatpush1.bf16.msra.mxu1 %v5043_v25  ;;  %3893 = vmatprep.subr.bf16.mxu0 %v5050_v45  ;;  %v5098_v25 = vcombine.high %v579_v20, %v583_v21  ;;  %v5100_v45 = vcombine.high %v580_v58, %v584_v22 }
 0x248   :  { %4057 = vmatprep.subr.bf16.mxu1 %v5052_v26  ;;  %v587_v26 = vld [vmem:[#allocation8 + $0x510] sm:$0xff] }
 0x249   :  { %v5105_v37 = vcombine.low %v587_v26, %v591_v14 }
 0x24a   :  { %3894 = vmatpush1.bf16.msra.mxu0 %v5049_v30  ;;  %v5106_v30 = vcombine.high %v587_v26, %v591_v14  ;;  %v636_v26 = vld [vmem:[#allocation8 + $0x698] sm:$0xff] }
 0x24b   :  { %4058 = vmatpush1.bf16.msra.mxu1 %v5051_v31  ;;  %3895 = vmatprep.subr.bf16.mxu0 %v5058_v32  ;;  %v5108_v31 = vcombine.high %v588_v27, %v592_v28  ;;  %v595_v32 = vld [vmem:[#allocation8 + $0x550] sm:$0xff]  ;;  %v640_v14 = vld [vmem:[#allocation8 + $0x6b8] sm:$0xff] }
 0x24c   :  { %4059 = vmatprep.subr.bf16.mxu1 %v5060_v34  ;;  %v599_v34 = vld [vmem:[#allocation8 + $0x570] sm:$0xff] }
 0x24d   :  { %v5113_v4 = vcombine.low %v595_v32, %v599_v34 }
 0x24e   :  { %3896 = vmatpush1.bf16.msra.mxu0 %v5057_v56  ;;  %v5114_v56 = vcombine.high %v595_v32, %v599_v34  ;;  %v644_v32 = vld [vmem:[#allocation8 + $0x6d8] sm:$0xff] }
 0x24f   :  { %4060 = vmatpush1.bf16.msra.mxu1 %v5059_v39  ;;  %3897 = vmatprep.subr.bf16.mxu0 %v5066_v41  ;;  %v5116_v39 = vcombine.high %v596_v62, %v600_v36  ;;  %v603_v41 = vld [vmem:[#allocation8 + $0x590] sm:$0xff]  ;;  %v648_v34 = vld [vmem:[#allocation8 + $0x6f8] sm:$0xff]  ;;  %v5155_v36 = vcombine.low %v636_v26, %v640_v14 }
 0x250   :  { %4061 = vmatprep.subr.bf16.mxu1 %v5068_v42  ;;  %v607_v42 = vld [vmem:[#allocation8 + $0x5b0] sm:$0xff] }
 0x252   :  { %3898 = vmatpush1.bf16.msra.mxu0 %v5065_v52  ;;  %v5122_v52 = vcombine.high %v603_v41, %v607_v42 }
 0x253   :  { %4062 = vmatpush1.bf16.msra.mxu1 %v5067_v53  ;;  %3908 = vmatprep.subr.bf16.mxu0 %v5074_v54  ;;  %v5124_v53 = vcombine.high %v604_v49, %v608_v51  ;;  %v611_v54 = vld [vmem:[#allocation8 + $0x5d0] sm:$0xff]  ;;  %v5163_v51 = vcombine.low %v644_v32, %v648_v34 }
 0x254   :  { %4072 = vmatprep.subr.bf16.mxu1 %v5076_v55  ;;  %v615_v55 = vld [vmem:[#allocation8 + $0x5f0] sm:$0xff] }
 0x255   :  { %3900 = vmatmul.mubr.bf16.vlgmr.msra.gmra.mrb[12].mxu0 %v6051_v6  ;;  %v5130_v2 = vcombine.high %v611_v54, %v615_v55 }
 0x256   :  { %4064 = vmatmul.mubr.bf16.vlgmr.msra.gmra.mrb[12].mxu1 %v6051_v6  ;;  %3909 = vmatpush1.bf16.msra.mxu0 %v5073_v63  ;;  %v5091_v6 = vcombine.low %v572_v10, %v576_v11  ;;  %v5121_v63 = vcombine.low %v603_v41, %v607_v42  ;;  %v5129_v10 = vcombine.low %v611_v54, %v615_v55  ;;  %v652_v41 = vld [vmem:[#allocation8 + $0x718] sm:$0xff] }
 0x257   :  { %3940 = vmatprep.mubr.bf16.mxu0 %v6055_v13  ;;  %4073 = vmatpush1.bf16.msra.mxu1 %v5075_v3  ;;  %v5132_v3 = vcombine.high %v612_v57, %v616_v61  ;;  %v5131_v11 = vcombine.low %v612_v57, %v616_v61  ;;  %v656_v42 = vld [vmem:[#allocation8 + $0x738] sm:$0xff] }
 0x258   :  { %4104 = vmatprep.mubr.bf16.mxu1 %v6055_v13  ;;  %3910 = vmatprep.subr.bf16.mxu0 %v5082_v5  ;;  %v5097_v13 = vcombine.low %v579_v20, %v583_v21  ;;  %v619_v5 = vld [vmem:[#allocation8 + $0x610] sm:$0xff]  ;;  %v628_v20 = vld [vmem:[#allocation8 + $0x658] sm:$0xff]  ;;  %v5171_v61 = vcombine.low %v652_v41, %v656_v42 }
 0x259   :  { %4074 = vmatprep.subr.bf16.mxu1 %v5084_v9  ;;  %v624_v9 = vld [vmem:[#allocation8 + $0x638] sm:$0xff]  ;;  %v5137_v58 = vcombine.low %v619_v5, %v623_v7 }
 0x25a   :  { %3911 = vmatpush1.bf16.msra.mxu0 %v5081_v16  ;;  %v5138_v16 = vcombine.high %v619_v5, %v623_v7  ;;  %v632_v21 = vld [vmem:[#allocation8 + $0x678] sm:$0xff]  ;;  %v5139_v22 = vcombine.low %v620_v8, %v624_v9 }
 0x25b   :  { %4075 = vmatpush1.bf16.msra.mxu1 %v5083_v17  ;;  %3912 = vmatprep.subr.bf16.mxu0 %v5090_v18  ;;  %v5140_v17 = vcombine.high %v620_v8, %v624_v9  ;;  %v627_v18 = vld [vmem:[#allocation8 + $0x650] sm:$0xff]  ;;  %v5147_v28 = vcombine.low %v628_v20, %v632_v21  ;;  %v660_v54 = vld [vmem:[#allocation8 + $0x758] sm:$0xff] }
 0x25c   :  { %4076 = vmatprep.subr.bf16.mxu1 %v5092_v19  ;;  %v631_v19 = vld [vmem:[#allocation8 + $0x670] sm:$0xff]  ;;  %v664_v55 = vld [vmem:[#allocation8 + $0x778] sm:$0xff] }
 0x25d   :  { %v5145_v27 = vcombine.low %v627_v18, %v631_v19  ;;  %v668_v5 = vld [vmem:[#allocation8 + $0x798] sm:$0xff]  ;;  %v5179_v9 = vcombine.low %v660_v54, %v664_v55 }
 0x25e   :  { %3913 = vmatpush1.bf16.msra.mxu0 %v5089_v23  ;;  %v5146_v23 = vcombine.high %v627_v18, %v631_v19  ;;  %v672_v7 = vld [vmem:[#allocation8 + $0x7b8] sm:$0xff] }
 0x25f   :  { %4077 = vmatpush1.bf16.msra.mxu1 %v5091_v6  ;;  %3914 = vmatprep.subr.bf16.mxu0 %v5098_v25  ;;  %v5148_v6 = vcombine.high %v628_v20, %v632_v21  ;;  %v635_v25 = vld [vmem:[#allocation8 + $0x690] sm:$0xff]  ;;  %v676_v18 = vld [vmem:[#allocation8 + $0x7d8] sm:$0xff]  ;;  %v5187_v21 = vcombine.low %v668_v5, %v672_v7 }
 0x260   :  { %4078 = vmatprep.subr.bf16.mxu1 %v5100_v45  ;;  %v639_v45 = vld [vmem:[#allocation8 + $0x6b0] sm:$0xff]  ;;  %v680_v19 = vld [vmem:[#allocation8 + $0x7f8] sm:$0xff] }
 0x261   :  { %v5153_v62 = vcombine.low %v635_v25, %v639_v45 }
 0x262   :  { %3915 = vmatpush1.bf16.msra.mxu0 %v5097_v13  ;;  %v5154_v13 = vcombine.high %v635_v25, %v639_v45  ;;  %v684_v25 = vld [vmem:[#allocation8 + $0x818] sm:$0xff] }
 0x263   :  { %4079 = vmatpush1.bf16.msra.mxu1 %v5099_v29  ;;  %3916 = vmatprep.subr.bf16.mxu0 %v5106_v30  ;;  %v5156_v29 = vcombine.high %v636_v26, %v640_v14  ;;  %v643_v30 = vld [vmem:[#allocation8 + $0x6d0] sm:$0xff]  ;;  %v688_v45 = vld [vmem:[#allocation8 + $0x838] sm:$0xff]  ;;  %v5195_v14 = vcombine.low %v676_v18, %v680_v19 }
 0x264   :  { %4080 = vmatprep.subr.bf16.mxu1 %v5108_v31  ;;  %v647_v31 = vld [vmem:[#allocation8 + $0x6f0] sm:$0xff] }
 0x265   :  { %v5161_v49 = vcombine.low %v643_v30, %v647_v31 }
 0x266   :  { %3917 = vmatpush1.bf16.msra.mxu0 %v5105_v37  ;;  %v5162_v37 = vcombine.high %v643_v30, %v647_v31  ;;  %v692_v31 = vld [vmem:[#allocation8 + $0x858] sm:$0xff] }
 0x267   :  { %4081 = vmatpush1.bf16.msra.mxu1 %v5107_v38  ;;  %3918 = vmatprep.subr.bf16.mxu0 %v5114_v56  ;;  %v5164_v38 = vcombine.high %v644_v32, %v648_v34  ;;  %v651_v56 = vld [vmem:[#allocation8 + $0x710] sm:$0xff]  ;;  %v696_v32 = vld [vmem:[#allocation8 + $0x878] sm:$0xff]  ;;  %v5203_v34 = vcombine.low %v684_v25, %v688_v45 }
 0x268   :  { %4082 = vmatprep.subr.bf16.mxu1 %v5116_v39  ;;  %v655_v39 = vld [vmem:[#allocation8 + $0x730] sm:$0xff] }
 0x269   :  { %v5169_v57 = vcombine.low %v651_v56, %v655_v39 }
 0x26a   :  { %3919 = vmatpush1.bf16.msra.mxu0 %v5113_v4  ;;  %v5170_v4 = vcombine.high %v651_v56, %v655_v39  ;;  %v700_v56 = vld [vmem:[#allocation8 + $0x898] sm:$0xff] }
 0x26b   :  { %4083 = vmatpush1.bf16.msra.mxu1 %v5115_v15  ;;  %3920 = vmatprep.subr.bf16.mxu0 %v5122_v52  ;;  %v5172_v15 = vcombine.high %v652_v41, %v656_v42  ;;  %v659_v52 = vld [vmem:[#allocation8 + $0x750] sm:$0xff]  ;;  %v704_v39 = vld [vmem:[#allocation8 + $0x8b8] sm:$0xff]  ;;  %v5211_v42 = vcombine.low %v692_v31, %v696_v32 }
 0x26c   :  { %4084 = vmatprep.subr.bf16.mxu1 %v5124_v53  ;;  %v663_v53 = vld [vmem:[#allocation8 + $0x770] sm:$0xff] }
 0x26d   :  { %v5177_v8 = vcombine.low %v659_v52, %v663_v53 }
 0x26e   :  { %3921 = vmatpush1.bf16.msra.mxu0 %v5121_v63  ;;  %v5178_v63 = vcombine.high %v659_v52, %v663_v53  ;;  %v708_v52 = vld [vmem:[#allocation8 + $0x8d8] sm:$0xff] }
 0x26f   :  { %4085 = vmatpush1.bf16.msra.mxu1 %v5123_v0  ;;  %3922 = vmatprep.subr.bf16.mxu0 %v5130_v2  ;;  %v5180_v0 = vcombine.high %v660_v54, %v664_v55  ;;  %v667_v2 = vld [vmem:[#allocation8 + $0x790] sm:$0xff]  ;;  %v712_v53 = vld [vmem:[#allocation8 + $0x8f8] sm:$0xff] }
 0x270   :  { %4086 = vmatprep.subr.bf16.mxu1 %v5132_v3  ;;  %v671_v3 = vld [vmem:[#allocation8 + $0x7b0] sm:$0xff] }
 0x271   :  { %v5185_v20 = vcombine.low %v667_v2, %v671_v3 }
 0x272   :  { %3923 = vmatpush1.bf16.msra.mxu0 %v5129_v10  ;;  %v5186_v10 = vcombine.high %v667_v2, %v671_v3  ;;  %v720_v2 = vld [vmem:[#allocation8 + $0x938] sm:$0xff]  ;;  %v5227_v3 = vcombine.low %v708_v52, %v712_v53 }
 0x273   :  { %4087 = vmatpush1.bf16.msra.mxu1 %v5131_v11  ;;  %3924 = vmatprep.subr.bf16.mxu0 %v5138_v16  ;;  %v5188_v11 = vcombine.high %v668_v5, %v672_v7  ;;  %v675_v16 = vld [vmem:[#allocation8 + $0x7d0] sm:$0xff] }
 0x274   :  { %4088 = vmatprep.subr.bf16.mxu1 %v5140_v17  ;;  %v679_v17 = vld [vmem:[#allocation8 + $0x7f0] sm:$0xff] }
 0x275   :  { %v5193_v26 = vcombine.low %v675_v16, %v679_v17 }
 0x276   :  { %3925 = vmatpush1.bf16.msra.mxu0 %v5137_v58  ;;  %v5194_v58 = vcombine.high %v675_v16, %v679_v17 }
 0x277   :  { %4089 = vmatpush1.bf16.msra.mxu1 %v5139_v22  ;;  %3926 = vmatprep.subr.bf16.mxu0 %v5146_v23  ;;  %v5196_v22 = vcombine.high %v676_v18, %v680_v19  ;;  %v683_v23 = vld [vmem:[#allocation8 + $0x810] sm:$0xff] }
 0x278   :  { %4090 = vmatprep.subr.bf16.mxu1 %v5148_v6  ;;  %v687_v6 = vld [vmem:[#allocation8 + $0x830] sm:$0xff] }
 0x279   :  { %v5201_v30 = vcombine.low %v683_v23, %v687_v6 }
 0x27a   :  { %3927 = vmatpush1.bf16.msra.mxu0 %v5145_v27  ;;  %v5202_v27 = vcombine.high %v683_v23, %v687_v6 }
 0x27b   :  { %4091 = vmatpush1.bf16.msra.mxu1 %v5147_v28  ;;  %3928 = vmatprep.subr.bf16.mxu0 %v5154_v13  ;;  %v5204_v28 = vcombine.high %v684_v25, %v688_v45  ;;  %v691_v13 = vld [vmem:[#allocation8 + $0x850] sm:$0xff] }
 0x27c   :  { %4092 = vmatprep.subr.bf16.mxu1 %v5156_v29  ;;  %v695_v29 = vld [vmem:[#allocation8 + $0x870] sm:$0xff] }
 0x27d   :  { %v5209_v41 = vcombine.low %v691_v13, %v695_v29 }
 0x27e   :  { %3929 = vmatpush1.bf16.msra.mxu0 %v5153_v62  ;;  %v5210_v62 = vcombine.high %v691_v13, %v695_v29 }
 0x27f   :  { %4093 = vmatpush1.bf16.msra.mxu1 %v5155_v36  ;;  %3930 = vmatprep.subr.bf16.mxu0 %v5162_v37  ;;  %v699_v36 = vld [vmem:[#allocation8 + $0x890] sm:$0xff] }
 0x280   :  { %4094 = vmatprep.subr.bf16.mxu1 %v5164_v38  ;;  %v703_v37 = vld [vmem:[#allocation8 + $0x8b0] sm:$0xff]  ;;  %v5212_v38 = vcombine.high %v692_v31, %v696_v32 }
 0x281   :  { %v5217_v54 = vcombine.low %v699_v36, %v703_v37  ;;  %v747_v32 = vld [vmem:[#allocation8 + $0xa10] sm:$0xff] }
 0x282   :  { %3931 = vmatpush1.bf16.msra.mxu0 %v5161_v49  ;;  %v5218_v49 = vcombine.high %v699_v36, %v703_v37  ;;  %v752_v36 = vld [vmem:[#allocation8 + $0xa38] sm:$0xff] }
 0x283   :  { %4095 = vmatpush1.bf16.msra.mxu1 %v5163_v51  ;;  %3932 = vmatprep.subr.bf16.mxu0 %v5170_v4  ;;  %v5220_v51 = vcombine.high %v700_v56, %v704_v39  ;;  %v707_v4 = vld [vmem:[#allocation8 + $0x8d0] sm:$0xff] }
 0x284   :  { %4096 = vmatprep.subr.bf16.mxu1 %v5172_v15  ;;  %v711_v15 = vld [vmem:[#allocation8 + $0x8f0] sm:$0xff] }
 0x285   :  { %v5226_v55 = vcombine.high %v707_v4, %v711_v15 }
 0x286   :  { %3933 = vmatpush1.bf16.msra.mxu0 %v5169_v57  ;;  %v5228_v57 = vcombine.high %v708_v52, %v712_v53 }
 0x287   :  { %4097 = vmatpush1.bf16.msra.mxu1 %v5171_v61  ;;  %3934 = vmatprep.subr.bf16.mxu0 %v5178_v63  ;;  %v715_v61 = vld [vmem:[#allocation8 + $0x910] sm:$0xff] }
 0x288   :  { %4098 = vmatprep.subr.bf16.mxu1 %v5180_v0  ;;  %v719_v63 = vld [vmem:[#allocation8 + $0x930] sm:$0xff]  ;;  %v716_v0 = vld [vmem:[#allocation8 + $0x918] sm:$0xff] }
 0x289   :  { %v5234_v5 = vcombine.high %v715_v61, %v719_v63  ;;  %v5236_v7 = vcombine.high %v716_v0, %v720_v2  ;;  %v5233_v16 = vcombine.low %v715_v61, %v719_v63  ;;  %v5235_v17 = vcombine.low %v716_v0, %v720_v2 }
 0x28a   :  { %3935 = vmatpush1.bf16.msra.mxu0 %v5177_v8  ;;  %v723_v8 = vld [vmem:[#allocation8 + $0x950] sm:$0xff] }
 0x28b   :  { %4099 = vmatpush1.bf16.msra.mxu1 %v5179_v9  ;;  %3936 = vmatprep.subr.bf16.mxu0 %v5186_v10  ;;  %v727_v9 = vld [vmem:[#allocation8 + $0x970] sm:$0xff]  ;;  %v724_v10 = vld [vmem:[#allocation8 + $0x958] sm:$0xff] }
 0x28c   :  { %4100 = vmatprep.subr.bf16.mxu1 %v5188_v11  ;;  %v728_v11 = vld [vmem:[#allocation8 + $0x978] sm:$0xff]  ;;  %v5242_v18 = vcombine.high %v723_v8, %v727_v9  ;;  %v5241_v23 = vcombine.low %v723_v8, %v727_v9 }
 0x28d   :  { %v5244_v19 = vcombine.high %v724_v10, %v728_v11  ;;  %v5243_v6 = vcombine.low %v724_v10, %v728_v11 }
 0x28e   :  { %3937 = vmatpush1.bf16.msra.mxu0 %v5185_v20  ;;  %v731_v20 = vld [vmem:[#allocation8 + $0x990] sm:$0xff] }
 0x28f   :  { %4101 = vmatpush1.bf16.msra.mxu1 %v5187_v21  ;;  %3938 = vmatprep.subr.bf16.mxu0 %v5194_v58  ;;  %v735_v21 = vld [vmem:[#allocation8 + $0x9b0] sm:$0xff]  ;;  %v732_v58 = vld [vmem:[#allocation8 + $0x998] sm:$0xff] }
 0x290   :  { %4102 = vmatprep.subr.bf16.mxu1 %v5196_v22  ;;  %v736_v22 = vld [vmem:[#allocation8 + $0x9b8] sm:$0xff]  ;;  %v5250_v25 = vcombine.high %v731_v20, %v735_v21  ;;  %v5249_v13 = vcombine.low %v731_v20, %v735_v21 }
 0x291   :  { %v5252_v45 = vcombine.high %v732_v58, %v736_v22  ;;  %v5251_v29 = vcombine.low %v732_v58, %v736_v22 }
 0x292   :  { %3939 = vmatpush1.bf16.msra.mxu0 %v5193_v26  ;;  %v739_v26 = vld [vmem:[#allocation8 + $0x9d0] sm:$0xff] }
 0x293   :  { %4103 = vmatpush1.bf16.msra.mxu1 %v5195_v14  ;;  %3949 = vmatprep.subr.bf16.mxu0 %v5202_v27  ;;  %v743_v14 = vld [vmem:[#allocation8 + $0x9f0] sm:$0xff]  ;;  %v740_v27 = vld [vmem:[#allocation8 + $0x9d8] sm:$0xff] }
 0x294   :  { %4113 = vmatprep.subr.bf16.mxu1 %v5204_v28  ;;  %v744_v28 = vld [vmem:[#allocation8 + $0x9f8] sm:$0xff]  ;;  %v5257_v37 = vcombine.low %v739_v26, %v743_v14 }
 0x295   :  { %3941 = vmatmul.mubr.bf16.vlgmr.msra.gmra.mrb[12].mxu0 %v6079_v50  ;;  %v5260_v31 = vcombine.high %v740_v27, %v744_v28 }
 0x296   :  { %4105 = vmatmul.mubr.bf16.vlgmr.msra.gmra.mrb[12].mxu1 %v6079_v50  ;;  %3950 = vmatpush1.bf16.msra.mxu0 %v5201_v30  ;;  %v5219_v50 = vcombine.low %v700_v56, %v704_v39  ;;  %v5258_v30 = vcombine.high %v739_v26, %v743_v14 }
 0x297   :  { %3981 = vmatprep.mubr.bf16.mxu0 %v6081_v60  ;;  %4114 = vmatpush1.bf16.msra.mxu1 %v5203_v34  ;;  %v751_v34 = vld [vmem:[#allocation8 + $0xa30] sm:$0xff] }
 0x298   :  { %4145 = vmatprep.mubr.bf16.mxu1 %v6081_v60  ;;  %3951 = vmatprep.subr.bf16.mxu0 %v5210_v62  ;;  %v5225_v60 = vcombine.low %v707_v4, %v711_v15  ;;  %v748_v62 = vld [vmem:[#allocation8 + $0xa18] sm:$0xff]  ;;  %v5266_v56 = vcombine.high %v747_v32, %v751_v34  ;;  %v5265_v4 = vcombine.low %v747_v32, %v751_v34 }
 0x299   :  { %4115 = vmatprep.subr.bf16.mxu1 %v5212_v38  ;;  %v5259_v38 = vcombine.low %v740_v27, %v744_v28  ;;  %v5268_v39 = vcombine.high %v748_v62, %v752_v36  ;;  %v5267_v15 = vcombine.low %v748_v62, %v752_v36 }
 0x29a   :  { %3952 = vmatpush1.bf16.msra.mxu0 %v5209_v41  ;;  %v755_v41 = vld [vmem:[#allocation8 + $0xa50] sm:$0xff] }
 0x29b   :  { %4116 = vmatpush1.bf16.msra.mxu1 %v5211_v42  ;;  %3953 = vmatprep.subr.bf16.mxu0 %v5218_v49  ;;  %v759_v42 = vld [vmem:[#allocation8 + $0xa70] sm:$0xff]  ;;  %v756_v49 = vld [vmem:[#allocation8 + $0xa58] sm:$0xff] }
 0x29c   :  { %4117 = vmatprep.subr.bf16.mxu1 %v5220_v51  ;;  %v760_v51 = vld [vmem:[#allocation8 + $0xa78] sm:$0xff]  ;;  %v5274_v52 = vcombine.high %v755_v41, %v759_v42  ;;  %v5273_v61 = vcombine.low %v755_v41, %v759_v42 }
 0x29d   :  { %v5276_v53 = vcombine.high %v756_v49, %v760_v51  ;;  %v5275_v63 = vcombine.low %v756_v49, %v760_v51 }
 0x29e   :  { %3954 = vmatpush1.bf16.msra.mxu0 %v5217_v54  ;;  %v763_v54 = vld [vmem:[#allocation8 + $0xa90] sm:$0xff] }
 0x29f   :  { %4118 = vmatpush1.bf16.msra.mxu1 %v5219_v50  ;;  %3955 = vmatprep.subr.bf16.mxu0 %v5226_v55  ;;  %v767_v50 = vld [vmem:[#allocation8 + $0xab0] sm:$0xff]  ;;  %v764_v55 = vld [vmem:[#allocation8 + $0xa98] sm:$0xff] }
 0x2a0   :  { %4119 = vmatprep.subr.bf16.mxu1 %v5228_v57  ;;  %v768_v57 = vld [vmem:[#allocation8 + $0xab8] sm:$0xff]  ;;  %v5282_v0 = vcombine.high %v763_v54, %v767_v50  ;;  %v5281_v8 = vcombine.low %v763_v54, %v767_v50 }
 0x2a1   :  { %v5284_v2 = vcombine.high %v764_v55, %v768_v57  ;;  %v5283_v9 = vcombine.low %v764_v55, %v768_v57 }
 0x2a2   :  { %3956 = vmatpush1.bf16.msra.mxu0 %v5225_v60  ;;  %v771_v60 = vld [vmem:[#allocation8 + $0xad0] sm:$0xff] }
 0x2a3   :  { %4120 = vmatpush1.bf16.msra.mxu1 %v5227_v3  ;;  %3957 = vmatprep.subr.bf16.mxu0 %v5234_v5  ;;  %v775_v3 = vld [vmem:[#allocation8 + $0xaf0] sm:$0xff]  ;;  %v772_v5 = vld [vmem:[#allocation8 + $0xad8] sm:$0xff] }
 0x2a4   :  { %4121 = vmatprep.subr.bf16.mxu1 %v5236_v7  ;;  %v776_v7 = vld [vmem:[#allocation8 + $0xaf8] sm:$0xff]  ;;  %v5290_v10 = vcombine.high %v771_v60, %v775_v3  ;;  %v5289_v20 = vcombine.low %v771_v60, %v775_v3 }
 0x2a5   :  { %v5292_v11 = vcombine.high %v772_v5, %v776_v7  ;;  %v5291_v21 = vcombine.low %v772_v5, %v776_v7  ;;  %v824_v60 = vld [vmem:[#allocation8 + $0xc78] sm:$0xff]  ;;  %v827_v7 = vld [vmem:[#allocation8 + $0xc90] sm:$0xff] }
 0x2a6   :  { %3958 = vmatpush1.bf16.msra.mxu0 %v5233_v16  ;;  %v779_v16 = vld [vmem:[#allocation8 + $0xb10] sm:$0xff] }
 0x2a7   :  { %4122 = vmatpush1.bf16.msra.mxu1 %v5235_v17  ;;  %3959 = vmatprep.subr.bf16.mxu0 %v5242_v18  ;;  %v783_v17 = vld [vmem:[#allocation8 + $0xb30] sm:$0xff]  ;;  %v780_v18 = vld [vmem:[#allocation8 + $0xb18] sm:$0xff] }
 0x2a8   :  { %4123 = vmatprep.subr.bf16.mxu1 %v5244_v19  ;;  %v784_v19 = vld [vmem:[#allocation8 + $0xb38] sm:$0xff]  ;;  %v5298_v58 = vcombine.high %v779_v16, %v783_v17  ;;  %v5297_v26 = vcombine.low %v779_v16, %v783_v17 }
 0x2a9   :  { %v5300_v22 = vcombine.high %v780_v18, %v784_v19  ;;  %v5299_v14 = vcombine.low %v780_v18, %v784_v19 }
 0x2aa   :  { %3960 = vmatpush1.bf16.msra.mxu0 %v5241_v23  ;;  %v787_v23 = vld [vmem:[#allocation8 + $0xb50] sm:$0xff] }
 0x2ab   :  { %4124 = vmatpush1.bf16.msra.mxu1 %v5243_v6  ;;  %3961 = vmatprep.subr.bf16.mxu0 %v5250_v25  ;;  %v791_v6 = vld [vmem:[#allocation8 + $0xb70] sm:$0xff]  ;;  %v788_v25 = vld [vmem:[#allocation8 + $0xb58] sm:$0xff] }
 0x2ac   :  { %4125 = vmatprep.subr.bf16.mxu1 %v5252_v45  ;;  %v792_v45 = vld [vmem:[#allocation8 + $0xb78] sm:$0xff]  ;;  %v5306_v27 = vcombine.high %v787_v23, %v791_v6  ;;  %v5305_v32 = vcombine.low %v787_v23, %v791_v6 }
 0x2ad   :  { %v5308_v28 = vcombine.high %v788_v25, %v792_v45  ;;  %v5307_v34 = vcombine.low %v788_v25, %v792_v45  ;;  %v843_v45 = vld [vmem:[#allocation8 + $0xd10] sm:$0xff] }
 0x2ae   :  { %3962 = vmatpush1.bf16.msra.mxu0 %v5249_v13  ;;  %v795_v13 = vld [vmem:[#allocation8 + $0xb90] sm:$0xff] }
 0x2af   :  { %4126 = vmatpush1.bf16.msra.mxu1 %v5251_v29  ;;  %3963 = vmatprep.subr.bf16.mxu0 %v5258_v30  ;;  %v799_v29 = vld [vmem:[#allocation8 + $0xbb0] sm:$0xff]  ;;  %v796_v30 = vld [vmem:[#allocation8 + $0xb98] sm:$0xff] }
 0x2b0   :  { %4127 = vmatprep.subr.bf16.mxu1 %v5260_v31  ;;  %v800_v31 = vld [vmem:[#allocation8 + $0xbb8] sm:$0xff]  ;;  %v5314_v62 = vcombine.high %v795_v13, %v799_v29  ;;  %v5313_v41 = vcombine.low %v795_v13, %v799_v29 }
 0x2b1   :  { %v5316_v36 = vcombine.high %v796_v30, %v800_v31  ;;  %v5315_v42 = vcombine.low %v796_v30, %v800_v31  ;;  %v851_v30 = vld [vmem:[#allocation8 + $0xd50] sm:$0xff] }
 0x2b2   :  { %3964 = vmatpush1.bf16.msra.mxu0 %v5257_v37  ;;  %v803_v37 = vld [vmem:[#allocation8 + $0xbd0] sm:$0xff] }
 0x2b3   :  { %4128 = vmatpush1.bf16.msra.mxu1 %v5259_v38  ;;  %3965 = vmatprep.subr.bf16.mxu0 %v5266_v56  ;;  %v807_v38 = vld [vmem:[#allocation8 + $0xbf0] sm:$0xff]  ;;  %v804_v56 = vld [vmem:[#allocation8 + $0xbd8] sm:$0xff] }
 0x2b4   :  { %4129 = vmatprep.subr.bf16.mxu1 %v5268_v39  ;;  %v808_v39 = vld [vmem:[#allocation8 + $0xbf8] sm:$0xff]  ;;  %v5322_v49 = vcombine.high %v803_v37, %v807_v38  ;;  %v5321_v54 = vcombine.low %v803_v37, %v807_v38  ;;  %v855_v31 = vld [vmem:[#allocation8 + $0xd70] sm:$0xff] }
 0x2b5   :  { %v5324_v51 = vcombine.high %v804_v56, %v808_v39  ;;  %v5323_v50 = vcombine.low %v804_v56, %v808_v39  ;;  %v5370_v37 = vcombine.high %v851_v30, %v855_v31  ;;  %v859_v56 = vld [vmem:[#allocation8 + $0xd90] sm:$0xff] }
 0x2b6   :  { %3966 = vmatpush1.bf16.msra.mxu0 %v5265_v4  ;;  %v811_v4 = vld [vmem:[#allocation8 + $0xc10] sm:$0xff] }
 0x2b7   :  { %4130 = vmatpush1.bf16.msra.mxu1 %v5267_v15  ;;  %3967 = vmatprep.subr.bf16.mxu0 %v5274_v52  ;;  %v815_v15 = vld [vmem:[#allocation8 + $0xc30] sm:$0xff]  ;;  %v812_v52 = vld [vmem:[#allocation8 + $0xc18] sm:$0xff] }
 0x2b8   :  { %4131 = vmatprep.subr.bf16.mxu1 %v5276_v53  ;;  %v816_v53 = vld [vmem:[#allocation8 + $0xc38] sm:$0xff]  ;;  %v5330_v55 = vcombine.high %v811_v4, %v815_v15  ;;  %v863_v39 = vld [vmem:[#allocation8 + $0xdb0] sm:$0xff] }
 0x2b9   :  { %v5332_v57 = vcombine.high %v812_v52, %v816_v53  ;;  %v5331_v3 = vcombine.low %v812_v52, %v816_v53 }
 0x2ba   :  { %3968 = vmatpush1.bf16.msra.mxu0 %v5273_v61  ;;  %v819_v61 = vld [vmem:[#allocation8 + $0xc50] sm:$0xff] }
 0x2bb   :  { %4132 = vmatpush1.bf16.msra.mxu1 %v5275_v63  ;;  %3969 = vmatprep.subr.bf16.mxu0 %v5282_v0  ;;  %v823_v63 = vld [vmem:[#allocation8 + $0xc70] sm:$0xff]  ;;  %v5329_v0 = vcombine.low %v811_v4, %v815_v15  ;;  %v5378_v4 = vcombine.high %v859_v56, %v863_v39 }
 0x2bc   :  { %4133 = vmatprep.subr.bf16.mxu1 %v5284_v2  ;;  %v820_v2 = vld [vmem:[#allocation8 + $0xc58] sm:$0xff]  ;;  %v5338_v5 = vcombine.high %v819_v61, %v823_v63  ;;  %v5337_v16 = vcombine.low %v819_v61, %v823_v63 }
 0x2bd   :  { %v5339_v17 = vcombine.low %v820_v2, %v824_v60  ;;  %v868_v61 = vld [vmem:[#allocation8 + $0xdd8] sm:$0xff] }
 0x2be   :  { %3970 = vmatpush1.bf16.msra.mxu0 %v5281_v8  ;;  %v831_v8 = vld [vmem:[#allocation8 + $0xcb0] sm:$0xff]  ;;  %v872_v63 = vld [vmem:[#allocation8 + $0xdf8] sm:$0xff] }
 0x2bf   :  { %4134 = vmatpush1.bf16.msra.mxu1 %v5283_v9  ;;  %3971 = vmatprep.subr.bf16.mxu0 %v5290_v10  ;;  %v5340_v9 = vcombine.high %v820_v2, %v824_v60  ;;  %v828_v10 = vld [vmem:[#allocation8 + $0xc98] sm:$0xff]  ;;  %v5346_v18 = vcombine.high %v827_v7, %v831_v8  ;;  %v5345_v23 = vcombine.low %v827_v7, %v831_v8 }
 0x2c0   :  { %4135 = vmatprep.subr.bf16.mxu1 %v5292_v11  ;;  %v832_v11 = vld [vmem:[#allocation8 + $0xcb8] sm:$0xff]  ;;  %v5377_v60 = vcombine.low %v859_v56, %v863_v39 }
 0x2c1   :  { %v5348_v19 = vcombine.high %v828_v10, %v832_v11 }
 0x2c2   :  { %3972 = vmatpush1.bf16.msra.mxu0 %v5289_v20  ;;  %v835_v20 = vld [vmem:[#allocation8 + $0xcd0] sm:$0xff] }
 0x2c3   :  { %4136 = vmatpush1.bf16.msra.mxu1 %v5291_v21  ;;  %3973 = vmatprep.subr.bf16.mxu0 %v5298_v58  ;;  %v839_v21 = vld [vmem:[#allocation8 + $0xcf0] sm:$0xff]  ;;  %v836_v58 = vld [vmem:[#allocation8 + $0xcd8] sm:$0xff] }
 0x2c4   :  { %4137 = vmatprep.subr.bf16.mxu1 %v5300_v22  ;;  %v840_v22 = vld [vmem:[#allocation8 + $0xcf8] sm:$0xff]  ;;  %v5354_v6 = vcombine.high %v835_v20, %v839_v21 }
 0x2c5   :  { %v5356_v25 = vcombine.high %v836_v58, %v840_v22 }
 0x2c6   :  { %3974 = vmatpush1.bf16.msra.mxu0 %v5297_v26  ;;  %v847_v26 = vld [vmem:[#allocation8 + $0xd30] sm:$0xff] }
 0x2c7   :  { %4138 = vmatpush1.bf16.msra.mxu1 %v5299_v14  ;;  %3975 = vmatprep.subr.bf16.mxu0 %v5306_v27  ;;  %v844_v14 = vld [vmem:[#allocation8 + $0xd18] sm:$0xff]  ;;  %v5362_v13 = vcombine.high %v843_v45, %v847_v26 }
 0x2c8   :  { %4139 = vmatprep.subr.bf16.mxu1 %v5308_v28  ;;  %v848_v27 = vld [vmem:[#allocation8 + $0xd38] sm:$0xff]  ;;  %v5355_v28 = vcombine.low %v836_v58, %v840_v22  ;;  %v883_v58 = vld [vmem:[#allocation8 + $0xe50] sm:$0xff] }
 0x2c9   :  { %v5364_v29 = vcombine.high %v844_v14, %v848_v27  ;;  %v887_v22 = vld [vmem:[#allocation8 + $0xe70] sm:$0xff] }
 0x2ca   :  { %3976 = vmatpush1.bf16.msra.mxu0 %v5305_v32  ;;  %v852_v32 = vld [vmem:[#allocation8 + $0xd58] sm:$0xff] }
 0x2cb   :  { %4140 = vmatpush1.bf16.msra.mxu1 %v5307_v34  ;;  %3977 = vmatprep.subr.bf16.mxu0 %v5314_v62  ;;  %v856_v34 = vld [vmem:[#allocation8 + $0xd78] sm:$0xff]  ;;  %v5361_v62 = vcombine.low %v843_v45, %v847_v26  ;;  %v5402_v45 = vcombine.high %v883_v58, %v887_v22 }
 0x2cc   :  { %4141 = vmatprep.subr.bf16.mxu1 %v5316_v36  ;;  %v5363_v36 = vcombine.low %v844_v14, %v848_v27  ;;  %v5372_v38 = vcombine.high %v852_v32, %v856_v34  ;;  %v891_v14 = vld [vmem:[#allocation8 + $0xe90] sm:$0xff] }
 0x2cd   :  { %v895_v27 = vld [vmem:[#allocation8 + $0xeb0] sm:$0xff] }
 0x2ce   :  { %3978 = vmatpush1.bf16.msra.mxu0 %v5313_v41  ;;  %v860_v41 = vld [vmem:[#allocation8 + $0xd98] sm:$0xff] }
 0x2cf   :  { %4142 = vmatpush1.bf16.msra.mxu1 %v5315_v42  ;;  %3979 = vmatprep.subr.bf16.mxu0 %v5322_v49  ;;  %v864_v42 = vld [vmem:[#allocation8 + $0xdb8] sm:$0xff]  ;;  %v5369_v49 = vcombine.low %v851_v30, %v855_v31  ;;  %v5410_v30 = vcombine.high %v891_v14, %v895_v27 }
 0x2d0   :  { %4143 = vmatprep.subr.bf16.mxu1 %v5324_v51  ;;  %v5371_v51 = vcombine.low %v852_v32, %v856_v34  ;;  %v5380_v53 = vcombine.high %v860_v41, %v864_v42  ;;  %v5379_v7 = vcombine.low %v860_v41, %v864_v42  ;;  %v899_v32 = vld [vmem:[#allocation8 + $0xed0] sm:$0xff] }
 0x2d1   :  { %v903_v34 = vld [vmem:[#allocation8 + $0xef0] sm:$0xff] }
 0x2d2   :  { %3980 = vmatpush1.bf16.msra.mxu0 %v5321_v54  ;;  %v867_v54 = vld [vmem:[#allocation8 + $0xdd0] sm:$0xff]  ;;  %v5418_v56 = vcombine.high %v899_v32, %v903_v34 }
 0x2d3   :  { %4144 = vmatpush1.bf16.msra.mxu1 %v5323_v50  ;;  %3990 = vmatprep.subr.bf16.mxu0 %v5330_v55  ;;  %v871_v50 = vld [vmem:[#allocation8 + $0xdf0] sm:$0xff] }
 0x2d4   :  { %4154 = vmatprep.subr.bf16.mxu1 %v5332_v57  ;;  %v5386_v8 = vcombine.high %v867_v54, %v871_v50  ;;  %v907_v41 = vld [vmem:[#allocation8 + $0xf10] sm:$0xff] }
 0x2d5   :  { %3982 = vmatmul.mubr.bf16.vlgmr.msra.gmra.mrb[12].mxu0 %v6097_v33  ;;  %v911_v42 = vld [vmem:[#allocation8 + $0xf30] sm:$0xff] }
 0x2d6   :  { %4146 = vmatmul.mubr.bf16.vlgmr.msra.gmra.mrb[12].mxu1 %v6097_v33  ;;  %3991 = vmatpush1.bf16.msra.mxu0 %v5329_v0  ;;  %v5347_v33 = vcombine.low %v828_v10, %v832_v11  ;;  %v875_v10 = vld [vmem:[#allocation8 + $0xe10] sm:$0xff] }
 0x2d7   :  { %4022 = vmatprep.mubr.bf16.mxu0 %v6099_v40  ;;  %4155 = vmatpush1.bf16.msra.mxu1 %v5331_v3  ;;  %v879_v11 = vld [vmem:[#allocation8 + $0xe30] sm:$0xff] }
 0x2d8   :  { %4186 = vmatprep.mubr.bf16.mxu1 %v6099_v40  ;;  %3992 = vmatprep.subr.bf16.mxu0 %v5338_v5  ;;  %v5353_v40 = vcombine.low %v835_v20, %v839_v21  ;;  %v5394_v20 = vcombine.high %v875_v10, %v879_v11 }
 0x2d9   :  { %4156 = vmatprep.subr.bf16.mxu1 %v5340_v9  ;;  %v5388_v9 = vcombine.high %v868_v61, %v872_v63 }
 0x2da   :  { %3993 = vmatpush1.bf16.msra.mxu0 %v5337_v16  ;;  %v876_v16 = vld [vmem:[#allocation8 + $0xe18] sm:$0xff] }
 0x2db   :  { %4157 = vmatpush1.bf16.msra.mxu1 %v5339_v17  ;;  %3994 = vmatprep.subr.bf16.mxu0 %v5346_v18  ;;  %v880_v17 = vld [vmem:[#allocation8 + $0xe38] sm:$0xff]  ;;  %v5385_v18 = vcombine.low %v867_v54, %v871_v50  ;;  %v5426_v54 = vcombine.high %v907_v41, %v911_v42 }
 0x2dc   :  { %4158 = vmatprep.subr.bf16.mxu1 %v5348_v19  ;;  %v5387_v19 = vcombine.low %v868_v61, %v872_v63  ;;  %v5396_v21 = vcombine.high %v876_v16, %v880_v17  ;;  %v915_v61 = vld [vmem:[#allocation8 + $0xf50] sm:$0xff] }
 0x2dd   :  { %v919_v63 = vld [vmem:[#allocation8 + $0xf70] sm:$0xff] }
 0x2de   :  { %3995 = vmatpush1.bf16.msra.mxu0 %v5345_v23  ;;  %v884_v23 = vld [vmem:[#allocation8 + $0xe58] sm:$0xff] }
 0x2df   :  { %4159 = vmatpush1.bf16.msra.mxu1 %v5347_v33  ;;  %3996 = vmatprep.subr.bf16.mxu0 %v5354_v6  ;;  %v888_v33 = vld [vmem:[#allocation8 + $0xe78] sm:$0xff]  ;;  %v5393_v6 = vcombine.low %v875_v10, %v879_v11 }
 0x2e0   :  { %4160 = vmatprep.subr.bf16.mxu1 %v5356_v25  ;;  %v5395_v25 = vcombine.low %v876_v16, %v880_v17  ;;  %v5404_v26 = vcombine.high %v884_v23, %v888_v33  ;;  %v924_v10 = vld [vmem:[#allocation8 + $0xf98] sm:$0xff]  ;;  %v6135_v16 = vld [vmem:[#allocation10] sm:$0xff]  ;;  %v5433_v17 = vcombine.low %v915_v61, %v919_v63 }
 0x2e1   :  { %v928_v11 = vld [vmem:[#allocation8 + $0xfb8] sm:$0xff] }
 0x2e2   :  { %3997 = vmatpush1.bf16.msra.mxu0 %v5353_v40  ;;  %v892_v40 = vld [vmem:[#allocation8 + $0xe98] sm:$0xff] }
 0x2e3   :  { %4161 = vmatpush1.bf16.msra.mxu1 %v5355_v28  ;;  %3998 = vmatprep.subr.bf16.mxu0 %v5362_v13  ;;  %v896_v28 = vld [vmem:[#allocation8 + $0xeb8] sm:$0xff]  ;;  %v5401_v13 = vcombine.low %v883_v58, %v887_v22  ;;  %v935_v58 = vld [vmem:[#allocation8 + $0xff0] sm:$0xff]  ;;  %v946_v22 = vrot.slane %v6135_v16, %v127_v46 }
 0x2e4   :  { %4162 = vmatprep.subr.bf16.mxu1 %v5364_v29  ;;  %v5403_v29 = vcombine.low %v884_v23, %v888_v33  ;;  %v5412_v31 = vcombine.high %v892_v40, %v896_v28  ;;  %v932_v23 = vld [vmem:[#allocation8 + $0xfd8] sm:$0xff] }
 0x2e5   :  { %v936_v33 = vld [vmem:[#allocation8 + $0xff8] sm:$0xff] }
 0x2e6   :  { %3999 = vmatpush1.bf16.msra.mxu0 %v5361_v62  ;;  %v900_v62 = vld [vmem:[#allocation8 + $0xed8] sm:$0xff] }
 0x2e7   :  { %4163 = vmatpush1.bf16.msra.mxu1 %v5363_v36  ;;  %4000 = vmatprep.subr.bf16.mxu0 %v5370_v37  ;;  %v904_v36 = vld [vmem:[#allocation8 + $0xef8] sm:$0xff]  ;;  %v5409_v37 = vcombine.low %v891_v14, %v895_v27  ;;  %v5452_v14 = vcombine.high %v932_v23, %v936_v33 }
 0x2e8   :  { %v6127_v15 = vpop.f32.mrb[8].mxu0  ;;  %v6129_v52 = vpop.f32.mrb[8].mxu1  ;;  %4164 = vmatprep.subr.bf16.mxu1 %v5372_v38  ;;  %v5411_v38 = vcombine.low %v892_v40, %v896_v28  ;;  %v5420_v39 = vcombine.high %v900_v62, %v904_v36  ;;  %v5451_v28 = vcombine.low %v932_v23, %v936_v33  ;;  %v5708_v23 = vld [vmem:[%s6379_s5 + $0x148] sm:$0xff]  }
 0x2e9   :  { %v6131_v55 = vpop.f32.mrb[9].mxu0  ;;  %v6133_v57 = vpop.f32.mrb[9].mxu1 }
 0x2ea   :  { %v3700_v0 = vpop.f32.mrb[10].mxu0  ;;  %v3864_v2 = vpop.f32.mrb[10].mxu1  ;;  %4001 = vmatpush1.bf16.msra.mxu0 %v5369_v49  ;;  %v908_v49 = vld [vmem:[#allocation8 + $0xf18] sm:$0xff]  ;;  %v5607_v27 = vadd.f32 %v6131_v55, %v946_v22 }
 0x2eb   :  { %4165 = vmatpush1.bf16.msra.mxu1 %v5371_v51  ;;  %v3701_v3 = vpop.f32.mrb[11].mxu0  ;;  %v3865_v5 = vpop.f32.mrb[11].mxu1  ;;  %4002 = vmatprep.subr.bf16.mxu0 %v5378_v4  ;;  %v912_v51 = vld [vmem:[#allocation8 + $0xf38] sm:$0xff]  ;;  %v5417_v4 = vcombine.low %v899_v32, %v903_v34 }
 0x2ec   :  { %4166 = vmatprep.subr.bf16.mxu1 %v5380_v53  ;;  %v5419_v53 = vcombine.low %v900_v62, %v904_v36  ;;  %v5428_v50 = vcombine.high %v908_v49, %v912_v51  ;;  %v916_v0 = vld [vmem:[#allocation8 + $0xf58] sm:$0xff]  ;;  %v5427_v3 = vcombine.low %v908_v49, %v912_v51  ;;  %v5434_v5 = vcombine.high %v915_v61, %v919_v63  ;;  %v5686_v49 = vld [vmem:[%s6379_s5 + $0x18] sm:$0xff]  }
 0x2ed   :  { %v920_v2 = vld [vmem:[#allocation8 + $0xf78] sm:$0xff]  ;;  %v5687_v51 = vld [vmem:[%s6379_s5 + $0x98] sm:$0xff]  }
 0x2ee   :  { %4003 = vmatpush1.bf16.msra.mxu0 %v5377_v60  ;;  %v5425_v60 = vcombine.low %v907_v41, %v911_v42  ;;  %v5674_v55 = vld [vmem:[%s6379_s5] sm:$0xff]   ;;  %v5677_v34 = vld [vmem:[%s6379_s5 + $0xc8] sm:$0xff]   ;;  %v5684_v41 = vld [vmem:[%s6379_s5 + $0x58] sm:$0xff]  }
 0x2ef   :  { %4167 = vmatpush1.bf16.msra.mxu1 %v5379_v7  ;;  %4004 = vmatprep.subr.bf16.mxu0 %v5386_v8  ;;  %v5436_v7 = vcombine.high %v916_v0, %v920_v2  ;;  %v923_v8 = vld [vmem:[#allocation8 + $0xf90] sm:$0xff]  ;;  %v5678_v36 = vld [vmem:[%s6379_s5 + $0x8] sm:$0xff]  }
 0x2f0   :  { %4168 = vmatprep.subr.bf16.mxu1 %v5388_v9  ;;  %v927_v9 = vld [vmem:[#allocation8 + $0xfb0] sm:$0xff]  ;;  %v5692_v61 = vld [vmem:[%s6379_s5 + $0x68] sm:$0xff]  }
 0x2f1   :  { %v5685_v42 = vld [vmem:[%s6379_s5 + $0xd8] sm:$0xff]   ;;  %v5693_v63 = vld [vmem:[%s6379_s5 + $0xe8] sm:$0xff]   ;;  %v5707_v22 = vld [vmem:[%s6379_s5 + $0x180] sm:$0xff]  }
 0x2f2   :  { %4005 = vmatpush1.bf16.msra.mxu0 %v5385_v18  ;;  %v5435_v18 = vcombine.low %v916_v0, %v920_v2  ;;  %v5694_v0 = vld [vmem:[%s6379_s5 + $0x28] sm:$0xff]   ;;  %v942_v2 = vrot.slane %v6135_v16, %v123_v44  ;;  %v5698_v44 = vld [vmem:[%s6379_s5 + $0x30] sm:$0xff]  }
 0x2f3   :  { %4169 = vmatpush1.bf16.msra.mxu1 %v5387_v19  ;;  %4006 = vmatprep.subr.bf16.mxu0 %v5394_v20  ;;  %v5442_v19 = vcombine.high %v923_v8, %v927_v9  ;;  %v5444_v20 = vcombine.high %v924_v10, %v928_v11 }
 0x2f4   :  { %4170 = vmatprep.subr.bf16.mxu1 %v5396_v21  ;;  %v931_v21 = vld [vmem:[#allocation8 + $0xfd0] sm:$0xff] }
 0x2f5   :  { %v5449_v46 = vcombine.low %v931_v21, %v935_v58 }
 0x2f6   :  { %4007 = vmatpush1.bf16.msra.mxu0 %v5393_v6  ;;  %v954_v6 = vrot.slane %v6135_v16, %v135_v47  ;;  %v5672_v47 = vld [vmem:[%s6379_s5 + $0x40] sm:$0xff]  }
 0x2f7   :  { %4171 = vmatpush1.bf16.msra.mxu1 %v5395_v25  ;;  %4008 = vmatprep.subr.bf16.mxu0 %v5402_v45  ;;  %v5441_v25 = vcombine.low %v923_v8, %v927_v9  ;;  %v5443_v45 = vcombine.low %v924_v10, %v928_v11  ;;  %v5606_v8 = vadd.f32 %v6127_v15, %v942_v2  ;;  %v5699_v9 = vld [vmem:[%s6379_s5 + $0xb0] sm:$0xff]   ;;  %v5701_v11 = vld [vmem:[%s6379_s5 + $0xf8] sm:$0xff]  }
 0x2f8   :  { %4172 = vmatprep.subr.bf16.mxu1 %v5404_v26  ;;  %v5450_v26 = vcombine.high %v931_v21, %v935_v58  ;;  %v5609_v40 = vadd.f32 %v6133_v57, %v954_v6  ;;  %v5675_v57 = vld [vmem:[%s6379_s5 + $0x80] sm:$0xff]   ;;  %v5702_v15 = vld [vmem:[%s6379_s5 + $0x38] sm:$0xff]   ;;  %v5709_v6 = vld [vmem:[%s6379_s5 + $0x1c8] sm:$0xff]  }
 0x2f9   :  { %v5706_v21 = vld [vmem:[%s6379_s5 + $0x100] sm:$0xff]  }
 0x2fa   :  { %4009 = vmatpush1.bf16.msra.mxu0 %v5401_v13  ;;  %v5673_v13 = vld [vmem:[%s6379_s5 + $0xc0] sm:$0xff]  }
 0x2fb   :  { %4173 = vmatpush1.bf16.msra.mxu1 %v5403_v29  ;;  %4010 = vmatprep.subr.bf16.mxu0 %v5410_v30  ;;  %v4196_v29 = vmax.f32 %v5607_v27, 0.0  ;;  %v4198_v30 = vmax.f32 %v5609_v40, 0.0  ;;  %v5714_v27 = vld [vmem:[%s6379_s5 + $0x110] sm:$0xff]  }
 0x2fc   :  { %4174 = vmatprep.subr.bf16.mxu1 %v5412_v31  ;;  %v5676_v31 = vld [vmem:[%s6379_s5 + $0x48] sm:$0xff]   ;;  %v5715_v40 = vld [vmem:[%s6379_s5 + $0x190] sm:$0xff]  }
 0x2fd   :  { %v4204_v32 = vpack.c.bf16 %v4196_v29, %v4196_v29  ;;  %v4206_v62 = vpack.c.bf16 %v4198_v30, %v4198_v30  ;;  %v5720_v29 = vld [vmem:[%s6379_s5 + $0x160] sm:$0xff]  }
 0x2fe   :  { %4011 = vmatpush1.bf16.msra.mxu0 %v5409_v37  ;;  %v5679_v37 = vld [vmem:[%s6379_s5 + $0x88] sm:$0xff]   ;;  %v5721_v30 = vld [vmem:[%s6379_s5 + $0x1e0] sm:$0xff]  }
 0x2ff   :  { %4175 = vmatpush1.bf16.msra.mxu1 %v5411_v38  ;;  %4012 = vmatprep.subr.bf16.mxu0 %v5418_v56  ;;  %v5680_v38 = vld [vmem:[%s6379_s5 + $0x50] sm:$0xff]  }
 0x300   :  { %4176 = vmatprep.subr.bf16.mxu1 %v5420_v39  ;;  %v5682_v56 = vld [vmem:[%s6379_s5 + $0x10] sm:$0xff]  }
 0x301   :  { %v5683_v39 = vld [vmem:[%s6379_s5 + $0x90] sm:$0xff]  }
 0x302   :  { %4013 = vmatpush1.bf16.msra.mxu0 %v5417_v4  ;;  %v5688_v4 = vld [vmem:[%s6379_s5 + $0x60] sm:$0xff]  }
 0x303   :  { %4177 = vmatpush1.bf16.msra.mxu1 %v5419_v53  ;;  %4014 = vmatprep.subr.bf16.mxu0 %v5426_v54  ;;  %v5689_v53 = vld [vmem:[%s6379_s5 + $0xe0] sm:$0xff]  }
 0x304   :  { %4178 = vmatprep.subr.bf16.mxu1 %v5428_v50  ;;  %v5690_v54 = vld [vmem:[%s6379_s5 + $0x20] sm:$0xff]  }
 0x305   :  { %v5691_v50 = vld [vmem:[%s6379_s5 + $0xa0] sm:$0xff]  }
 0x306   :  { %4015 = vmatpush1.bf16.msra.mxu0 %v5425_v60  ;;  %v5695_v60 = vld [vmem:[%s6379_s5 + $0xa8] sm:$0xff]  }
 0x307   :  { %4179 = vmatpush1.bf16.msra.mxu1 %v5427_v3  ;;  %4016 = vmatprep.subr.bf16.mxu0 %v5434_v5  ;;  %v5696_v3 = vld [vmem:[%s6379_s5 + $0x70] sm:$0xff]   ;;  %v950_v5 = vrot.slane %v6135_v16, %v131_v1  ;;  %v5700_v1 = vld [vmem:[%s6379_s5 + $0x78] sm:$0xff]  }
 0x308   :  { %4180 = vmatprep.subr.bf16.mxu1 %v5436_v7  ;;  %v5697_v7 = vld [vmem:[%s6379_s5 + $0xf0] sm:$0xff]  }
 0x309   :  { %v5608_v10 = vadd.f32 %v6129_v52, %v950_v5  ;;  %v5704_v52 = vld [vmem:[%s6379_s5 + $0x140] sm:$0xff]  }
 0x30a   :  { %4017 = vmatpush1.bf16.msra.mxu0 %v5433_v17  ;;  %v4195_v17 = vmax.f32 %v5606_v8, 0.0 }
 0x30b   :  { %4181 = vmatpush1.bf16.msra.mxu1 %v5435_v18  ;;  %4018 = vmatprep.subr.bf16.mxu0 %v5442_v19  ;;  %v5703_v18 = vld [vmem:[%s6379_s5 + $0xb8] sm:$0xff]   ;;  %v4197_v19 = vmax.f32 %v5608_v10, 0.0 }
 0x30c   :  { %4182 = vmatprep.subr.bf16.mxu1 %v5444_v20  ;;  %v5705_v20 = vld [vmem:[%s6379_s5 + $0x1c0] sm:$0xff]   ;;  %v4203_v58 = vpack.c.bf16 %v4195_v17, %v4195_v17 }
 0x30d   :  { %v4205_v33 = vpack.c.bf16 %v4197_v19, %v4197_v19 }
 0x30e   :  { %4019 = vmatpush1.bf16.msra.mxu0 %v5441_v25  ;;  %v5710_v25 = vld [vmem:[%s6379_s5 + $0x108] sm:$0xff]  }
 0x30f   :  { %4183 = vmatpush1.bf16.msra.mxu1 %v5443_v45  ;;  %4020 = vmatprep.subr.bf16.mxu0 %v5450_v26  ;;  %v5711_v45 = vld [vmem:[%s6379_s5 + $0x188] sm:$0xff]   ;;  %v5712_v26 = vld [vmem:[%s6379_s5 + $0x150] sm:$0xff]  }
 0x310   :  { %4184 = vmatprep.subr.bf16.mxu1 %v5452_v14  ;;  %v5713_v14 = vld [vmem:[%s6379_s5 + $0x1d0] sm:$0xff]  }
 0x312   :  { %4021 = vmatpush1.bf16.msra.mxu0 %v5449_v46  ;;  %v5716_v46 = vld [vmem:[%s6379_s5 + $0x158] sm:$0xff]  }
 0x313   :  { %4185 = vmatpush1.bf16.msra.mxu1 %v5451_v28  ;;  %5518 = vmatprep.subr.bf16.mxu0 %v5672_v47  ;;  %v5717_v28 = vld [vmem:[%s6379_s5 + $0x1d8] sm:$0xff]  }
 0x314   :  { %5540 = vmatprep.subr.bf16.mxu1 %v5673_v13  ;;  %v5718_v47 = vld [vmem:[%s6379_s5 + $0x118] sm:$0xff]  }
 0x315   :  { %4023 = vmatmul.mubr.bf16.vlgmr.msra.gmra.mrb[12].mxu0 %v6109_v24  ;;  %v5719_v13 = vld [vmem:[%s6379_s5 + $0x198] sm:$0xff]  }
 0x316   :  { %4187 = vmatmul.mubr.bf16.vlgmr.msra.gmra.mrb[12].mxu1 %v6109_v24  ;;  %5519 = vmatpush3.bf16.msra.mxu0 %v5674_v55  ;;  %v5681_v24 = vld [vmem:[%s6379_s5 + $0xd0] sm:$0xff]   ;;  %v5722_v55 = vld [vmem:[%s6379_s5 + $0x120] sm:$0xff]  }
 0x317   :  { %4762 = vmatprep.mubr.bf16.mxu0 %v4204_v32  ;;  %5541 = vmatpush3.bf16.msra.mxu1 %v5675_v57  ;;  %v5723_v57 = vld [vmem:[%s6379_s5 + $0x1a0] sm:$0xff]   ;;  %v5725_v32 = vld [vmem:[%s6379_s5 + $0x1e8] sm:$0xff]  }
 0x318   :  { %4802 = vmatprep.mubr.bf16.mxu1 %v4206_v62  ;;  %5520 = vmatprep.subr.bf16.mxu0 %v5676_v31  ;;  %v5724_v31 = vld [vmem:[%s6379_s5 + $0x168] sm:$0xff]  }
 0x319   :  { %5542 = vmatprep.subr.bf16.mxu1 %v5677_v34  ;;  %v5726_v34 = vld [vmem:[%s6379_s5 + $0x128] sm:$0xff]  }
 0x31a   :  { %5521 = vmatpush3.bf16.msra.mxu0 %v5678_v36  ;;  %v5727_v62 = vld [vmem:[%s6379_s5 + $0x1a8] sm:$0xff]   ;;  %v5728_v36 = vld [vmem:[%s6379_s5 + $0x170] sm:$0xff]  }
 0x31b   :  { %5543 = vmatpush3.bf16.msra.mxu1 %v5679_v37  ;;  %5522 = vmatprep.subr.bf16.mxu0 %v5680_v38  ;;  %v5729_v37 = vld [vmem:[%s6379_s5 + $0x1f0] sm:$0xff]  }
 0x31c   :  { %5544 = vmatprep.subr.bf16.mxu1 %v5681_v24  ;;  %v5730_v38 = vld [vmem:[%s6379_s5 + $0x130] sm:$0xff]  }
 0x31d   :  { %v5731_v24 = vld [vmem:[%s6379_s5 + $0x1b0] sm:$0xff]  }
 0x31e   :  { %5523 = vmatpush3.bf16.msra.mxu0 %v5682_v56  ;;  %v5732_v56 = vld [vmem:[%s6379_s5 + $0x178] sm:$0xff]  }
 0x31f   :  { %5545 = vmatpush3.bf16.msra.mxu1 %v5683_v39  ;;  %5524 = vmatprep.subr.bf16.mxu0 %v5684_v41  ;;  %v5733_v39 = vld [vmem:[%s6379_s5 + $0x1f8] sm:$0xff]  }
 0x320   :  { %5546 = vmatprep.subr.bf16.mxu1 %v5685_v42  ;;  %v5734_v41 = vld [vmem:[%s6379_s5 + $0x138] sm:$0xff]  }
 0x321   :  { %v5735_v42 = vld [vmem:[%s6379_s5 + $0x1b8] sm:$0xff]   ;;  %s5914_s5 = smov [#allocation13]  }
 0x322   :  { %5525 = vmatpush3.bf16.msra.mxu0 %v5686_v49  ;;  %v958_v49 = vrot.slane %v6135_v16, %v139_v48  ;;  %s4909_s9 = sshll.u32 %s5914_s5, 4  ;;  %s4910_s9 = int_to_ptr.vmem [resolvable:$true] %s4909_s9 }
 0x323   :  { %5547 = vmatpush3.bf16.msra.mxu1 %v5687_v51  ;;  %5526 = vmatprep.subr.bf16.mxu0 %v5688_v4  ;;  %v966_v51 = vrot.slane %v6135_v16, %v147_v35  ;;  %v962_v4 = vrot.slane %v6135_v16, %v143_v12  ;;  %s5873_s10 = scalar_lea.vmem %s4910_s9, 128  ;;  %p5878_p7 = scmp.lt.s32.totalorder %s4910_s9, %s4910_s9 }
 0x324   :  { %5548 = vmatprep.subr.bf16.mxu1 %v5689_v53  ;;  %v970_v53 = vrot.slane %v6135_v16, %v151_v59  ;;  %p5874_p6 = scmp.ne.s32.totalorder %s4910_s9, %s5873_s10  ;;  %p5879_p8 = scmp.lt.s32.totalorder %s5873_s10, %s5873_s10 }
 0x326   :  { %5527 = vmatpush3.bf16.msra.mxu0 %v5690_v54  ;;  %p5880_p9 = por %p5879_p8, %p5878_p7 }
 0x327   :  { %5549 = vmatpush3.bf16.msra.mxu1 %v5691_v50  ;;  %5528 = vmatprep.subr.bf16.mxu0 %v5692_v61 }
 0x328   :  { %5550 = vmatprep.subr.bf16.mxu1 %v5693_v63  ;;  %p5881_p10 = pnand %p5880_p9, %p5874_p6 }
 0x32a   :  { %5529 = vmatpush3.bf16.msra.mxu0 %v5694_v0 }
 0x32b   :  { %5551 = vmatpush3.bf16.msra.mxu1 %v5695_v60  ;;  %5530 = vmatprep.subr.bf16.mxu0 %v5696_v3 }
 0x32c   :  { %5552 = vmatprep.subr.bf16.mxu1 %v5697_v7 }
 0x32e   :  { %5531 = vmatpush3.bf16.msra.mxu0 %v5698_v44 }
 0x32f   :  { %5553 = vmatpush3.bf16.msra.mxu1 %v5699_v9  ;;  %5532 = vmatprep.subr.bf16.mxu0 %v5700_v1 }
 0x330   :  { %5554 = vmatprep.subr.bf16.mxu1 %v5701_v11 }
 0x332   :  { %5533 = vmatpush3.bf16.msra.mxu0 %v5702_v15  ;;  %v5453_v15 = vld [vmem:[#allocation11] ss:$0 sm:$0xff] }
 0x333   :  { %5555 = vmatpush3.bf16.msra.mxu1 %v5703_v18  ;;  %5562 = vmatprep.subr.bf16.mxu0 %v5704_v52 }
 0x334   :  { %5584 = vmatprep.subr.bf16.mxu1 %v5705_v20 }
 0x335   :  { %4763 = vmatmul.mubr.bf16.vlgmr.msra.gmra.mrb[16].mxu0 %v4203_v58 }
 0x336   :  { %4803 = vmatmul.mubr.bf16.vlgmr.msra.gmra.mrb[16].mxu1 %v4205_v33  ;;  %5563 = vmatpush3.bf16.msra.mxu0 %v5706_v21 }
 0x337   :  { %5585 = vmatpush3.bf16.msra.mxu1 %v5707_v22  ;;  %5564 = vmatprep.subr.bf16.mxu0 %v5708_v23 }
 0x338   :  { %5586 = vmatprep.subr.bf16.mxu1 %v5709_v6 }
 0x33a   :  { %5565 = vmatpush3.bf16.msra.mxu0 %v5710_v25 }
 0x33b   :  { %5587 = vmatpush3.bf16.msra.mxu1 %v5711_v45  ;;  %5566 = vmatprep.subr.bf16.mxu0 %v5712_v26 }
 0x33c   :  { %5588 = vmatprep.subr.bf16.mxu1 %v5713_v14 }
 0x33e   :  { %5567 = vmatpush3.bf16.msra.mxu0 %v5714_v27 }
 0x33f   :  { %5589 = vmatpush3.bf16.msra.mxu1 %v5715_v40  ;;  %5568 = vmatprep.subr.bf16.mxu0 %v5716_v46 }
 0x340   :  { %5590 = vmatprep.subr.bf16.mxu1 %v5717_v28 }
 0x342   :  { %5569 = vmatpush3.bf16.msra.mxu0 %v5718_v47 }
 0x343   :  { %5591 = vmatpush3.bf16.msra.mxu1 %v5719_v13  ;;  %5570 = vmatprep.subr.bf16.mxu0 %v5720_v29 }
 0x344   :  { %5592 = vmatprep.subr.bf16.mxu1 %v5721_v30 }
 0x346   :  { %5571 = vmatpush3.bf16.msra.mxu0 %v5722_v55 }
 0x347   :  { %5593 = vmatpush3.bf16.msra.mxu1 %v5723_v57  ;;  %5572 = vmatprep.subr.bf16.mxu0 %v5724_v31 }
 0x348   :  { %5594 = vmatprep.subr.bf16.mxu1 %v5725_v32 }
 0x34a   :  { %5573 = vmatpush3.bf16.msra.mxu0 %v5726_v34 }
 0x34b   :  { %5595 = vmatpush3.bf16.msra.mxu1 %v5727_v62  ;;  %5574 = vmatprep.subr.bf16.mxu0 %v5728_v36 }
 0x34c   :  { %5596 = vmatprep.subr.bf16.mxu1 %v5729_v37 }
 0x34e   :  { %5575 = vmatpush3.bf16.msra.mxu0 %v5730_v38 }
 0x34f   :  { %5597 = vmatpush3.bf16.msra.mxu1 %v5731_v24  ;;  %5576 = vmatprep.subr.bf16.mxu0 %v5732_v56 }
 0x350   :  { %5598 = vmatprep.subr.bf16.mxu1 %v5733_v39 }
 0x352   :  { %5577 = vmatpush3.bf16.msra.mxu0 %v5734_v41 }
 0x353   :  { %5599 = vmatpush3.bf16.msra.mxu1 %v5735_v42 }
 0x3e8   :  { %v4024_v54 = vpop.f32.mrb[12].mxu0 }
 0x3e9   :  { %v5610_v50 = vadd.f32 %v4024_v54, %v958_v49  ;;  %v4188_v61 = vpop.f32.mrb[12].mxu1  ;;  %v4026_v63 = vpop.f32.mrb[13].mxu0 }
 0x3ea   :  { %v5612_v0 = vadd.f32 %v4188_v61, %v966_v51  ;;  %v5611_v2 = vadd.f32 %v4026_v63, %v962_v4  ;;  %v4190_v60 = vpop.f32.mrb[13].mxu1  ;;  %v4028_v48 = vpop.f32.mrb[14].mxu0 }
 0x3eb   :  { %v4199_v3 = vmax.f32 %v5610_v50, 0.0  ;;  %v5613_v5 = vadd.f32 %v4190_v60, %v970_v53  ;;  %v4192_v7 = vpop.f32.mrb[14].mxu1  ;;  %v4029_v35 = vpop.f32.mrb[15].mxu0 }
 0x3ec   :  { %v4201_v44 = vmax.f32 %v5612_v0, 0.0  ;;  %v4200_v8 = vmax.f32 %v5611_v2, 0.0  ;;  %v4193_v9 = vpop.f32.mrb[15].mxu1 }
 0x3ed   :  { %v4202_v12 = vmax.f32 %v5613_v5, 0.0  ;;  %v4207_v43 = vpack.c.bf16 %v4199_v3, %v4199_v3 }
 0x3ee   :  { %v4208_v1 = vpack.c.bf16 %v4200_v8, %v4200_v8  ;;  %v4209_v59 = vpack.c.bf16 %v4201_v44, %v4201_v44 }
 0x3ef   :  { %v4210_v10 = vpack.c.bf16 %v4202_v12, %v4202_v12 }
 0x3f0   :  { %4842 = vmatprep.mubr.bf16.mxu0 %v4208_v1 }
 0x3f1   :  { %4882 = vmatprep.mubr.bf16.mxu1 %v4210_v10  ;;  %4843 = vmatmul.mubr.bf16.vlgmr.msra.gmra.mrb[20].mxu0 %v4207_v43 }
 0x3f2   :  { %4883 = vmatmul.mubr.bf16.vlgmr.msra.gmra.mrb[20].mxu1 %v4209_v59 }
 0x408   :  { %v5534_v16 = vpop.f32.mrb[16].mxu0 }
 0x409   :  { %v5556_v11 = vpop.f32.mrb[16].mxu1  ;;  %v5535_v17 = vpop.f32.mrb[17].mxu0 }
 0x40a   :  { %v5536_v18 = vadd.f32 %v5535_v17, %v5534_v16  ;;  %v5557_v52 = vpop.f32.mrb[17].mxu1  ;;  %v5537_v19 = vpop.f32.mrb[18].mxu0 }
 0x40b   :  { %v5558_v20 = vadd.f32 %v5557_v52, %v5556_v11  ;;  %v5559_v21 = vpop.f32.mrb[18].mxu1  ;;  %v5538_v58 = vpop.f32.mrb[19].mxu0 }
 0x40c   :  { %v4765_v22 = vadd.f32 %v5536_v18, %v5453_v15  ;;  %v5560_v23 = vpop.f32.mrb[19].mxu1 }
 0x40e   :  { %v4805_v33 = vadd.f32 %v5558_v20, %v4765_v22 }
 0x4c4   :  { %v5578_v6 = vpop.f32.mrb[20].mxu0 }
 0x4c5   :  { %v5600_v25 = vpop.f32.mrb[20].mxu1  ;;  %v5579_v45 = vpop.f32.mrb[21].mxu0 }
 0x4c6   :  { %v5580_v26 = vadd.f32 %v5579_v45, %v5578_v6  ;;  %v5601_v14 = vpop.f32.mrb[21].mxu1  ;;  %v5581_v27 = vpop.f32.mrb[22].mxu0 }
 0x4c7   :  { %v5602_v40 = vadd.f32 %v5601_v14, %v5600_v25  ;;  %v5603_v46 = vpop.f32.mrb[22].mxu1  ;;  %v5582_v28 = vpop.f32.mrb[23].mxu0 }
 0x4c8   :  { %v4845_v47 = vadd.f32 %v5580_v26, %v4805_v33  ;;  %v5604_v13 = vpop.f32.mrb[23].mxu1 }
 0x4ca   :  { %v4885_v29 = vadd.f32 %v5602_v40, %v4845_v47 }
 0x4cc   :  { %v4891_v30 = vsel %vm4890_vm1, %v4885_v29, -inf }
 0x4cd   :  { %4892 = vmax.xlane.f32.xlu0 %v4891_v30 }
 0x55a   :  { %v4893_v55 = vpop.xlane.xlu0 %4892 }
 0x55b   :  { %v4894_v57 = vsub.f32 %v4885_v29, %v4893_v55 }
 0x55d   :  { %v4895_v31 = vmul.f32 1.442695, %v4894_v57 }
 0x55f   :  { %5736 = vpow2.f32 %v4895_v31 }
 0x569   :  { %v5737_v32 = vpop.eup %5736 }
 0x56a   :  { %v4897_v34 = vsel %vm4890_vm1, %v5737_v32, 0.0 }
 0x56b   :  { %4898 = vadd.xlane.f32.xlu0 %v4897_v34 }
 0x5f8   :  { %v4899_v62 = vpop.xlane.xlu0 %4898 }
 0x5f9   :  { %5738 = vrcp.f32 %v4899_v62 }
 0x603   :  { %v5739_v36 = vpop.eup %5738 }
 0x604   :  { %v4901_v37 = vmul.f32 %v5739_v36, %v5737_v32 }
 0x606   :  { %4902 = vst.msk [vmem:[#allocation13] sm:$0xff] %vm4890_vm1, %v4901_v37 }
 0x607   :  { %5884 = shalt.err (!%p5881_p10)
}
 0x608   :  { %s5885_s14 = scalar_lea.hbm %s6381_s7, 128 }
 0x609   :  { %p5886_p11 = scmp.ne.s32.totalorder %s6381_s7, %s5885_s14  ;;  %p5889_p12 = scmp.lt.u32.totalorder %s5885_s14, %s6381_s7 }
 0x60b   :  { %p5891_p13 = pnand %p5889_p12, %p5886_p11 }
 0x60d   :  { %5894 = shalt.err (!%p5891_p13)
}
 0x60e   :  { %4912 = dma.vmem_to_hbm [thread:$0]  %s4910_s9, 128, %s6381_s7, [#allocation4]  }
 0x60f   :  { %5903 = dma.done.wait [#allocation4], 128  }
 0x610   :  { %5904 = vsyncadd [#allocation4], 4294967168 }
 0x611   :  { %4916 = vsyncpa [#allocation3], 1 }
 0x612   :  { %4917 = vsyncpa [#allocation6], 1 }
 0x613   :  { %4918 = vsyncpa [#allocation9], 1 }
 0x614   :  { %4919 = vsyncpa [#allocation12], 1 }
 0x615   :  { %4920 = vsyncpa [#allocation4], 1 }

</bundles_post_ra>
